<compile_context>
chip_gen: v6e
topology: v6e:2x2x1
jax: 0.10.0
libtpu: 0.0.40
codegen_flags: <defaults>
</compile_context>

<pallas_src>
import functools

import jax
import jax.numpy as jnp
from jax.experimental import pallas as pl
from jax.experimental.pallas import tpu as pltpu

SEQ = 62    # fixed by the PyTorch module (reshape(-1, 62 * hidden_size))
LANE = 128
SUB = 8


def _round_up(v, m):
    return ((v + m - 1) // m) * m


def _resident(shape):
    """Weights: constant block index -> DMA'd once, stay VMEM-resident."""
    n = len(shape)
    return pl.BlockSpec(shape, lambda i, _n=n: (0,) * _n)


def _fast_recip(x):
    # EUP approx reciprocal + one Newton step: ~f32 accuracy, frees VPU slots.
    r = pl.reciprocal(x, approx=True)
    return r * (2.0 - x * r)


# ----------------------------------------------------------------------------
# One-time parameter preparation (padding + expansion matrix), run outside jit
# ----------------------------------------------------------------------------
def prepare_params(params, hidden_dim):
    H = hidden_dim
    H1 = params["w1"].shape[1]
    H2 = params["w2"].shape[1]
    C = params["wc"].shape[1]
    H1P, H2P, CP = _round_up(H1, LANE), _round_up(H2, LANE), _round_up(C, LANE)
    SP = _round_up(SEQ, SUB)                               # 62 -> 64

    # fc1 rows are indexed by flattened (s, h); pad the s-dim and the out-dim.
    w1 = params["w1"].reshape(SEQ, H, H1)
    w1 = jnp.pad(w1, ((0, SP - SEQ), (0, 0), (0, H1P - H1))).reshape(SP * H, H1P)
    b1 = jnp.pad(params["b1"], ((0, 0), (0, H1P - H1)))
    w2 = jnp.pad(params["w2"], ((0, H1P - H1), (0, H2P - H2)))
    b2 = jnp.pad(params["b2"], ((0, 0), (0, H2P - H2)))
    wc = jnp.pad(params["wc"], ((0, H2P - H2), (0, CP - C)))
    bc = jnp.pad(params["bc"], ((0, 0), (0, CP - C)))

    # E[s, s*H + h] = 1 : expands attention weights (N, SP) -> (N, SP*H) with
    # one small MXU dot instead of a lane<->sublane relayout / flatten.
    lane = jnp.arange(SP * H, dtype=jnp.int32)[None, :] // H
    E = (lane == jnp.arange(SP, dtype=jnp.int32)[:, None]).astype(jnp.float32)

    return {"W_w": params["W_w"], "u_w_row": params["u_w"].reshape(1, H),
            "E": E, "w1": w1, "b1": b1, "w2": w2, "b2": b2, "wc": wc, "bc": bc}


# ----------------------------------------------------------------------------
# Fused per-domain forward (one pallas_call)
# ----------------------------------------------------------------------------
def _domain_forward(prep, x, *, hidden_2, num_class, block_b=None):
    N, S, H = x.shape
    SP = _round_up(S, SUB)
    SH = SP * H
    H1P = prep["w1"].shape[1]
    H2P = prep["w2"].shape[1]
    CP = prep["wc"].shape[1]
    D_out = H2P + 2 * CP                # [feat | logits | probs], 128-aligned

    # explicit 8-aligned sequence axis; the flat view is a contiguous reshape
    xp = jnp.pad(x, ((0, 0), (0, SP - S), (0, 0)))          # (N, SP, H)
    xf = xp.reshape(N, SH)                                   # (N, SP*H)

    if block_b is None:
        if N <= SUB:
            block_b = N
        else:
            # >= 2 grid steps so the "parallel" axis shards across both TCs.
            block_b = min(256, _round_up(pl.cdiv(N, 2), SUB))
            # keep per-step VMEM (double-buffered x3+xf+out + padded temps) bounded
            row_bytes = (2 * SP * H + SP * max(H, LANE) + SP * H
                         + 2 * H1P + 2 * H2P + D_out) * 4
            cap = max(SUB, ((28 << 20) // (2 * row_bytes)) // SUB * SUB)
            block_b = max(SUB, min(block_b, cap))
    nb = pl.cdiv(N, block_b)

    weight_bytes = sum(int(v.size) for v in prep.values()) * 4
    est = (2 * weight_bytes
           + 2 * block_b * (2 * SP * H + D_out) * 4
           + block_b * (SP * max(H, LANE) + SP * H + 2 * H1P + 2 * H2P) * 4)
    # clamp to ~56 MiB for v7x headroom; very large configs should K-tile w1.
    vmem_limit = int(min(max(est * 3 // 2, 32 << 20), 56 << 20))

    def kernel(x3_ref, xf_ref, e_ref, ww_ref, uw_ref, w1_ref, b1_ref,
               w2_ref, b2_ref, wc_ref, bc_ref, out_ref):
        TB = x3_ref.shape[0]
        x3 = x3_ref[...]                                     # (TB, SP, H)

        # attention projection: one MXU push over all rows; SP % 8 == 0 keeps
        # the reshape sublane-group preserving (layout-cheap).
        score = jnp.tanh(jnp.dot(x3.reshape(TB * SP, H), ww_ref[...],
                                 preferred_element_type=jnp.float32))
        # score @ u_w (N=1) -> VPU multiply + lane reduction, no 1-col matmul
        al = jnp.sum(score.reshape(TB, SP, H) * uw_ref[...][None, :, :],
                     axis=-1)                                # (TB, SP)

        # masked softmax over the (padded) sequence axis
        s_idx = jax.lax.broadcasted_iota(jnp.int32, (TB, SP), 1)
        al = jnp.where(s_idx < S, al, jnp.float32(-1e30))
        e = jnp.exp(al - jnp.max(al, axis=1, keepdims=True))
        a = e * _fast_recip(jnp.sum(e, axis=1, keepdims=True))       # (TB, SP)

        # expand per-position weights across their H lanes via a tiny MXU dot
        # against the 0/1 expansion matrix -> no in-kernel flatten/relayout.
        a_exp = jnp.dot(a, e_ref[...], preferred_element_type=jnp.float32)
        sx = xf_ref[...] * a_exp                                      # (TB, SP*H)

        # MLP (all lane-dense: H1P / H2P are multiples of 128)
        h = jnp.dot(sx, w1_ref[...], preferred_element_type=jnp.float32) + b1_ref[...]
        h = jnp.maximum(h, 0.0)
        h = jnp.dot(h, w2_ref[...], preferred_element_type=jnp.float32) + b2_ref[...]
        h = jnp.maximum(h, 0.0)                                       # (TB, H2P)

        # classifier: MXU dot with 128-padded class dim, masked class softmax
        logits = jnp.dot(h, wc_ref[...], preferred_element_type=jnp.float32) + bc_ref[...]
        c_idx = jax.lax.broadcasted_iota(jnp.int32, (TB, CP), 1)
        lm = jnp.where(c_idx < num_class, logits, jnp.float32(-1e30))
        ee = jnp.exp(lm - jnp.max(lm, axis=1, keepdims=True))
        probs = ee * _fast_recip(jnp.sum(ee, axis=1, keepdims=True))

        # 128-aligned packed output slab -> unmasked full-tile stores
        out_ref[:, :H2P] = h
        out_ref[:, H2P:H2P + CP] = logits
        out_ref[:, H2P + CP:] = probs

    out = pl.pallas_call(
        kernel,
        out_shape=jax.ShapeDtypeStruct((N, D_out), jnp.float32),
        grid=(nb,),
        in_specs=[
            pl.BlockSpec((block_b, SP, H), lambda i: (i, 0, 0)),
            pl.BlockSpec((block_b, SH), lambda i: (i, 0)),
            _resident(prep["E"].shape),
            _resident(prep["W_w"].shape),
            _resident(prep["u_w_row"].shape),
            _resident(prep["w1"].shape),
            _resident(prep["b1"].shape),
            _resident(prep["w2"].shape),
            _resident(prep["b2"].shape),
            _resident(prep["wc"].shape),
            _resident(prep["bc"].shape),
        ],
        out_specs=pl.BlockSpec((block_b, D_out), lambda i: (i, 0)),
        compiler_params=pltpu.CompilerParams(
            dimension_semantics=("parallel",),
            vmem_limit_bytes=vmem_limit),
    )(xp, xf, prep["E"], prep["W_w"], prep["u_w_row"], prep["w1"], prep["b1"],
      prep["w2"], prep["b2"], prep["wc"], prep["bc"])

    feat = out[:, :hidden_2]
    logits = out[:, H2P:H2P + num_class]
    probs = out[:, H2P + CP:H2P + CP + num_class]
    return feat, logits, probs


def dann_withatt_forward(prep, source, target, source_label=None, *,
                         hidden_2, num_class):
    del source_label   # only used by the training loss in the original module
    feat_s, logit_s, prob_s = _domain_forward(prep, source,
                                              hidden_2=hidden_2, num_class=num_class)
    feat_t, _logit_t, prob_t = _domain_forward(prep, target,
                                               hidden_2=hidden_2, num_class=num_class)
    # (source_predict, feature_source_f, feature_target_f,
    #  source_label_feature, target_label_feature)
    return logit_s, feat_s, feat_t, prob_s, prob_t


# ----------------------------------------------------------------------------
# Parameter init (mirrors the PyTorch module; dropout layers unused in forward)
# ----------------------------------------------------------------------------
def init_params(key, hidden_1, hidden_2, num_of_class, hidden_dim):
    ks = jax.random.split(key, 8)
    d_in = hidden_dim * SEQ

    def lin(kw, kb, fan_in, fan_out):
        lim = 1.0 / jnp.sqrt(fan_in)
        w = jax.random.uniform(kw, (fan_in, fan_out), jnp.float32, -lim, lim)
        b = jax.random.uniform(kb, (1, fan_out), jnp.float32, -lim, lim)
        return w, b

    params = {}
    params["W_w"] = jax.random.uniform(ks[0], (hidden_dim, hidden_dim),
                                       jnp.float32, -0.1, 0.1)
    params["u_w"] = jax.random.uniform(ks[1], (hidden_dim, 1),
                                       jnp.float32, -0.1, 0.1)
    params["w1"], params["b1"] = lin(ks[2], ks[3], d_in, hidden_1)
    params["w2"], params["b2"] = lin(ks[4], ks[5], hidden_1, hidden_2)
    params["wc"], params["bc"] = lin(ks[6], ks[7], hidden_2, num_of_class)
    return params


# ----------------------------------------------------------------------------
# Pure-JAX reference for verification
# ----------------------------------------------------------------------------
def _ref_extract(params, x):
    score = jnp.tanh(jnp.einsum("bsh,hk->bsk", x, params["W_w"]))
    a = jax.nn.softmax(jnp.einsum("bsh,hk->bsk", score, params["u_w"]), axis=1)
    sx = (x * a).reshape(x.shape[0], -1)
    h = jax.nn.relu(sx @ params["w1"] + params["b1"])
    h = jax.nn.relu(h @ params["w2"] + params["b2"])
    return h


def _ref_forward(params, source, target):
    fs = _ref_extract(params, source)
    ft = _ref_extract(params, target)
    ls = fs @ params["wc"] + params["bc"]
    return ls, fs, ft, jax.nn.softmax(ls, axis=1), jax.nn.softmax(
        ft @ params["wc"] + params["bc"], axis=1)


if __name__ == "__main__":
    B, H = 4, 16                 # batch, hidden_dim
    hidden_1, hidden_2 = 64, 32
    num_of_class = 4

    key = jax.random.PRNGKey(0)
    kp, ks, kt = jax.random.split(key, 3)
    params = init_params(kp, hidden_1, hidden_2, num_of_class, H)
    source = jax.random.normal(ks, (B, SEQ, H), jnp.float32)
    target = jax.random.normal(kt, (B, SEQ, H), jnp.float32)

    prep = prepare_params(params, H)      # one-time weight padding (outside jit)
    fwd = jax.jit(functools.partial(dann_withatt_forward,
                                    hidden_2=hidden_2, num_class=num_of_class))
    outs = jax.block_until_ready(fwd(prep, source, target))

    refs = _ref_forward(params, source, target)
    for o, r in zip(outs, refs):
        assert o.shape == r.shape, (o.shape, r.shape)
        assert jnp.allclose(o, r, atol=1e-4, rtol=1e-4), "mismatch vs reference"

    print("KERNEL_OK")
</pallas_src>

<mosaic_0001>
module attributes {stable_mosaic.version = 11 : i64} {
  func.func @kernel(%arg0: i32, %arg1: memref<4x64x16xf32, #tpu.memory_space<vmem>>, %arg2: memref<4x1024xf32, #tpu.memory_space<vmem>>, %arg3: memref<64x1024xf32, #tpu.memory_space<vmem>>, %arg4: memref<16x16xf32, #tpu.memory_space<vmem>>, %arg5: memref<1x16xf32, #tpu.memory_space<vmem>>, %arg6: memref<1024x128xf32, #tpu.memory_space<vmem>>, %arg7: memref<1x128xf32, #tpu.memory_space<vmem>>, %arg8: memref<128x128xf32, #tpu.memory_space<vmem>>, %arg9: memref<1x128xf32, #tpu.memory_space<vmem>>, %arg10: memref<128x128xf32, #tpu.memory_space<vmem>>, %arg11: memref<1x128xf32, #tpu.memory_space<vmem>>, %arg12: memref<4x384xf32, #tpu.memory_space<vmem>>) attributes {dimension_semantics = [#tpu.dimension_semantics<parallel>], iteration_bounds = array<i64: 1>, scalar_prefetch = 0 : i64, scratch_operands = 0 : i64, tpu.core_type = #tpu.core_type<tc>, window_params = [{transform_indices = @transform_0, window_bounds = array<i64: 4, 64, 16>}, {transform_indices = @transform_1, window_bounds = array<i64: 4, 1024>}, {pipeline_mode = #tpu.pipeline_mode<synchronous>, transform_indices = @transform_2, window_bounds = array<i64: 64, 1024>}, {pipeline_mode = #tpu.pipeline_mode<synchronous>, transform_indices = @transform_3, window_bounds = array<i64: 16, 16>}, {pipeline_mode = #tpu.pipeline_mode<synchronous>, transform_indices = @transform_4, window_bounds = array<i64: 1, 16>}, {pipeline_mode = #tpu.pipeline_mode<synchronous>, transform_indices = @transform_5, window_bounds = array<i64: 1024, 128>}, {pipeline_mode = #tpu.pipeline_mode<synchronous>, transform_indices = @transform_6, window_bounds = array<i64: 1, 128>}, {pipeline_mode = #tpu.pipeline_mode<synchronous>, transform_indices = @transform_7, window_bounds = array<i64: 128, 128>}, {pipeline_mode = #tpu.pipeline_mode<synchronous>, transform_indices = @transform_8, window_bounds = array<i64: 1, 128>}, {pipeline_mode = #tpu.pipeline_mode<synchronous>, transform_indices = @transform_9, window_bounds = array<i64: 128, 128>}, {pipeline_mode = #tpu.pipeline_mode<synchronous>, transform_indices = @transform_10, window_bounds = array<i64: 1, 128>}, {transform_indices = @transform_11, window_bounds = array<i64: 4, 384>}]} {
    %c0 = arith.constant 0 : index
    %c0_0 = arith.constant 0 : index
    %c0_1 = arith.constant 0 : index
    %0 = vector.load %arg1[%c0, %c0_0, %c0_1] : memref<4x64x16xf32, #tpu.memory_space<vmem>>, vector<4x64x16xf32>
    %1 = vector.shape_cast %0 : vector<4x64x16xf32> to vector<256x16xf32>
    %c0_2 = arith.constant 0 : index
    %c0_3 = arith.constant 0 : index
    %2 = vector.load %arg4[%c0_2, %c0_3] : memref<16x16xf32, #tpu.memory_space<vmem>>, vector<16x16xf32>
    %cst = arith.constant dense<0.000000e+00> : vector<256x16xf32>
    %3 = tpu.matmul %1, %2, %cst {dimension_numbers = #tpu.dot_dimension_numbers<[1], [0], [0], [1], [0, 0, 1, 1], [], []>} : vector<256x16xf32>, vector<16x16xf32>, vector<256x16xf32> -> vector<256x16xf32>
    %4 = math.tanh %3 : vector<256x16xf32>
    %5 = vector.shape_cast %4 : vector<256x16xf32> to vector<4x64x16xf32>
    %c0_4 = arith.constant 0 : index
    %c0_5 = arith.constant 0 : index
    %6 = vector.load %arg5[%c0_4, %c0_5] : memref<1x16xf32, #tpu.memory_space<vmem>>, vector<1x16xf32>
    %7 = vector.shape_cast %6 : vector<1x16xf32> to vector<1x1x16xf32>
    %8 = vector.broadcast %7 : vector<1x1x16xf32> to vector<4x64x16xf32>
    %9 = arith.mulf %5, %8 : vector<4x64x16xf32>
    %cst_6 = arith.constant dense<0.000000e+00> : vector<4x64xf32>
    %10 = vector.multi_reduction <add>, %9, %cst_6 [2] : vector<4x64x16xf32> to vector<4x64xf32>
    %11 = tpu.iota {dimensions = array<i32: 1>} : vector<4x64xi32>
    %c62_i32 = arith.constant 62 : i32
    %12 = vector.broadcast %c62_i32 : i32 to vector<4x64xi32>
    %13 = arith.cmpi slt, %11, %12 : vector<4x64xi32>
    %cst_7 = arith.constant -1.000000e+30 : f32
    %14 = vector.broadcast %cst_7 : f32 to vector<4x64xf32>
    %15 = arith.select %13, %10, %14 : vector<4x64xi1>, vector<4x64xf32>
    %cst_8 = arith.constant dense<0xFF800000> : vector<4xf32>
    %16 = vector.multi_reduction <maximumf>, %15, %cst_8 [1] : vector<4x64xf32> to vector<4xf32>
    %17 = vector.shape_cast %16 : vector<4xf32> to vector<4x1xf32>
    %18 = vector.broadcast %17 : vector<4x1xf32> to vector<4x64xf32>
    %19 = arith.subf %15, %18 : vector<4x64xf32>
    %20 = math.exp %19 : vector<4x64xf32>
    %cst_9 = arith.constant dense<0.000000e+00> : vector<4xf32>
    %21 = vector.multi_reduction <add>, %20, %cst_9 [1] : vector<4x64xf32> to vector<4xf32>
    %22 = vector.shape_cast %21 : vector<4xf32> to vector<4x1xf32>
    %23 = tpu.reciprocal %22 {approx = true} : vector<4x1xf32> -> vector<4x1xf32>
    %24 = arith.mulf %22, %23 : vector<4x1xf32>
    %cst_10 = arith.constant 2.000000e+00 : f32
    %25 = vector.broadcast %cst_10 : f32 to vector<4x1xf32>
    %26 = arith.subf %25, %24 : vector<4x1xf32>
    %27 = arith.mulf %23, %26 : vector<4x1xf32>
    %28 = vector.broadcast %27 : vector<4x1xf32> to vector<4x64xf32>
    %29 = arith.mulf %20, %28 : vector<4x64xf32>
    %c0_11 = arith.constant 0 : index
    %c0_12 = arith.constant 0 : index
    %30 = vector.load %arg3[%c0_11, %c0_12] : memref<64x1024xf32, #tpu.memory_space<vmem>>, vector<64x1024xf32>
    %cst_13 = arith.constant dense<0.000000e+00> : vector<4x1024xf32>
    %31 = tpu.matmul %29, %30, %cst_13 {dimension_numbers = #tpu.dot_dimension_numbers<[1], [0], [0], [1], [0, 0, 1, 1], [], []>} : vector<4x64xf32>, vector<64x1024xf32>, vector<4x1024xf32> -> vector<4x1024xf32>
    %c0_14 = arith.constant 0 : index
    %c0_15 = arith.constant 0 : index
    %32 = vector.load %arg2[%c0_14, %c0_15] : memref<4x1024xf32, #tpu.memory_space<vmem>>, vector<4x1024xf32>
    %33 = arith.mulf %32, %31 : vector<4x1024xf32>
    %c0_16 = arith.constant 0 : index
    %c0_17 = arith.constant 0 : index
    %34 = vector.load %arg6[%c0_16, %c0_17] : memref<1024x128xf32, #tpu.memory_space<vmem>>, vector<1024x128xf32>
    %cst_18 = arith.constant dense<0.000000e+00> : vector<4x128xf32>
    %35 = tpu.matmul %33, %34, %cst_18 {dimension_numbers = #tpu.dot_dimension_numbers<[1], [0], [0], [1], [0, 0, 1, 1], [], []>} : vector<4x1024xf32>, vector<1024x128xf32>, vector<4x128xf32> -> vector<4x128xf32>
    %c0_19 = arith.constant 0 : index
    %c0_20 = arith.constant 0 : index
    %36 = vector.load %arg7[%c0_19, %c0_20] : memref<1x128xf32, #tpu.memory_space<vmem>>, vector<1x128xf32>
    %37 = vector.broadcast %36 : vector<1x128xf32> to vector<4x128xf32>
    %38 = arith.addf %35, %37 : vector<4x128xf32>
    %cst_21 = arith.constant 0.000000e+00 : f32
    %39 = vector.broadcast %cst_21 : f32 to vector<4x128xf32>
    %40 = arith.maximumf %38, %39 : vector<4x128xf32>
    %c0_22 = arith.constant 0 : index
    %c0_23 = arith.constant 0 : index
    %41 = vector.load %arg8[%c0_22, %c0_23] : memref<128x128xf32, #tpu.memory_space<vmem>>, vector<128x128xf32>
    %cst_24 = arith.constant dense<0.000000e+00> : vector<4x128xf32>
    %42 = tpu.matmul %40, %41, %cst_24 {dimension_numbers = #tpu.dot_dimension_numbers<[1], [0], [0], [1], [0, 0, 1, 1], [], []>} : vector<4x128xf32>, vector<128x128xf32>, vector<4x128xf32> -> vector<4x128xf32>
    %c0_25 = arith.constant 0 : index
    %c0_26 = arith.constant 0 : index
    %43 = vector.load %arg9[%c0_25, %c0_26] : memref<1x128xf32, #tpu.memory_space<vmem>>, vector<1x128xf32>
    %44 = vector.broadcast %43 : vector<1x128xf32> to vector<4x128xf32>
    %45 = arith.addf %42, %44 : vector<4x128xf32>
    %cst_27 = arith.constant 0.000000e+00 : f32
    %46 = vector.broadcast %cst_27 : f32 to vector<4x128xf32>
    %47 = arith.maximumf %45, %46 : vector<4x128xf32>
    %c0_28 = arith.constant 0 : index
    %c0_29 = arith.constant 0 : index
    %48 = vector.load %arg10[%c0_28, %c0_29] : memref<128x128xf32, #tpu.memory_space<vmem>>, vector<128x128xf32>
    %cst_30 = arith.constant dense<0.000000e+00> : vector<4x128xf32>
    %49 = tpu.matmul %47, %48, %cst_30 {dimension_numbers = #tpu.dot_dimension_numbers<[1], [0], [0], [1], [0, 0, 1, 1], [], []>} : vector<4x128xf32>, vector<128x128xf32>, vector<4x128xf32> -> vector<4x128xf32>
    %c0_31 = arith.constant 0 : index
    %c0_32 = arith.constant 0 : index
    %50 = vector.load %arg11[%c0_31, %c0_32] : memref<1x128xf32, #tpu.memory_space<vmem>>, vector<1x128xf32>
    %51 = vector.broadcast %50 : vector<1x128xf32> to vector<4x128xf32>
    %52 = arith.addf %49, %51 : vector<4x128xf32>
    %53 = tpu.iota {dimensions = array<i32: 1>} : vector<4x128xi32>
    %c4_i32 = arith.constant 4 : i32
    %54 = vector.broadcast %c4_i32 : i32 to vector<4x128xi32>
    %55 = arith.cmpi slt, %53, %54 : vector<4x128xi32>
    %cst_33 = arith.constant -1.000000e+30 : f32
    %56 = vector.broadcast %cst_33 : f32 to vector<4x128xf32>
    %57 = arith.select %55, %52, %56 : vector<4x128xi1>, vector<4x128xf32>
    %cst_34 = arith.constant dense<0xFF800000> : vector<4xf32>
    %58 = vector.multi_reduction <maximumf>, %57, %cst_34 [1] : vector<4x128xf32> to vector<4xf32>
    %59 = vector.shape_cast %58 : vector<4xf32> to vector<4x1xf32>
    %60 = vector.broadcast %59 : vector<4x1xf32> to vector<4x128xf32>
    %61 = arith.subf %57, %60 : vector<4x128xf32>
    %62 = math.exp %61 : vector<4x128xf32>
    %cst_35 = arith.constant dense<0.000000e+00> : vector<4xf32>
    %63 = vector.multi_reduction <add>, %62, %cst_35 [1] : vector<4x128xf32> to vector<4xf32>
    %64 = vector.shape_cast %63 : vector<4xf32> to vector<4x1xf32>
    %65 = tpu.reciprocal %64 {approx = true} : vector<4x1xf32> -> vector<4x1xf32>
    %66 = arith.mulf %64, %65 : vector<4x1xf32>
    %cst_36 = arith.constant 2.000000e+00 : f32
    %67 = vector.broadcast %cst_36 : f32 to vector<4x1xf32>
    %68 = arith.subf %67, %66 : vector<4x1xf32>
    %69 = arith.mulf %65, %68 : vector<4x1xf32>
    %70 = vector.broadcast %69 : vector<4x1xf32> to vector<4x128xf32>
    %71 = arith.mulf %62, %70 : vector<4x128xf32>
    %c0_37 = arith.constant 0 : index
    %c0_38 = arith.constant 0 : index
    %72 = vector.load %arg12[%c0_37, %c0_38] : memref<4x384xf32, #tpu.memory_space<vmem>>, vector<4x128xf32>
    tpu.vector_store %arg12[%c0_37, %c0_38], %47 {strides = array<i32>} : memref<4x384xf32, #tpu.memory_space<vmem>>, vector<4x128xf32>,
    %c0_39 = arith.constant 0 : index
    %c128 = arith.constant 128 : index
    %73 = vector.load %arg12[%c0_39, %c128] : memref<4x384xf32, #tpu.memory_space<vmem>>, vector<4x128xf32>
    tpu.vector_store %arg12[%c0_39, %c128], %52 {strides = array<i32>} : memref<4x384xf32, #tpu.memory_space<vmem>>, vector<4x128xf32>,
    %c0_40 = arith.constant 0 : index
    %c256 = arith.constant 256 : index
    %74 = vector.load %arg12[%c0_40, %c256] : memref<4x384xf32, #tpu.memory_space<vmem>>, vector<4x128xf32>
    tpu.vector_store %arg12[%c0_40, %c256], %71 {strides = array<i32>} : memref<4x384xf32, #tpu.memory_space<vmem>>, vector<4x128xf32>,
    return
  }
  func.func @transform_0(%arg0: i32) -> (i32, i32, i32) {
    %c0_i32 = arith.constant 0 : i32
    %c0_i32_0 = arith.constant 0 : i32
    %c0_i32_1 = arith.constant 0 : i32
    return %arg0, %c0_i32, %c0_i32_0 : i32, i32, i32
  }
  func.func @transform_1(%arg0: i32) -> (i32, i32) {
    %c0_i32 = arith.constant 0 : i32
    %c0_i32_0 = arith.constant 0 : i32
    return %arg0, %c0_i32 : i32, i32
  }
  func.func @transform_2(%arg0: i32) -> (i32, i32) {
    %c0_i32 = arith.constant 0 : i32
    %c0_i32_0 = arith.constant 0 : i32
    %c0_i32_1 = arith.constant 0 : i32
    return %c0_i32, %c0_i32_0 : i32, i32
  }
  func.func @transform_3(%arg0: i32) -> (i32, i32) {
    %c0_i32 = arith.constant 0 : i32
    %c0_i32_0 = arith.constant 0 : i32
    %c0_i32_1 = arith.constant 0 : i32
    return %c0_i32, %c0_i32_0 : i32, i32
  }
  func.func @transform_4(%arg0: i32) -> (i32, i32) {
    %c0_i32 = arith.constant 0 : i32
    %c0_i32_0 = arith.constant 0 : i32
    %c0_i32_1 = arith.constant 0 : i32
    return %c0_i32, %c0_i32_0 : i32, i32
  }
  func.func @transform_5(%arg0: i32) -> (i32, i32) {
    %c0_i32 = arith.constant 0 : i32
    %c0_i32_0 = arith.constant 0 : i32
    %c0_i32_1 = arith.constant 0 : i32
    return %c0_i32, %c0_i32_0 : i32, i32
  }
  func.func @transform_6(%arg0: i32) -> (i32, i32) {
    %c0_i32 = arith.constant 0 : i32
    %c0_i32_0 = arith.constant 0 : i32
    %c0_i32_1 = arith.constant 0 : i32
    return %c0_i32, %c0_i32_0 : i32, i32
  }
  func.func @transform_7(%arg0: i32) -> (i32, i32) {
    %c0_i32 = arith.constant 0 : i32
    %c0_i32_0 = arith.constant 0 : i32
    %c0_i32_1 = arith.constant 0 : i32
    return %c0_i32, %c0_i32_0 : i32, i32
  }
  func.func @transform_8(%arg0: i32) -> (i32, i32) {
    %c0_i32 = arith.constant 0 : i32
    %c0_i32_0 = arith.constant 0 : i32
    %c0_i32_1 = arith.constant 0 : i32
    return %c0_i32, %c0_i32_0 : i32, i32
  }
  func.func @transform_9(%arg0: i32) -> (i32, i32) {
    %c0_i32 = arith.constant 0 : i32
    %c0_i32_0 = arith.constant 0 : i32
    %c0_i32_1 = arith.constant 0 : i32
    return %c0_i32, %c0_i32_0 : i32, i32
  }
  func.func @transform_10(%arg0: i32) -> (i32, i32) {
    %c0_i32 = arith.constant 0 : i32
    %c0_i32_0 = arith.constant 0 : i32
    %c0_i32_1 = arith.constant 0 : i32
    return %c0_i32, %c0_i32_0 : i32, i32
  }
  func.func @transform_11(%arg0: i32) -> (i32, i32) {
    %c0_i32 = arith.constant 0 : i32
    %c0_i32_0 = arith.constant 0 : i32
    return %arg0, %c0_i32 : i32, i32
  }
}

module attributes {stable_mosaic.version = 11 : i64} {
  func.func @kernel(%arg0: i32, %arg1: memref<4x64x16xf32, #tpu.memory_space<vmem>>, %arg2: memref<4x1024xf32, #tpu.memory_space<vmem>>, %arg3: memref<64x1024xf32, #tpu.memory_space<vmem>>, %arg4: memref<16x16xf32, #tpu.memory_space<vmem>>, %arg5: memref<1x16xf32, #tpu.memory_space<vmem>>, %arg6: memref<1024x128xf32, #tpu.memory_space<vmem>>, %arg7: memref<1x128xf32, #tpu.memory_space<vmem>>, %arg8: memref<128x128xf32, #tpu.memory_space<vmem>>, %arg9: memref<1x128xf32, #tpu.memory_space<vmem>>, %arg10: memref<128x128xf32, #tpu.memory_space<vmem>>, %arg11: memref<1x128xf32, #tpu.memory_space<vmem>>, %arg12: memref<4x384xf32, #tpu.memory_space<vmem>>) attributes {dimension_semantics = [#tpu.dimension_semantics<parallel>], iteration_bounds = array<i64: 1>, scalar_prefetch = 0 : i64, scratch_operands = 0 : i64, tpu.core_type = #tpu.core_type<tc>, window_params = [{transform_indices = @transform_0, window_bounds = array<i64: 4, 64, 16>}, {transform_indices = @transform_1, window_bounds = array<i64: 4, 1024>}, {pipeline_mode = #tpu.pipeline_mode<synchronous>, transform_indices = @transform_2, window_bounds = array<i64: 64, 1024>}, {pipeline_mode = #tpu.pipeline_mode<synchronous>, transform_indices = @transform_3, window_bounds = array<i64: 16, 16>}, {pipeline_mode = #tpu.pipeline_mode<synchronous>, transform_indices = @transform_4, window_bounds = array<i64: 1, 16>}, {pipeline_mode = #tpu.pipeline_mode<synchronous>, transform_indices = @transform_5, window_bounds = array<i64: 1024, 128>}, {pipeline_mode = #tpu.pipeline_mode<synchronous>, transform_indices = @transform_6, window_bounds = array<i64: 1, 128>}, {pipeline_mode = #tpu.pipeline_mode<synchronous>, transform_indices = @transform_7, window_bounds = array<i64: 128, 128>}, {pipeline_mode = #tpu.pipeline_mode<synchronous>, transform_indices = @transform_8, window_bounds = array<i64: 1, 128>}, {pipeline_mode = #tpu.pipeline_mode<synchronous>, transform_indices = @transform_9, window_bounds = array<i64: 128, 128>}, {pipeline_mode = #tpu.pipeline_mode<synchronous>, transform_indices = @transform_10, window_bounds = array<i64: 1, 128>}, {transform_indices = @transform_11, window_bounds = array<i64: 4, 384>}]} {
    %c0 = arith.constant 0 : index
    %c0_0 = arith.constant 0 : index
    %c0_1 = arith.constant 0 : index
    %0 = vector.load %arg1[%c0, %c0_0, %c0_1] : memref<4x64x16xf32, #tpu.memory_space<vmem>>, vector<4x64x16xf32>
    %1 = vector.shape_cast %0 : vector<4x64x16xf32> to vector<256x16xf32>
    %c0_2 = arith.constant 0 : index
    %c0_3 = arith.constant 0 : index
    %2 = vector.load %arg4[%c0_2, %c0_3] : memref<16x16xf32, #tpu.memory_space<vmem>>, vector<16x16xf32>
    %cst = arith.constant dense<0.000000e+00> : vector<256x16xf32>
    %3 = tpu.matmul %1, %2, %cst {dimension_numbers = #tpu.dot_dimension_numbers<[1], [0], [0], [1], [0, 0, 1, 1], [], []>} : vector<256x16xf32>, vector<16x16xf32>, vector<256x16xf32> -> vector<256x16xf32>
    %4 = math.tanh %3 : vector<256x16xf32>
    %5 = vector.shape_cast %4 : vector<256x16xf32> to vector<4x64x16xf32>
    %c0_4 = arith.constant 0 : index
    %c0_5 = arith.constant 0 : index
    %6 = vector.load %arg5[%c0_4, %c0_5] : memref<1x16xf32, #tpu.memory_space<vmem>>, vector<1x16xf32>
    %7 = vector.shape_cast %6 : vector<1x16xf32> to vector<1x1x16xf32>
    %8 = vector.broadcast %7 : vector<1x1x16xf32> to vector<4x64x16xf32>
    %9 = arith.mulf %5, %8 : vector<4x64x16xf32>
    %cst_6 = arith.constant dense<0.000000e+00> : vector<4x64xf32>
    %10 = vector.multi_reduction <add>, %9, %cst_6 [2] : vector<4x64x16xf32> to vector<4x64xf32>
    %11 = tpu.iota {dimensions = array<i32: 1>} : vector<4x64xi32>
    %c62_i32 = arith.constant 62 : i32
    %12 = vector.broadcast %c62_i32 : i32 to vector<4x64xi32>
    %13 = arith.cmpi slt, %11, %12 : vector<4x64xi32>
    %cst_7 = arith.constant -1.000000e+30 : f32
    %14 = vector.broadcast %cst_7 : f32 to vector<4x64xf32>
    %15 = arith.select %13, %10, %14 : vector<4x64xi1>, vector<4x64xf32>
    %cst_8 = arith.constant dense<0xFF800000> : vector<4xf32>
    %16 = vector.multi_reduction <maximumf>, %15, %cst_8 [1] : vector<4x64xf32> to vector<4xf32>
    %17 = vector.shape_cast %16 : vector<4xf32> to vector<4x1xf32>
    %18 = vector.broadcast %17 : vector<4x1xf32> to vector<4x64xf32>
    %19 = arith.subf %15, %18 : vector<4x64xf32>
    %20 = math.exp %19 : vector<4x64xf32>
    %cst_9 = arith.constant dense<0.000000e+00> : vector<4xf32>
    %21 = vector.multi_reduction <add>, %20, %cst_9 [1] : vector<4x64xf32> to vector<4xf32>
    %22 = vector.shape_cast %21 : vector<4xf32> to vector<4x1xf32>
    %23 = tpu.reciprocal %22 {approx = true} : vector<4x1xf32> -> vector<4x1xf32>
    %24 = arith.mulf %22, %23 : vector<4x1xf32>
    %cst_10 = arith.constant 2.000000e+00 : f32
    %25 = vector.broadcast %cst_10 : f32 to vector<4x1xf32>
    %26 = arith.subf %25, %24 : vector<4x1xf32>
    %27 = arith.mulf %23, %26 : vector<4x1xf32>
    %28 = vector.broadcast %27 : vector<4x1xf32> to vector<4x64xf32>
    %29 = arith.mulf %20, %28 : vector<4x64xf32>
    %c0_11 = arith.constant 0 : index
    %c0_12 = arith.constant 0 : index
    %30 = vector.load %arg3[%c0_11, %c0_12] : memref<64x1024xf32, #tpu.memory_space<vmem>>, vector<64x1024xf32>
    %cst_13 = arith.constant dense<0.000000e+00> : vector<4x1024xf32>
    %31 = tpu.matmul %29, %30, %cst_13 {dimension_numbers = #tpu.dot_dimension_numbers<[1], [0], [0], [1], [0, 0, 1, 1], [], []>} : vector<4x64xf32>, vector<64x1024xf32>, vector<4x1024xf32> -> vector<4x1024xf32>
    %c0_14 = arith.constant 0 : index
    %c0_15 = arith.constant 0 : index
    %32 = vector.load %arg2[%c0_14, %c0_15] : memref<4x1024xf32, #tpu.memory_space<vmem>>, vector<4x1024xf32>
    %33 = arith.mulf %32, %31 : vector<4x1024xf32>
    %c0_16 = arith.constant 0 : index
    %c0_17 = arith.constant 0 : index
    %34 = vector.load %arg6[%c0_16, %c0_17] : memref<1024x128xf32, #tpu.memory_space<vmem>>, vector<1024x128xf32>
    %cst_18 = arith.constant dense<0.000000e+00> : vector<4x128xf32>
    %35 = tpu.matmul %33, %34, %cst_18 {dimension_numbers = #tpu.dot_dimension_numbers<[1], [0], [0], [1], [0, 0, 1, 1], [], []>} : vector<4x1024xf32>, vector<1024x128xf32>, vector<4x128xf32> -> vector<4x128xf32>
    %c0_19 = arith.constant 0 : index
    %c0_20 = arith.constant 0 : index
    %36 = vector.load %arg7[%c0_19, %c0_20] : memref<1x128xf32, #tpu.memory_space<vmem>>, vector<1x128xf32>
    %37 = vector.broadcast %36 : vector<1x128xf32> to vector<4x128xf32>
    %38 = arith.addf %35, %37 : vector<4x128xf32>
    %cst_21 = arith.constant 0.000000e+00 : f32
    %39 = vector.broadcast %cst_21 : f32 to vector<4x128xf32>
    %40 = arith.maximumf %38, %39 : vector<4x128xf32>
    %c0_22 = arith.constant 0 : index
    %c0_23 = arith.constant 0 : index
    %41 = vector.load %arg8[%c0_22, %c0_23] : memref<128x128xf32, #tpu.memory_space<vmem>>, vector<128x128xf32>
    %cst_24 = arith.constant dense<0.000000e+00> : vector<4x128xf32>
    %42 = tpu.matmul %40, %41, %cst_24 {dimension_numbers = #tpu.dot_dimension_numbers<[1], [0], [0], [1], [0, 0, 1, 1], [], []>} : vector<4x128xf32>, vector<128x128xf32>, vector<4x128xf32> -> vector<4x128xf32>
    %c0_25 = arith.constant 0 : index
    %c0_26 = arith.constant 0 : index
    %43 = vector.load %arg9[%c0_25, %c0_26] : memref<1x128xf32, #tpu.memory_space<vmem>>, vector<1x128xf32>
    %44 = vector.broadcast %43 : vector<1x128xf32> to vector<4x128xf32>
    %45 = arith.addf %42, %44 : vector<4x128xf32>
    %cst_27 = arith.constant 0.000000e+00 : f32
    %46 = vector.broadcast %cst_27 : f32 to vector<4x128xf32>
    %47 = arith.maximumf %45, %46 : vector<4x128xf32>
    %c0_28 = arith.constant 0 : index
    %c0_29 = arith.constant 0 : index
    %48 = vector.load %arg10[%c0_28, %c0_29] : memref<128x128xf32, #tpu.memory_space<vmem>>, vector<128x128xf32>
    %cst_30 = arith.constant dense<0.000000e+00> : vector<4x128xf32>
    %49 = tpu.matmul %47, %48, %cst_30 {dimension_numbers = #tpu.dot_dimension_numbers<[1], [0], [0], [1], [0, 0, 1, 1], [], []>} : vector<4x128xf32>, vector<128x128xf32>, vector<4x128xf32> -> vector<4x128xf32>
    %c0_31 = arith.constant 0 : index
    %c0_32 = arith.constant 0 : index
    %50 = vector.load %arg11[%c0_31, %c0_32] : memref<1x128xf32, #tpu.memory_space<vmem>>, vector<1x128xf32>
    %51 = vector.broadcast %50 : vector<1x128xf32> to vector<4x128xf32>
    %52 = arith.addf %49, %51 : vector<4x128xf32>
    %53 = tpu.iota {dimensions = array<i32: 1>} : vector<4x128xi32>
    %c4_i32 = arith.constant 4 : i32
    %54 = vector.broadcast %c4_i32 : i32 to vector<4x128xi32>
    %55 = arith.cmpi slt, %53, %54 : vector<4x128xi32>
    %cst_33 = arith.constant -1.000000e+30 : f32
    %56 = vector.broadcast %cst_33 : f32 to vector<4x128xf32>
    %57 = arith.select %55, %52, %56 : vector<4x128xi1>, vector<4x128xf32>
    %cst_34 = arith.constant dense<0xFF800000> : vector<4xf32>
    %58 = vector.multi_reduction <maximumf>, %57, %cst_34 [1] : vector<4x128xf32> to vector<4xf32>
    %59 = vector.shape_cast %58 : vector<4xf32> to vector<4x1xf32>
    %60 = vector.broadcast %59 : vector<4x1xf32> to vector<4x128xf32>
    %61 = arith.subf %57, %60 : vector<4x128xf32>
    %62 = math.exp %61 : vector<4x128xf32>
    %cst_35 = arith.constant dense<0.000000e+00> : vector<4xf32>
    %63 = vector.multi_reduction <add>, %62, %cst_35 [1] : vector<4x128xf32> to vector<4xf32>
    %64 = vector.shape_cast %63 : vector<4xf32> to vector<4x1xf32>
    %65 = tpu.reciprocal %64 {approx = true} : vector<4x1xf32> -> vector<4x1xf32>
    %66 = arith.mulf %64, %65 : vector<4x1xf32>
    %cst_36 = arith.constant 2.000000e+00 : f32
    %67 = vector.broadcast %cst_36 : f32 to vector<4x1xf32>
    %68 = arith.subf %67, %66 : vector<4x1xf32>
    %69 = arith.mulf %65, %68 : vector<4x1xf32>
    %70 = vector.broadcast %69 : vector<4x1xf32> to vector<4x128xf32>
    %71 = arith.mulf %62, %70 : vector<4x128xf32>
    %c0_37 = arith.constant 0 : index
    %c0_38 = arith.constant 0 : index
    %72 = vector.load %arg12[%c0_37, %c0_38] : memref<4x384xf32, #tpu.memory_space<vmem>>, vector<4x128xf32>
    tpu.vector_store %arg12[%c0_37, %c0_38], %47 {strides = array<i32>} : memref<4x384xf32, #tpu.memory_space<vmem>>, vector<4x128xf32>,
    %c0_39 = arith.constant 0 : index
    %c128 = arith.constant 128 : index
    %73 = vector.load %arg12[%c0_39, %c128] : memref<4x384xf32, #tpu.memory_space<vmem>>, vector<4x128xf32>
    tpu.vector_store %arg12[%c0_39, %c128], %52 {strides = array<i32>} : memref<4x384xf32, #tpu.memory_space<vmem>>, vector<4x128xf32>,
    %c0_40 = arith.constant 0 : index
    %c256 = arith.constant 256 : index
    %74 = vector.load %arg12[%c0_40, %c256] : memref<4x384xf32, #tpu.memory_space<vmem>>, vector<4x128xf32>
    tpu.vector_store %arg12[%c0_40, %c256], %71 {strides = array<i32>} : memref<4x384xf32, #tpu.memory_space<vmem>>, vector<4x128xf32>,
    return
  }
  func.func @transform_0(%arg0: i32) -> (i32, i32, i32) {
    %c0_i32 = arith.constant 0 : i32
    %c0_i32_0 = arith.constant 0 : i32
    %c0_i32_1 = arith.constant 0 : i32
    return %arg0, %c0_i32, %c0_i32_0 : i32, i32, i32
  }
  func.func @transform_1(%arg0: i32) -> (i32, i32) {
    %c0_i32 = arith.constant 0 : i32
    %c0_i32_0 = arith.constant 0 : i32
    return %arg0, %c0_i32 : i32, i32
  }
  func.func @transform_2(%arg0: i32) -> (i32, i32) {
    %c0_i32 = arith.constant 0 : i32
    %c0_i32_0 = arith.constant 0 : i32
    %c0_i32_1 = arith.constant 0 : i32
    return %c0_i32, %c0_i32_0 : i32, i32
  }
  func.func @transform_3(%arg0: i32) -> (i32, i32) {
    %c0_i32 = arith.constant 0 : i32
    %c0_i32_0 = arith.constant 0 : i32
    %c0_i32_1 = arith.constant 0 : i32
    return %c0_i32, %c0_i32_0 : i32, i32
  }
  func.func @transform_4(%arg0: i32) -> (i32, i32) {
    %c0_i32 = arith.constant 0 : i32
    %c0_i32_0 = arith.constant 0 : i32
    %c0_i32_1 = arith.constant 0 : i32
    return %c0_i32, %c0_i32_0 : i32, i32
  }
  func.func @transform_5(%arg0: i32) -> (i32, i32) {
    %c0_i32 = arith.constant 0 : i32
    %c0_i32_0 = arith.constant 0 : i32
    %c0_i32_1 = arith.constant 0 : i32
    return %c0_i32, %c0_i32_0 : i32, i32
  }
  func.func @transform_6(%arg0: i32) -> (i32, i32) {
    %c0_i32 = arith.constant 0 : i32
    %c0_i32_0 = arith.constant 0 : i32
    %c0_i32_1 = arith.constant 0 : i32
    return %c0_i32, %c0_i32_0 : i32, i32
  }
  func.func @transform_7(%arg0: i32) -> (i32, i32) {
    %c0_i32 = arith.constant 0 : i32
    %c0_i32_0 = arith.constant 0 : i32
    %c0_i32_1 = arith.constant 0 : i32
    return %c0_i32, %c0_i32_0 : i32, i32
  }
  func.func @transform_8(%arg0: i32) -> (i32, i32) {
    %c0_i32 = arith.constant 0 : i32
    %c0_i32_0 = arith.constant 0 : i32
    %c0_i32_1 = arith.constant 0 : i32
    return %c0_i32, %c0_i32_0 : i32, i32
  }
  func.func @transform_9(%arg0: i32) -> (i32, i32) {
    %c0_i32 = arith.constant 0 : i32
    %c0_i32_0 = arith.constant 0 : i32
    %c0_i32_1 = arith.constant 0 : i32
    return %c0_i32, %c0_i32_0 : i32, i32
  }
  func.func @transform_10(%arg0: i32) -> (i32, i32) {
    %c0_i32 = arith.constant 0 : i32
    %c0_i32_0 = arith.constant 0 : i32
    %c0_i32_1 = arith.constant 0 : i32
    return %c0_i32, %c0_i32_0 : i32, i32
  }
  func.func @transform_11(%arg0: i32) -> (i32, i32) {
    %c0_i32 = arith.constant 0 : i32
    %c0_i32_0 = arith.constant 0 : i32
    return %arg0, %c0_i32 : i32, i32
  }
}

</mosaic_0001>

<bundles_post_ra>
// kernel: dann_withatt_forward.2
= control target key start
LH: loop header
LB: loop body
LE: loop exit
PB: predicated region body
PF: predicated region fallthrough
CT: control target
= control target key end

     0   :  { %16 = vsyncpa [#allocation3], 0  ;;  %s3192_s0 = inlined_call_operand.vmem [shape: f32[4,64,16], index: 0, kind: input, shape index: {}]   ;;  %s3193_s1 = inlined_call_operand.vmem [shape: f32[4,1024], index: 1, kind: input, shape index: {}]   ;;  %s3194_s2 = inlined_call_operand.hbm [shape: f32[64,1024], index: 2, kind: input, shape index: {}]   ;;  %s3195_s3 = inlined_call_operand.vmem [shape: f32[16,16], index: 3, kind: input, shape index: {}]   ;;  %s3196_s4 = inlined_call_operand.vmem [shape: f32[1,16], index: 4, kind: input, shape index: {}]   ;;  %s3197_s5 = inlined_call_operand.vmem [shape: f32[1024,128], index: 5, kind: input, shape index: {}]   ;;  %s3198_s6 = inlined_call_operand.vmem [shape: f32[1,128], index: 6, kind: input, shape index: {}]   ;;  %s3199_s7 = inlined_call_operand.hbm [shape: f32[128,128], index: 7, kind: input, shape index: {}]   ;;  %s3200_s8 = inlined_call_operand.vmem [shape: f32[1,128], index: 8, kind: input, shape index: {}]   ;;  %s3201_s9 = inlined_call_operand.hbm [shape: f32[128,128], index: 9, kind: input, shape index: {}]   ;;  %s3202_s10 = inlined_call_operand.vmem [shape: f32[1,128], index: 10, kind: input, shape index: {}]   ;;  %s3203_s11 = inlined_call_operand.vmem [shape: f32[4,384], index: 11, kind: output, shape index: {}]  }
   0x1   :  { %17 = vsyncpa [#allocation5], 0  ;;  %s2362_s17 = smov [#allocation4]  }
   0x2   :  { %s47_s18 = sshll.u32 %s2362_s17, 4  ;;  %s48_s18 = int_to_ptr.vmem [resolvable:$true] %s47_s18 }
   0x3   :  { %s2306_s19 = scalar_lea.vmem %s48_s18, 2048  ;;  %p2311_p1 = scmp.lt.s32.totalorder %s48_s18, %s48_s18 }
   0x4   :  { %p2307_p0 = scmp.ne.s32.totalorder %s48_s18, %s2306_s19  ;;  %p2312_p2 = scmp.lt.s32.totalorder %s2306_s19, %s2306_s19 }
   0x6   :  { %p2313_p3 = por %p2312_p2, %p2311_p1 }
   0x8   :  { %p2314_p4 = pnand %p2313_p3, %p2307_p0 }
   0xa   :  { %2317 = shalt.err (!%p2314_p4)
}
   0xb   :  { %s2363_s20 = smov 128   ;;  %s2364_s21 = smov 8  }
   0xc   :  { %53 = dma.hbm_to_vmem [thread:$0]  %s3199_s7, 2048, %s48_s18, [#allocation5], %s2363_s20, %s2363_s20, %s2364_s21  }
   0xd   :  { %s2365_s24 = smov [#allocation2]  }
   0xe   :  { %s27_s25 = sshll.u32 %s2365_s24, 4  ;;  %s28_s25 = int_to_ptr.vmem [resolvable:$true] %s27_s25 }
   0xf   :  { %s2326_s26 = scalar_lea.vmem %s28_s25, 8192  ;;  %p2331_p6 = scmp.lt.s32.totalorder %s28_s25, %s28_s25 }
  0x10   :  { %p2327_p5 = scmp.ne.s32.totalorder %s28_s25, %s2326_s26  ;;  %p2332_p7 = scmp.lt.s32.totalorder %s2326_s26, %s2326_s26 }
  0x12   :  { %p2333_p8 = por %p2332_p7, %p2331_p6 }
  0x14   :  { %p2334_p9 = pnand %p2333_p8, %p2327_p5 }
  0x16   :  { %2337 = shalt.err (!%p2334_p9)
}
  0x17   :  { %s2366_s27 = smov 1024   ;;  %s2367_s28 = smov 64  }
  0x18   :  { %33 = dma.hbm_to_vmem [thread:$0]  %s3194_s2, 8192, %s28_s25, [#allocation3], %s2366_s27, %s2366_s27, %s2367_s28  }
  0x19   :  { %s2368_s12 = smov [#allocation6]  }
  0x1a   :  { %s61_s13 = sshll.u32 %s2368_s12, 4  ;;  %s62_s13 = int_to_ptr.vmem [resolvable:$true] %s61_s13 }
  0x1b   :  { %s2346_s7 = scalar_lea.vmem %s62_s13, 2048  ;;  %p2351_p11 = scmp.lt.s32.totalorder %s62_s13, %s62_s13 }
  0x1c   :  { %p2347_p10 = scmp.ne.s32.totalorder %s62_s13, %s2346_s7  ;;  %p2352_p12 = scmp.lt.s32.totalorder %s2346_s7, %s2346_s7 }
  0x1e   :  { %p2353_p13 = por %p2352_p12, %p2351_p11 }
  0x20   :  { %p2354_p0 = pnand %p2353_p13, %p2347_p10 }
  0x22   :  { %2357 = shalt.err (!%p2354_p0)
}
  0x23   :  { %67 = dma.hbm_to_vmem [thread:$0]  %s3201_s9, 2048, %s62_s13, [#allocation5], %s2363_s20, %s2363_s20, %s2364_s21  }
  0x24   :  { %2358 = dma.done.wait [#allocation3], 8192  }
  0x25   :  { %2359 = vsyncadd [#allocation3], 4294959104 }
  0x26   :  { %2360 = dma.done.wait [#allocation5], 4096  }
  0x27   :  { %2361 = vsyncadd [#allocation5], 4294963200  ;;  %vm113_vm0 = vcmask 130048   ;;  %v112_v0 = vld [vmem:[%s3195_s3 + $0x8] sm:$0xff]  ;;  %v111_v1 = vld [vmem:[%s3195_s3] sm:$0xff]  ;;  %vm646_vm1 = vcmask 130112  }
  0x28   :  { %v79_v2 = vld [vmem:[%s3192_s0] sm:$0xff]  ;;  %2095 = vmatprep.subr.mxu0 %v112_v0  ;;  %v80_v3 = vld [vmem:[%s3192_s0 + $0x8] sm:$0xff]  ;;  %v81_v4 = vld [vmem:[%s3192_s0 + $0x10] sm:$0xff]  ;;  %vm653_vm2 = vcmask 195712   ;;  %vm660_vm3 = vcmask 261312   ;;  %vm667_vm4 = vcmask 326912  }
  0x29   :  { %2099 = vmatprep.mubr.msk.f32.mxu0 %vm113_vm0, %v79_v2  ;;  %2096 = vmatpush3.msra.mxu0 %v112_v0  ;;  %v82_v5 = vld [vmem:[%s3192_s0 + $0x18] sm:$0xff]  ;;  %v83_v6 = vld [vmem:[%s3192_s0 + $0x20] sm:$0xff]  ;;  %v84_v7 = vld [vmem:[%s3192_s0 + $0x28] sm:$0xff]  ;;  %vm674_vm5 = vcmask 392512   ;;  %vm681_vm6 = vcmask 458112   ;;  %vm688_vm7 = vcmask 523712  }
  0x2a   :  { %2097 = vmatprep.subr.mxu0 %v111_v1  ;;  %v85_v8 = vld [vmem:[%s3192_s0 + $0x30] sm:$0xff]  ;;  %v86_v9 = vld [vmem:[%s3192_s0 + $0x38] sm:$0xff]  ;;  %v87_v10 = vld [vmem:[%s3192_s0 + $0x40] sm:$0xff]  ;;  %vm807_vm8 = vcmask 1041409   ;;  %vm809_vm9 = vcmask 1042434   ;;  %vm811_vm10 = vcmask 1043459  }
  0x2b   :  { %2098 = vmatpush3.msra.mxu0 %v111_v1  ;;  %v88_v11 = vld [vmem:[%s3192_s0 + $0x48] sm:$0xff]  ;;  %v89_v12 = vld [vmem:[%s3192_s0 + $0x50] sm:$0xff]  ;;  %v90_v13 = vld [vmem:[%s3192_s0 + $0x58] sm:$0xff]  ;;  %vm815_vm12 = vcmask 519168   ;;  %vm894_vm13 = vcmask 523264   ;;  %vm2370_vm14 = vmmov 0  }
  0x2c   :  { %2100 = vmatmul.mubr.msk.f32.vlgmr.msra.gmra.mxu0 %vm113_vm0, %v80_v3  ;;  %v91_v14 = vld [vmem:[%s3192_s0 + $0x60] sm:$0xff]  ;;  %v92_v15 = vld [vmem:[%s3192_s0 + $0x68] sm:$0xff]  ;;  %v93_v16 = vld [vmem:[%s3192_s0 + $0x70] sm:$0xff] }
  0x2d   :  { %2102 = vmatprep.mubr.msk.f32.mxu0 %vm113_vm0, %v81_v4  ;;  %v94_v17 = vld [vmem:[%s3192_s0 + $0x78] sm:$0xff]  ;;  %v95_v18 = vld [vmem:[%s3192_s0 + $0x80] sm:$0xff]  ;;  %v96_v19 = vld [vmem:[%s3192_s0 + $0x88] sm:$0xff] }
  0x2e   :  { %v97_v20 = vld [vmem:[%s3192_s0 + $0x90] sm:$0xff]  ;;  %v98_v21 = vld [vmem:[%s3192_s0 + $0x98] sm:$0xff]  ;;  %v99_v22 = vld [vmem:[%s3192_s0 + $0xa0] sm:$0xff] }
  0x2f   :  { %v100_v23 = vld [vmem:[%s3192_s0 + $0xa8] sm:$0xff]  ;;  %v101_v24 = vld [vmem:[%s3192_s0 + $0xb0] sm:$0xff]  ;;  %v102_v25 = vld [vmem:[%s3192_s0 + $0xb8] sm:$0xff] }
  0x30   :  { %2103 = vmatmul.mubr.msk.f32.gmra.mxu0 %vm113_vm0, %v82_v5  ;;  %v103_v26 = vld [vmem:[%s3192_s0 + $0xc0] sm:$0xff]  ;;  %v104_v27 = vld [vmem:[%s3192_s0 + $0xc8] sm:$0xff]  ;;  %v105_v28 = vld [vmem:[%s3192_s0 + $0xd0] sm:$0xff] }
  0x31   :  { %2105 = vmatprep.mubr.msk.f32.mxu0 %vm113_vm0, %v83_v6  ;;  %v106_v29 = vld [vmem:[%s3192_s0 + $0xd8] sm:$0xff]  ;;  %v107_v30 = vld [vmem:[%s3192_s0 + $0xe0] sm:$0xff]  ;;  %v108_v31 = vld [vmem:[%s3192_s0 + $0xe8] sm:$0xff] }
  0x32   :  { %v109_v32 = vld [vmem:[%s3192_s0 + $0xf0] sm:$0xff]  ;;  %v110_v33 = vld [vmem:[%s3192_s0 + $0xf8] sm:$0xff]  ;;  %v2577_v41 = vld [vmem:[%s3196_s4] ss:$0 sm:$0xff] }
  0x34   :  { %2106 = vmatmul.mubr.msk.f32.gmra.mxu0 %vm113_vm0, %v84_v7 }
  0x35   :  { %2108 = vmatprep.mubr.msk.f32.mxu0 %vm113_vm0, %v85_v8 }
  0x38   :  { %2109 = vmatmul.mubr.msk.f32.gmra.mxu0 %vm113_vm0, %v86_v9 }
  0x39   :  { %2111 = vmatprep.mubr.msk.f32.mxu0 %vm113_vm0, %v87_v10 }
  0x3c   :  { %2112 = vmatmul.mubr.msk.f32.gmra.mxu0 %vm113_vm0, %v88_v11 }
  0x3d   :  { %2114 = vmatprep.mubr.msk.f32.mxu0 %vm113_vm0, %v89_v12 }
  0x40   :  { %2115 = vmatmul.mubr.msk.f32.gmra.mxu0 %vm113_vm0, %v90_v13 }
  0x41   :  { %2117 = vmatprep.mubr.msk.f32.mxu0 %vm113_vm0, %v91_v14 }
  0x44   :  { %2118 = vmatmul.mubr.msk.f32.gmra.mxu0 %vm113_vm0, %v92_v15 }
  0x45   :  { %2120 = vmatprep.mubr.msk.f32.mxu0 %vm113_vm0, %v93_v16 }
  0x48   :  { %2121 = vmatmul.mubr.msk.f32.gmra.mxu0 %vm113_vm0, %v94_v17 }
  0x49   :  { %2123 = vmatprep.mubr.msk.f32.mxu0 %vm113_vm0, %v95_v18 }
  0x4c   :  { %2124 = vmatmul.mubr.msk.f32.gmra.mxu0 %vm113_vm0, %v96_v19 }
  0x4d   :  { %2126 = vmatprep.mubr.msk.f32.mxu0 %vm113_vm0, %v97_v20 }
  0x50   :  { %2127 = vmatmul.mubr.msk.f32.gmra.mxu0 %vm113_vm0, %v98_v21 }
  0x51   :  { %2129 = vmatprep.mubr.msk.f32.mxu0 %vm113_vm0, %v99_v22 }
  0x54   :  { %2130 = vmatmul.mubr.msk.f32.gmra.mxu0 %vm113_vm0, %v100_v23 }
  0x55   :  { %2132 = vmatprep.mubr.msk.f32.mxu0 %vm113_vm0, %v101_v24 }
  0x58   :  { %2133 = vmatmul.mubr.msk.f32.gmra.mxu0 %vm113_vm0, %v102_v25 }
  0x59   :  { %2135 = vmatprep.mubr.msk.f32.mxu0 %vm113_vm0, %v103_v26 }
  0x5c   :  { %2136 = vmatmul.mubr.msk.f32.gmra.mxu0 %vm113_vm0, %v104_v27 }
  0x5d   :  { %2138 = vmatprep.mubr.msk.f32.mxu0 %vm113_vm0, %v105_v28 }
  0x60   :  { %2139 = vmatmul.mubr.msk.f32.gmra.mxu0 %vm113_vm0, %v106_v29 }
  0x61   :  { %2141 = vmatprep.mubr.msk.f32.mxu0 %vm113_vm0, %v107_v30 }
  0x64   :  { %2142 = vmatmul.mubr.msk.f32.gmra.mxu0 %vm113_vm0, %v108_v31 }
  0x65   :  { %2144 = vmatprep.mubr.msk.f32.mxu0 %vm113_vm0, %v109_v32 }
  0x68   :  { %2145 = vmatmul.mubr.msk.f32.gmra.mxu0 %vm113_vm0, %v110_v33 }
  0xec   :  { %v2101_v34 = vpop.f32.mrf.mxu0 }
  0xed   :  { %2226 = vtanh.f32 %v2101_v34 }
  0xee   :  { %v276_v35 = vpop.f32.mrf.mxu0 }
  0xef   :  { %2228 = vtanh.f32 %v276_v35 }
  0xf0   :  { %v2104_v36 = vpop.f32.mrf.mxu0 }
  0xf1   :  { %2230 = vtanh.f32 %v2104_v36 }
  0xf2   :  { %v286_v37 = vpop.f32.mrf.mxu0 }
  0xf3   :  { %2232 = vtanh.f32 %v286_v37 }
  0xf4   :  { %v2107_v38 = vpop.f32.mrf.mxu0 }
  0xf5   :  { %2234 = vtanh.f32 %v2107_v38 }
  0xf6   :  { %v296_v39 = vpop.f32.mrf.mxu0 }
  0xf7   :  { %2236 = vtanh.f32 %v296_v39 }
  0xf8   :  { %v2110_v40 = vpop.f32.mrf.mxu0 }
  0xf9   :  { %2238 = vtanh.f32 %v2110_v40 }
  0xfa   :  { %v2227_v42 = vpop.eup %2226  ;;  %v306_v43 = vpop.f32.mrf.mxu0 }
  0xfb   :  { %v475_v44 = vmul.f32 %v2227_v42, %v2577_v41  ;;  %2240 = vtanh.f32 %v306_v43 }
  0xfc   :  { %v2229_v45 = vpop.eup %2228  ;;  %v2113_v46 = vpop.f32.mrf.mxu0 }
  0xfd   :  { %v509_v47 = vsel %vm113_vm0, %v475_v44, 0.0  ;;  %v474_v48 = vmul.f32 %v2229_v45, %v2577_v41  ;;  %2242 = vtanh.f32 %v2113_v46 }
  0xfe   :  { %v2231_v49 = vpop.eup %2230  ;;  %510 = vadd.xlane.f32.xlu0 %v509_v47  ;;  %v316_v50 = vpop.f32.mrf.mxu0 }
  0xff   :  { %v477_v52 = vmul.f32 %v2231_v49, %v2577_v41  ;;  %v506_v54 = vsel %vm113_vm0, %v474_v48, 0.0  ;;  %2244 = vtanh.f32 %v316_v50 }
 0x100   :  { %v2116_v51 = vpop.f32.mrf.mxu0  ;;  %v2233_v53 = vpop.eup %2232 }
 0x101   :  { %v515_v60 = vsel %vm113_vm0, %v477_v52, 0.0  ;;  %v476_v62 = vmul.f32 %v2233_v53, %v2577_v41 }
 0x102   :  { %v2235_v55 = vpop.eup %2234  ;;  %507 = vadd.xlane.f32.xlu0 %v506_v54  ;;  %v326_v56 = vpop.f32.mrf.mxu0 }
 0x103   :  { %v479_v57 = vmul.f32 %v2235_v55, %v2577_v41  ;;  %v512_v3 = vsel %vm113_vm0, %v476_v62, 0.0 }
 0x104   :  { %v2237_v58 = vpop.eup %2236  ;;  %v2119_v59 = vpop.f32.mrf.mxu0 }
 0x105   :  { %2246 = vtanh.f32 %v2119_v59  ;;  %v521_v61 = vsel %vm113_vm0, %v479_v57, 0.0  ;;  %v478_v63 = vmul.f32 %v2237_v58, %v2577_v41 }
 0x106   :  { %v2239_v0 = vpop.eup %2238  ;;  %516 = vadd.xlane.f32.xlu0 %v515_v60  ;;  %522 = vadd.xlane.f32.xlu1 %v521_v61  ;;  %v336_v1 = vpop.f32.mrf.mxu0 }
 0x107   :  { %2248 = vtanh.f32 %v336_v1  ;;  %v518_v4 = vsel %vm113_vm0, %v478_v63, 0.0  ;;  %v481_v5 = vmul.f32 %v2239_v0, %v2577_v41 }
 0x108   :  { %2250 = vtanh.f32 %v2116_v51  ;;  %v2122_v2 = vpop.f32.mrf.mxu0  ;;  %v2241_v6 = vpop.eup %2240 }
 0x109   :  { %2252 = vtanh.f32 %v2122_v2  ;;  %v527_v10 = vsel %vm113_vm0, %v481_v5, 0.0  ;;  %v480_v11 = vmul.f32 %v2241_v6, %v2577_v41 }
 0x10a   :  { %513 = vadd.xlane.f32.xlu0 %v512_v3  ;;  %519 = vadd.xlane.f32.xlu1 %v518_v4  ;;  %v346_v7 = vpop.f32.mrf.mxu0  ;;  %2254 = vtanh.f32 %v326_v56  ;;  %v2243_v9 = vpop.eup %2242 }
 0x10b   :  { %2256 = vtanh.f32 %v346_v7  ;;  %v483_v14 = vmul.f32 %v2243_v9, %v2577_v41  ;;  %v524_v16 = vsel %vm113_vm0, %v480_v11, 0.0 }
 0x10c   :  { %v2125_v8 = vpop.f32.mrf.mxu0  ;;  %v2245_v15 = vpop.eup %2244 }
 0x10d   :  { %2258 = vtanh.f32 %v2125_v8  ;;  %v533_v22 = vsel %vm113_vm0, %v483_v14, 0.0  ;;  %v482_v25 = vmul.f32 %v2245_v15, %v2577_v41 }
 0x10e   :  { %528 = vadd.xlane.f32.xlu1 %v527_v10  ;;  %v356_v12 = vpop.f32.mrf.mxu0 }
 0x10f   :  { %2260 = vtanh.f32 %v356_v12  ;;  %v530_v32 = vsel %vm113_vm0, %v482_v25, 0.0 }
 0x110   :  { %v2128_v13 = vpop.f32.mrf.mxu0 }
 0x111   :  { %2262 = vtanh.f32 %v2128_v13 }
 0x112   :  { %v2247_v17 = vpop.eup %2246  ;;  %525 = vadd.xlane.f32.xlu1 %v524_v16  ;;  %v366_v18 = vpop.f32.mrf.mxu0 }
 0x113   :  { %v487_v19 = vmul.f32 %v2247_v17, %v2577_v41  ;;  %2264 = vtanh.f32 %v366_v18 }
 0x114   :  { %v2249_v20 = vpop.eup %2248  ;;  %v2131_v21 = vpop.f32.mrf.mxu0 }
 0x115   :  { %v2251_v23 = vpop.eup %2250  ;;  %v545_v24 = vsel %vm113_vm0, %v487_v19, 0.0  ;;  %v486_v26 = vmul.f32 %v2249_v20, %v2577_v41  ;;  %2266 = vtanh.f32 %v2131_v21 }
 0x116   :  { %v2253_v27 = vpop.eup %2252  ;;  %534 = vadd.xlane.f32.xlu1 %v533_v22  ;;  %546 = vadd.xlane.f32.xlu0 %v545_v24  ;;  %v376_v28 = vpop.f32.mrf.mxu0  ;;  %v485_v30 = vmul.f32 %v2251_v23, %v2577_v41 }
 0x117   :  { %v2255_v31 = vpop.eup %2254  ;;  %v542_v33 = vsel %vm113_vm0, %v486_v26, 0.0  ;;  %v489_v34 = vmul.f32 %v2253_v27, %v2577_v41  ;;  %2268 = vtanh.f32 %v376_v28 }
 0x118   :  { %v2134_v29 = vpop.f32.mrf.mxu0  ;;  %v2257_v35 = vpop.eup %2256  ;;  %v539_v38 = vsel %vm113_vm0, %v485_v30, 0.0  ;;  %v484_v42 = vmul.f32 %v2255_v31, %v2577_v41 }
 0x119   :  { %v551_v40 = vsel %vm113_vm0, %v489_v34, 0.0  ;;  %v488_v43 = vmul.f32 %v2257_v35, %v2577_v41 }
 0x11a   :  { %531 = vadd.xlane.f32.xlu1 %v530_v32  ;;  %543 = vadd.xlane.f32.xlu0 %v542_v33  ;;  %v386_v36 = vpop.f32.mrf.mxu0  ;;  %v2259_v39 = vpop.eup %2258  ;;  %v536_v49 = vsel %vm113_vm0, %v484_v42, 0.0 }
 0x11b   :  { %v491_v47 = vmul.f32 %v2259_v39, %v2577_v41  ;;  %v548_v50 = vsel %vm113_vm0, %v488_v43, 0.0 }
 0x11c   :  { %v2137_v37 = vpop.f32.mrf.mxu0  ;;  %v2261_v44 = vpop.eup %2260 }
 0x11d   :  { %2270 = vtanh.f32 %v2137_v37  ;;  %v490_v51 = vmul.f32 %v2261_v44, %v2577_v41  ;;  %v557_v54 = vsel %vm113_vm0, %v491_v47, 0.0 }
 0x11e   :  { %540 = vadd.xlane.f32.xlu1 %v539_v38  ;;  %552 = vadd.xlane.f32.xlu0 %v551_v40  ;;  %v396_v45 = vpop.f32.mrf.mxu0  ;;  %2272 = vtanh.f32 %v386_v36  ;;  %v2263_v48 = vpop.eup %2262 }
 0x11f   :  { %v554_v56 = vsel %vm113_vm0, %v490_v51, 0.0  ;;  %v493_v57 = vmul.f32 %v2263_v48, %v2577_v41 }
 0x120   :  { %v2140_v46 = vpop.f32.mrf.mxu0  ;;  %v2265_v52 = vpop.eup %2264 }
 0x121   :  { %2274 = vtanh.f32 %v2140_v46  ;;  %v492_v58 = vmul.f32 %v2265_v52, %v2577_v41  ;;  %v563_v63 = vsel %vm113_vm0, %v493_v57, 0.0 }
 0x122   :  { %537 = vadd.xlane.f32.xlu1 %v536_v49  ;;  %549 = vadd.xlane.f32.xlu0 %v548_v50  ;;  %v406_v53 = vpop.f32.mrf.mxu0  ;;  %v2267_v59 = vpop.eup %2266  ;;  %v602_v50 = vlaneseq }
 0x123   :  { %2276 = vtanh.f32 %v406_v53  ;;  %v560_v0 = vsel %vm113_vm0, %v492_v58, 0.0  ;;  %v495_v1 = vmul.f32 %v2267_v59, %v2577_v41 }
 0x124   :  { %2278 = vtanh.f32 %v396_v45  ;;  %v2143_v55 = vpop.f32.mrf.mxu0  ;;  %v2269_v62 = vpop.eup %2268  ;;  %v2659_v53 = vand.u32 127, %v602_v50  ;;  %v638_v57 = vshrl.u32 %v602_v50, 7 }
 0x125   :  { %2280 = vtanh.f32 %v2143_v55  ;;  %v569_v6 = vsel %vm113_vm0, %v495_v1, 0.0  ;;  %v494_v8 = vmul.f32 %v2269_v62, %v2577_v41 }
 0x126   :  { %558 = vadd.xlane.f32.xlu1 %v557_v54  ;;  %555 = vadd.xlane.f32.xlu0 %v554_v56  ;;  %v416_v60 = vpop.f32.mrf.mxu0  ;;  %2282 = vtanh.f32 %v2134_v29  ;;  %v648_v56 = vadd.s32 4294967280, %v2659_v53  ;;  %v641_v58 = vadd.s32 4294967288, %v2659_v53  ;;  %vm604_vm11 = vcmp.lt.s32.totalorder %v2659_v53, 62 }
 0x127   :  { %2284 = vtanh.f32 %v416_v60  ;;  %v566_v13 = vsel %vm113_vm0, %v494_v8, 0.0  ;;  %vm1821_vm15 = vcmp.lt.s32.totalorder %v2659_v53, 4 }
 0x128   :  { %v2146_v61 = vpop.f32.mrf.mxu0  ;;  %v2668_v62 = vsub.s32 %v648_v56, %v638_v57 }
 0x129   :  { %2286 = vtanh.f32 %v2146_v61  ;;  %v2666_v61 = vsub.s32 %v2659_v53, %v638_v57 }
 0x12a   :  { %v2271_v2 = vpop.eup %2270  ;;  %564 = vadd.xlane.f32.xlu1 %v563_v63  ;;  %561 = vadd.xlane.f32.xlu0 %v560_v0  ;;  %v426_v3 = vpop.f32.mrf.mxu0  ;;  %v644_v63 = vsub.s32 %v641_v58, %v638_v57  ;;  %v655_v0 = vadd.s32 4294967272, %v2659_v53 }
 0x12b   :  { %v499_v4 = vmul.f32 %v2271_v2, %v2577_v41  ;;  %v2273_v5 = vpop.eup %2272  ;;  %2288 = vtanh.f32 %v426_v3 }
 0x12c   :  { %v496_v15 = vmul.f32 %v2273_v5, %v2577_v41  ;;  %v658_v8 = vsub.s32 %v655_v0, %v638_v57 }
 0x12d   :  { %v581_v7 = vsel %vm113_vm0, %v499_v4, 0.0 }
 0x12e   :  { %v2275_v9 = vpop.eup %2274  ;;  %570 = vadd.xlane.f32.xlu1 %v569_v6  ;;  %582 = vadd.xlane.f32.xlu0 %v581_v7  ;;  %v572_v20 = vsel %vm113_vm0, %v496_v15, 0.0  ;;  %v662_v6 = vadd.s32 4294967264, %v2659_v53  ;;  %v669_v15 = vadd.s32 4294967256, %v2659_v53 }
 0x12f   :  { %v501_v10 = vmul.f32 %v2275_v9, %v2577_v41 }
 0x130   :  { %v2277_v11 = vpop.eup %2276 }
 0x131   :  { %v2279_v12 = vpop.eup %2278  ;;  %v587_v14 = vsel %vm113_vm0, %v501_v10, 0.0  ;;  %v500_v16 = vmul.f32 %v2277_v11, %v2577_v41 }
 0x132   :  { %v2281_v17 = vpop.eup %2280  ;;  %567 = vadd.xlane.f32.xlu1 %v566_v13  ;;  %588 = vadd.xlane.f32.xlu0 %v587_v14  ;;  %v498_v22 = vmul.f32 %v2279_v12, %v2577_v41 }
 0x133   :  { %v503_v18 = vmul.f32 %v2281_v17, %v2577_v41  ;;  %v2283_v19 = vpop.eup %2282  ;;  %v584_v21 = vsel %vm113_vm0, %v500_v16, 0.0  ;;  %v665_v17 = vsub.s32 %v662_v6, %v638_v57 }
 0x134   :  { %v2285_v23 = vpop.eup %2284  ;;  %v578_v26 = vsel %vm113_vm0, %v498_v22, 0.0  ;;  %v497_v27 = vmul.f32 %v2283_v19, %v2577_v41  ;;  %v676_v19 = vadd.s32 4294967248, %v2659_v53 }
 0x135   :  { %v593_v24 = vsel %vm113_vm0, %v503_v18, 0.0  ;;  %v502_v28 = vmul.f32 %v2285_v23, %v2577_v41  ;;  %v683_v18 = vadd.s32 4294967240, %v2659_v53 }
 0x136   :  { %573 = vadd.xlane.f32.xlu1 %v572_v20  ;;  %585 = vadd.xlane.f32.xlu0 %v584_v21  ;;  %v2287_v25 = vpop.eup %2286  ;;  %v575_v30 = vsel %vm113_vm0, %v497_v27, 0.0 }
 0x137   :  { %v590_v31 = vsel %vm113_vm0, %v502_v28, 0.0  ;;  %v505_v32 = vmul.f32 %v2287_v25, %v2577_v41 }
 0x138   :  { %v2289_v29 = vpop.eup %2288 }
 0x139   :  { %v504_v33 = vmul.f32 %v2289_v29, %v2577_v41  ;;  %v599_v34 = vsel %vm113_vm0, %v505_v32, 0.0  ;;  %v679_v32 = vsub.s32 %v676_v19, %v638_v57 }
 0x13a   :  { %579 = vadd.xlane.f32.xlu1 %v578_v26  ;;  %594 = vadd.xlane.f32.xlu0 %v593_v24 }
 0x13b   :  { %v596_v35 = vsel %vm113_vm0, %v504_v33, 0.0  ;;  %vm1823_vm0 = vcmask 1043456  }
 0x13e   :  { %576 = vadd.xlane.f32.xlu1 %v575_v30  ;;  %591 = vadd.xlane.f32.xlu0 %v590_v31  ;;  %v672_v30 = vsub.s32 %v669_v15, %v638_v57  ;;  %v686_v31 = vsub.s32 %v683_v18, %v638_v57 }
 0x142   :  { %600 = vadd.xlane.f32.xlu1 %v599_v34  ;;  %597 = vadd.xlane.f32.xlu0 %v596_v35 }
 0x187   :  { %v511_v36 = vpop.xlane.xlu0 %510 }
 0x188   :  { %v645_v14 = vrot.slane %v511_v36, %v644_v63 }
 0x18b   :  { %v508_v37 = vpop.xlane.xlu0 %507 }
 0x18c   :  { %v640_v7 = vrot.slane %v508_v37, %v2666_v61 }
 0x18e   :  { %v647_v20 = vsel %vm646_vm1, %v645_v14, %v640_v7 }
 0x18f   :  { %v2643_v38 = vpop.xlane.xlu1 %522  ;;  %v2647_v40 = vpop.xlane.xlu0 %516 }
 0x190   :  { %v659_v29 = vrot.slane %v2647_v40, %v658_v8 }
 0x193   :  { %v2645_v39 = vpop.xlane.xlu1 %519  ;;  %v514_v43 = vpop.xlane.xlu0 %513 }
 0x194   :  { %v652_v10 = vrot.slane %v514_v43, %v2668_v62  ;;  %v666_v43 = vrot.slane %v2645_v39, %v665_v17 }
 0x196   :  { %v654_v24 = vsel %vm653_vm2, %v652_v10, %v647_v20 }
 0x197   :  { %v2649_v42 = vpop.xlane.xlu1 %528  ;;  %v661_v34 = vsel %vm660_vm3, %v659_v29, %v654_v24  ;;  %v887_v29 = vld [vmem:[#allocation2 + $0x1c8] sm:$0xff] }
 0x198   :  { %914 = vmatprep.subr.mxu1 %v887_v29  ;;  %v890_v29 = vld [vmem:[#allocation2 + $0x1e0] sm:$0xff] }
 0x19b   :  { %v2651_v41 = vpop.xlane.xlu1 %525 }
 0x19c   :  { %v680_v56 = vrot.slane %v2651_v41, %v679_v32 }
 0x19f   :  { %v535_v44 = vpop.xlane.xlu1 %534  ;;  %v2653_v45 = vpop.xlane.xlu0 %546 }
 0x1a0   :  { %v697_v5 = vrot.slane %v535_v44, %v644_v63  ;;  %v717_v35 = vrot.slane %v2653_v45, %v672_v30  ;;  %v673_v45 = vrot.slane %v2643_v38, %v672_v30 }
 0x1a3   :  { %v532_v46 = vpop.xlane.xlu1 %531  ;;  %v544_v47 = vpop.xlane.xlu0 %543 }
 0x1a4   :  { %v693_v1 = vrot.slane %v532_v46, %v2666_v61  ;;  %v712_v25 = vrot.slane %v544_v47, %v665_v17 }
 0x1a6   :  { %v698_v9 = vsel %vm646_vm1, %v697_v5, %v693_v1 }
 0x1a7   :  { %v541_v48 = vpop.xlane.xlu1 %540  ;;  %v2655_v49 = vpop.xlane.xlu0 %552 }
 0x1a8   :  { %v707_v16 = vrot.slane %v541_v48, %v658_v8  ;;  %v727_v5 = vrot.slane %v2655_v49, %v686_v31 }
 0x1ab   :  { %v538_v51 = vpop.xlane.xlu1 %537  ;;  %v2657_v52 = vpop.xlane.xlu0 %549 }
 0x1ac   :  { %v702_v2 = vrot.slane %v538_v51, %v2668_v62 }
 0x1ae   :  { %v703_v11 = vsel %vm653_vm2, %v702_v2, %v698_v9  ;;  %v687_v9 = vrot.slane %v2649_v42, %v686_v31 }
 0x1af   :  { %v559_v54 = vpop.xlane.xlu1 %558  ;;  %v556_v55 = vpop.xlane.xlu0 %555  ;;  %v708_v21 = vsel %vm660_vm3, %v707_v16, %v703_v11 }
 0x1b0   :  { %v736_v22 = vrot.slane %v559_v54, %v644_v63  ;;  %v732_v23 = vrot.slane %v556_v55, %v2666_v61  ;;  %v713_v33 = vsel %vm667_vm4, %v712_v25, %v708_v21  ;;  %v668_v54 = vsel %vm667_vm4, %v666_v43, %v661_v34  ;;  %v870_v34 = vld [vmem:[#allocation2 + $0x140] sm:$0xff] }
 0x1b1   :  { %v718_v48 = vsel %vm674_vm5, %v717_v35, %v713_v33  ;;  %v722_v55 = vrot.slane %v2657_v52, %v679_v32  ;;  %v871_v33 = vld [vmem:[#allocation2 + $0x148] sm:$0xff]  ;;  %v854_v43 = vld [vmem:[#allocation2 + $0xc0] sm:$0xff] }
 0x1b2   :  { %v737_v36 = vsel %vm646_vm1, %v736_v22, %v732_v23  ;;  %v863_v35 = vld [vmem:[#allocation2 + $0x108] sm:$0xff] }
 0x1b3   :  { %v2663_v59 = vpop.xlane.xlu1 %564  ;;  %v562_v60 = vpop.xlane.xlu0 %561 }
 0x1b4   :  { %v741_v26 = vrot.slane %v562_v60, %v2668_v62  ;;  %v746_v37 = vrot.slane %v2663_v59, %v658_v8  ;;  %v723_v60 = vsel %vm681_vm6, %v722_v55, %v718_v48  ;;  %v831_v48 = vld [vmem:[#allocation2 + $0x8] sm:$0xff]  ;;  %v1221_v55 = vld [vmem:[%s3197_s5 + $0x78] sm:$0xff] }
 0x1b6   :  { %v742_v44 = vsel %vm653_vm2, %v741_v26, %v737_v36  ;;  %v862_v36 = vld [vmem:[#allocation2 + $0x100] sm:$0xff] }
 0x1b7   :  { %v2673_v3 = vpop.xlane.xlu1 %570  ;;  %v583_v4 = vpop.xlane.xlu0 %582  ;;  %v747_v57 = vsel %vm660_vm3, %v746_v37, %v742_v44  ;;  %v855_v37 = vld [vmem:[#allocation2 + $0xc8] sm:$0xff] }
 0x1b8   :  { %v775_v50 = vrot.slane %v583_v4, %v644_v63  ;;  %v756_v52 = vrot.slane %v2673_v3, %v672_v30  ;;  %v675_v4 = vsel %vm674_vm5, %v673_v45, %v668_v54  ;;  %v728_v3 = vsel %vm688_vm7, %v727_v5, %v723_v60  ;;  %v847_v44 = vld [vmem:[#allocation2 + $0x88] sm:$0xff]  ;;  %v1237_v54 = vld [vmem:[%s3197_s5 + $0xf8] sm:$0xff]  ;;  %v1218_v60 = vld [vmem:[%s3197_s5 + $0x60] sm:$0xff] }
 0x1b9   :  { %v682_v6 = vsel %vm681_vm6, %v680_v56, %v675_v4  ;;  %v2369_v45 = vmov 0.0   ;;  %1921 = vmatprep.subr.mxu0 %v1237_v54  ;;  %v1220_v56 = vld [vmem:[%s3197_s5 + $0x70] sm:$0xff]  ;;  %v1213_v4 = vld [vmem:[%s3197_s5 + $0x38] sm:$0xff] }
 0x1ba   :  { %v689_v16 = vsel %vm688_vm7, %v687_v9, %v682_v6  ;;  %962 = vmatprep.mubr.f32.mxu1 %v2369_v45  ;;  %1922 = vmatpush3.msra.mxu0 %v1221_v55  ;;  %v1228_v5 = vld [vmem:[%s3197_s5 + $0xb0] sm:$0xff]  ;;  %v1226_v9 = vld [vmem:[%s3197_s5 + $0xa0] sm:$0xff]  ;;  %v885_v54 = vld [vmem:[#allocation2 + $0x1b8] sm:$0xff] }
 0x1bb   :  { %v568_v12 = vpop.xlane.xlu1 %567  ;;  %v589_v13 = vpop.xlane.xlu0 %588  ;;  %v808_v42 = vsel %vm807_vm8, %v728_v3, %v689_v16  ;;  %v1212_v6 = vld [vmem:[%s3197_s5 + $0x30] sm:$0xff] }
 0x1bc   :  { %v751_v40 = vrot.slane %v568_v12, %v665_v17  ;;  %v785_v58 = vrot.slane %v589_v13, %v658_v8  ;;  %v880_v16 = vld [vmem:[#allocation2 + $0x190] sm:$0xff] }
 0x1bd   :  { %v884_v55 = vld [vmem:[#allocation2 + $0x1b0] sm:$0xff] }
 0x1be   :  { %v752_v63 = vsel %vm667_vm4, %v751_v40, %v747_v57  ;;  %v846_v40 = vld [vmem:[#allocation2 + $0x80] sm:$0xff]  ;;  %v1235_v57 = vld [vmem:[%s3197_s5 + $0xe8] sm:$0xff] }
 0x1bf   :  { %v574_v27 = vpop.xlane.xlu1 %573  ;;  %v586_v28 = vpop.xlane.xlu0 %585  ;;  %v757_v7 = vsel %vm674_vm5, %v756_v52, %v752_v63  ;;  %v1233_v63 = vld [vmem:[%s3197_s5 + $0xd8] sm:$0xff]  ;;  %v1215_v52 = vld [vmem:[%s3197_s5 + $0x48] sm:$0xff] }
 0x1c0   :  { %v780_v39 = vrot.slane %v586_v28, %v2668_v62 }
 0x1c3   :  { %v580_v46 = vpop.xlane.xlu1 %579  ;;  %v595_v47 = vpop.xlane.xlu0 %594 }
 0x1c4   :  { %v771_v51 = vrot.slane %v580_v46, %v2666_v61  ;;  %v761_v61 = vrot.slane %v574_v27, %v679_v32  ;;  %v795_v11 = vrot.slane %v595_v47, %v672_v30  ;;  %v886_v30 = vld [vmem:[#allocation2 + $0x1c0] sm:$0xff]  ;;  %v839_v46 = vld [vmem:[#allocation2 + $0x48] sm:$0xff] }
 0x1c5   :  { %915 = vmatpush1.msra.mxu1 %v886_v30  ;;  %v838_v47 = vld [vmem:[#allocation2 + $0x40] sm:$0xff]  ;;  %v883_v30 = vld [vmem:[#allocation2 + $0x1a8] sm:$0xff] }
 0x1c6   :  { %v776_v59 = vsel %vm646_vm1, %v775_v50, %v771_v51  ;;  %v762_v10 = vsel %vm681_vm6, %v761_v61, %v757_v7  ;;  %v830_v50 = vld [vmem:[#allocation2] sm:$0xff]  ;;  %v889_v51 = vld [vmem:[#allocation2 + $0x1d8] sm:$0xff]  ;;  %v1227_v7 = vld [vmem:[%s3197_s5 + $0xa8] sm:$0xff] }
 0x1c7   :  { %v781_v38 = vsel %vm653_vm2, %v780_v39, %v776_v59  ;;  %v577_v0 = vpop.xlane.xlu1 %576  ;;  %v592_v1 = vpop.xlane.xlu0 %591  ;;  %v1236_v39 = vld [vmem:[%s3197_s5 + $0xf0] sm:$0xff]  ;;  %v1234_v59 = vld [vmem:[%s3197_s5 + $0xe0] sm:$0xff]  ;;  %v1217_v61 = vld [vmem:[%s3197_s5 + $0x58] sm:$0xff] }
 0x1c8   :  { %v766_v2 = vrot.slane %v577_v0, %v686_v31  ;;  %v786_v62 = vsel %vm660_vm3, %v785_v58, %v781_v38  ;;  %v790_v41 = vrot.slane %v592_v1, %v665_v17  ;;  %1923 = vmatprep.subr.mxu0 %v1236_v39  ;;  %v1219_v58 = vld [vmem:[%s3197_s5 + $0x68] sm:$0xff]  ;;  %v1232_v38 = vld [vmem:[%s3197_s5 + $0xd0] sm:$0xff]  ;;  %v877_v39 = vld [vmem:[#allocation2 + $0x178] sm:$0xff] }
 0x1c9   :  { %1924 = vmatpush3.msra.mxu0 %v1220_v56  ;;  %v1216_v0 = vld [vmem:[%s3197_s5 + $0x50] sm:$0xff]  ;;  %v1231_v1 = vld [vmem:[%s3197_s5 + $0xc8] sm:$0xff] }
 0x1ca   :  { %v791_v8 = vsel %vm667_vm4, %v790_v41, %v786_v62  ;;  %v767_v14 = vsel %vm688_vm7, %v766_v2, %v762_v10  ;;  %1925 = vmatprep.subr.mxu0 %v1235_v57  ;;  %v1230_v2 = vld [vmem:[%s3197_s5 + $0xc0] sm:$0xff]  ;;  %v1229_v41 = vld [vmem:[%s3197_s5 + $0xb8] sm:$0xff]  ;;  %v876_v56 = vld [vmem:[#allocation2 + $0x170] sm:$0xff] }
 0x1cb   :  { %v601_v12 = vpop.xlane.xlu1 %600  ;;  %v598_v13 = vpop.xlane.xlu0 %597  ;;  %v796_v17 = vsel %vm674_vm5, %v795_v11, %v791_v8  ;;  %v810_v20 = vsel %vm809_vm9, %v767_v14, %v808_v42  ;;  %1926 = vmatpush3.msra.mxu0 %v1219_v58  ;;  %v1214_v62 = vld [vmem:[%s3197_s5 + $0x40] sm:$0xff]  ;;  %v1211_v8 = vld [vmem:[%s3197_s5 + $0x28] sm:$0xff]  ;;  %v865_v42 = vld [vmem:[#allocation2 + $0x118] sm:$0xff] }
 0x1cc   :  { %v805_v15 = vrot.slane %v601_v12, %v686_v31  ;;  %v800_v49 = vrot.slane %v598_v13, %v679_v32  ;;  %v879_v31 = vld [vmem:[#allocation2 + $0x188] sm:$0xff]  ;;  %v878_v32 = vld [vmem:[#allocation2 + $0x180] sm:$0xff]  ;;  %1927 = vmatprep.subr.mxu0 %v1234_v59  ;;  %v869_v57 = vld [vmem:[#allocation2 + $0x138] sm:$0xff] }
 0x1cd   :  { %916 = vmatprep.subr.mxu1 %v879_v31  ;;  %1928 = vmatpush3.msra.mxu0 %v1218_v60  ;;  %v882_v31 = vld [vmem:[#allocation2 + $0x1a0] sm:$0xff]  ;;  %v868_v58 = vld [vmem:[#allocation2 + $0x130] sm:$0xff]  ;;  %v861_v59 = vld [vmem:[#allocation2 + $0xf8] sm:$0xff] }
 0x1ce   :  { %v801_v18 = vsel %vm681_vm6, %v800_v49, %v796_v17  ;;  %917 = vmatpush1.msra.mxu1 %v878_v32  ;;  %1929 = vmatprep.subr.mxu0 %v1233_v63  ;;  %v881_v49 = vld [vmem:[#allocation2 + $0x198] sm:$0xff]  ;;  %v875_v32 = vld [vmem:[#allocation2 + $0x168] sm:$0xff]  ;;  %v860_v60 = vld [vmem:[#allocation2 + $0xf0] sm:$0xff] }
 0x1cf   :  { %v806_v19 = vsel %vm688_vm7, %v805_v15, %v801_v18  ;;  %918 = vmatprep.subr.mxu1 %v871_v33  ;;  %1930 = vmatpush3.msra.mxu0 %v1217_v61  ;;  %v888_v15 = vld [vmem:[#allocation2 + $0x1d0] sm:$0xff]  ;;  %v873_v17 = vld [vmem:[#allocation2 + $0x158] sm:$0xff]  ;;  %v874_v33 = vld [vmem:[#allocation2 + $0x160] sm:$0xff] }
 0x1d0   :  { %v812_v21 = vsel %vm811_vm10, %v806_v19, %v810_v20  ;;  %919 = vmatpush1.msra.mxu1 %v870_v34  ;;  %1931 = vmatprep.subr.mxu0 %v1232_v38  ;;  %v872_v18 = vld [vmem:[#allocation2 + $0x150] sm:$0xff]  ;;  %v857_v20 = vld [vmem:[#allocation2 + $0xd8] sm:$0xff]  ;;  %v867_v34 = vld [vmem:[#allocation2 + $0x128] sm:$0xff] }
 0x1d1   :  { %v814_v22 = vsel %vm604_vm11, %v812_v21, -1e+30  ;;  %920 = vmatprep.subr.mxu1 %v863_v35  ;;  %1932 = vmatpush3.msra.mxu0 %v1216_v0  ;;  %v864_v19 = vld [vmem:[#allocation2 + $0x110] sm:$0xff]  ;;  %v866_v35 = vld [vmem:[#allocation2 + $0x120] sm:$0xff]  ;;  %v853_v63 = vld [vmem:[#allocation2 + $0xb8] sm:$0xff] }
 0x1d2   :  { %v816_v23 = vsel %vm815_vm12, %v814_v22, -inf  ;;  %921 = vmatpush1.msra.mxu1 %v862_v36  ;;  %1933 = vmatprep.subr.mxu0 %v1231_v1  ;;  %v856_v21 = vld [vmem:[#allocation2 + $0xd0] sm:$0xff]  ;;  %v859_v36 = vld [vmem:[#allocation2 + $0xe8] sm:$0xff]  ;;  %v845_v38 = vld [vmem:[#allocation2 + $0x78] sm:$0xff] }
 0x1d3   :  { %817 = vmax.xlane.f32.xlu0 %v816_v23  ;;  %922 = vmatprep.subr.mxu1 %v855_v37  ;;  %v848_v23 = vld [vmem:[#allocation2 + $0x90] sm:$0xff]  ;;  %v858_v37 = vld [vmem:[#allocation2 + $0xe0] sm:$0xff]  ;;  %v837_v1 = vld [vmem:[#allocation2 + $0x38] sm:$0xff] }
 0x1d4   :  { %923 = vmatpush1.msra.mxu1 %v854_v43  ;;  %1934 = vmatpush3.msra.mxu0 %v1215_v52  ;;  %v851_v43 = vld [vmem:[#allocation2 + $0xa8] sm:$0xff]  ;;  %v852_v61 = vld [vmem:[#allocation2 + $0xb0] sm:$0xff] }
 0x1d5   :  { %924 = vmatprep.subr.mxu1 %v847_v44  ;;  %1935 = vmatprep.subr.mxu0 %v1230_v2  ;;  %v850_v44 = vld [vmem:[#allocation2 + $0xa0] sm:$0xff]  ;;  %v844_v0 = vld [vmem:[#allocation2 + $0x70] sm:$0xff]  ;;  %v1269_v2 = vld [vmem:[%s3197_s5 + $0x1f8] sm:$0xff] }
 0x1d6   :  { %925 = vmatpush1.msra.mxu1 %v846_v40  ;;  %1936 = vmatpush3.msra.mxu0 %v1214_v62  ;;  %v843_v40 = vld [vmem:[#allocation2 + $0x68] sm:$0xff]  ;;  %v836_v52 = vld [vmem:[#allocation2 + $0x30] sm:$0xff]  ;;  %v1253_v62 = vld [vmem:[%s3197_s5 + $0x178] sm:$0xff] }
 0x1d7   :  { %926 = vmatprep.subr.mxu1 %v839_v46  ;;  %1937 = vmatprep.subr.mxu0 %v1229_v41  ;;  %v842_v46 = vld [vmem:[#allocation2 + $0x60] sm:$0xff]  ;;  %v1268_v41 = vld [vmem:[%s3197_s5 + $0x1f0] sm:$0xff] }
 0x1d8   :  { %927 = vmatpush1.msra.mxu1 %v838_v47  ;;  %1938 = vmatpush3.msra.mxu0 %v1213_v4  ;;  %v835_v47 = vld [vmem:[#allocation2 + $0x28] sm:$0xff]  ;;  %v1252_v4 = vld [vmem:[%s3197_s5 + $0x170] sm:$0xff] }
 0x1d9   :  { %928 = vmatprep.subr.mxu1 %v831_v48  ;;  %1939 = vmatprep.subr.mxu0 %v1228_v5  ;;  %v834_v48 = vld [vmem:[#allocation2 + $0x20] sm:$0xff]  ;;  %v1267_v5 = vld [vmem:[%s3197_s5 + $0x1e8] sm:$0xff] }
 0x1da   :  { %929 = vmatpush1.msra.mxu1 %v830_v50  ;;  %1940 = vmatpush3.msra.mxu0 %v1212_v6  ;;  %v893_v50 = vld [vmem:[#allocation2 + $0x1f8] sm:$0xff]  ;;  %v1251_v6 = vld [vmem:[%s3197_s5 + $0x168] sm:$0xff] }
 0x1db   :  { %985 = vmatprep.subr.mxu1 %v889_v51  ;;  %1941 = vmatprep.subr.mxu0 %v1227_v7  ;;  %v892_v51 = vld [vmem:[#allocation2 + $0x1f0] sm:$0xff]  ;;  %v1266_v7 = vld [vmem:[%s3197_s5 + $0x1e0] sm:$0xff] }
 0x1dc   :  { %1942 = vmatpush3.msra.mxu0 %v1211_v8  ;;  %v1210_v8 = vld [vmem:[%s3197_s5 + $0x20] sm:$0xff] }
 0x1dd   :  { %1943 = vmatprep.subr.mxu0 %v1226_v9  ;;  %v1250_v9 = vld [vmem:[%s3197_s5 + $0x160] sm:$0xff] }
 0x1de   :  { %1944 = vmatpush3.msra.mxu0 %v1210_v8 }
 0x25c   :  { %v818_v24 = vpop.xlane.xlu0 %817 }
 0x25d   :  { %v819_v25 = vsub.f32 %v814_v22, %v818_v24  ;;  %v849_v22 = vld [vmem:[#allocation2 + $0x98] sm:$0xff] }
 0x25e   :  { %v841_v24 = vld [vmem:[#allocation2 + $0x58] sm:$0xff] }
 0x25f   :  { %v820_v26 = vmul.f32 1.442695, %v819_v25  ;;  %v840_v25 = vld [vmem:[#allocation2 + $0x50] sm:$0xff] }
 0x261   :  { %2290 = vpow2.f32 %v820_v26  ;;  %v833_v26 = vld [vmem:[#allocation2 + $0x18] sm:$0xff] }
 0x26e   :  { %v2725_v27 = vpop.eup %2290 }
 0x26f   :  { %v822_v28 = vsel %vm815_vm12, %v2725_v27, 0.0 }
 0x270   :  { %823 = vadd.xlane.f32.xlu1 %v822_v28  ;;  %v891_v28 = vld [vmem:[#allocation2 + $0x1e8] sm:$0xff] }
 0x2f9   :  { %v824_v3 = vpop.xlane.xlu1 %823 }
 0x2fa   :  { %2292 = vrcp.f32 %v824_v3 }
 0x307   :  { %v2293_v10 = vpop.eup %2292 }
 0x308   :  { %v826_v11 = vmul.f32 %v2293_v10, %v824_v3  ;;  %v1225_v3 = vld [vmem:[%s3197_s5 + $0x98] sm:$0xff] }
 0x309   :  { %1945 = vmatprep.subr.mxu0 %v1225_v3  ;;  %v1277_v3 = vld [vmem:[%s3197_s5 + $0x238] sm:$0xff] }
 0x30a   :  { %v827_v12 = vsub.f32 2.0, %v826_v11  ;;  %v1209_v11 = vld [vmem:[%s3197_s5 + $0x18] sm:$0xff] }
 0x30b   :  { %1946 = vmatpush3.msra.mxu0 %v1209_v11  ;;  %v1292_v11 = vld [vmem:[%s3197_s5 + $0x2b0] sm:$0xff] }
 0x30c   :  { %v828_v13 = vmul.f32 %v2293_v10, %v827_v12  ;;  %v1265_v10 = vld [vmem:[%s3197_s5 + $0x1d8] sm:$0xff] }
 0x30d   :  { %v1249_v12 = vld [vmem:[%s3197_s5 + $0x158] sm:$0xff] }
 0x30e   :  { %v2799_v14 = vmul.f32 %v2725_v27, %v828_v13  ;;  %v832_v27 = vld [vmem:[#allocation2 + $0x10] sm:$0xff] }
 0x30f   :  { %v1224_v13 = vld [vmem:[%s3197_s5 + $0x90] sm:$0xff] }
 0x310   :  { %1880 = vmatmul.mubr.msk.f32.vlgmr.msra.gmra.mxu1 %vm894_vm13, %v2799_v14  ;;  %1947 = vmatprep.subr.mxu0 %v1224_v13  ;;  %v1276_v13 = vld [vmem:[%s3197_s5 + $0x230] sm:$0xff] }
 0x311   :  { %986 = vmatpush1.msra.mxu1 %v888_v15  ;;  %1033 = vmatprep.mubr.f32.mxu1 %v2369_v45  ;;  %v1208_v15 = vld [vmem:[%s3197_s5 + $0x10] sm:$0xff] }
 0x312   :  { %987 = vmatprep.subr.mxu1 %v881_v49  ;;  %v1248_v49 = vld [vmem:[%s3197_s5 + $0x150] sm:$0xff]  ;;  %1948 = vmatpush3.msra.mxu0 %v1208_v15  ;;  %v1291_v15 = vld [vmem:[%s3197_s5 + $0x2a8] sm:$0xff] }
 0x313   :  { %988 = vmatpush1.msra.mxu1 %v880_v16  ;;  %v1223_v16 = vld [vmem:[%s3197_s5 + $0x88] sm:$0xff] }
 0x314   :  { %989 = vmatprep.subr.mxu1 %v873_v17  ;;  %v1263_v17 = vld [vmem:[%s3197_s5 + $0x1c8] sm:$0xff]  ;;  %1949 = vmatprep.subr.mxu0 %v1223_v16 }
 0x315   :  { %990 = vmatpush1.msra.mxu1 %v872_v18  ;;  %v1207_v18 = vld [vmem:[%s3197_s5 + $0x8] sm:$0xff] }
 0x316   :  { %991 = vmatprep.subr.mxu1 %v865_v42  ;;  %v1247_v42 = vld [vmem:[%s3197_s5 + $0x148] sm:$0xff]  ;;  %1950 = vmatpush3.msra.mxu0 %v1207_v18  ;;  %v1290_v18 = vld [vmem:[%s3197_s5 + $0x2a0] sm:$0xff] }
 0x317   :  { %992 = vmatpush1.msra.mxu1 %v864_v19  ;;  %v1222_v19 = vld [vmem:[%s3197_s5 + $0x80] sm:$0xff]  ;;  %v1275_v16 = vld [vmem:[%s3197_s5 + $0x228] sm:$0xff] }
 0x318   :  { %993 = vmatprep.subr.mxu1 %v857_v20  ;;  %v1262_v20 = vld [vmem:[%s3197_s5 + $0x1c0] sm:$0xff]  ;;  %1951 = vmatprep.subr.mxu0 %v1222_v19 }
 0x319   :  { %994 = vmatpush1.msra.mxu1 %v856_v21  ;;  %v1206_v21 = vld [vmem:[%s3197_s5] sm:$0xff] }
 0x31a   :  { %995 = vmatprep.subr.mxu1 %v849_v22  ;;  %v1246_v22 = vld [vmem:[%s3197_s5 + $0x140] sm:$0xff]  ;;  %1952 = vmatpush3.msra.mxu0 %v1206_v21  ;;  %v1289_v21 = vld [vmem:[%s3197_s5 + $0x298] sm:$0xff] }
 0x31b   :  { %996 = vmatpush1.msra.mxu1 %v848_v23  ;;  %v1261_v23 = vld [vmem:[%s3197_s5 + $0x1b8] sm:$0xff]  ;;  %v1274_v19 = vld [vmem:[%s3197_s5 + $0x220] sm:$0xff] }
 0x31c   :  { %997 = vmatprep.subr.mxu1 %v841_v24  ;;  %v1301_v24 = vld [vmem:[%s3197_s5 + $0x2f8] sm:$0xff] }
 0x31d   :  { %998 = vmatpush1.msra.mxu1 %v840_v25  ;;  %1991 = vmatprep.subr.mxu0 %v1301_v24  ;;  %v1245_v25 = vld [vmem:[%s3197_s5 + $0x138] sm:$0xff] }
 0x31e   :  { %999 = vmatprep.subr.mxu1 %v833_v26  ;;  %v1260_v26 = vld [vmem:[%s3197_s5 + $0x1b0] sm:$0xff]  ;;  %v1273_v24 = vld [vmem:[%s3197_s5 + $0x218] sm:$0xff] }
 0x31f   :  { %1000 = vmatpush1.msra.mxu1 %v832_v27  ;;  %v1244_v27 = vld [vmem:[%s3197_s5 + $0x130] sm:$0xff] }
 0x320   :  { %1881 = vmatmul.mubr.msk.f32.vlgmr.msra.gmra.mxu1 %vm894_vm13, %v2799_v14  ;;  %1056 = vmatprep.subr.mxu1 %v891_v28  ;;  %v1259_v28 = vld [vmem:[%s3197_s5 + $0x1a8] sm:$0xff] }
 0x321   :  { %1057 = vmatpush1.msra.mxu1 %v890_v29  ;;  %1104 = vmatprep.mubr.f32.mxu1 %v2369_v45  ;;  %v1243_v29 = vld [vmem:[%s3197_s5 + $0x128] sm:$0xff] }
 0x322   :  { %1058 = vmatprep.subr.mxu1 %v883_v30  ;;  %v1258_v30 = vld [vmem:[%s3197_s5 + $0x1a0] sm:$0xff] }
 0x323   :  { %1059 = vmatpush1.msra.mxu1 %v882_v31  ;;  %v1242_v31 = vld [vmem:[%s3197_s5 + $0x120] sm:$0xff] }
 0x324   :  { %1060 = vmatprep.subr.mxu1 %v875_v32  ;;  %v1257_v32 = vld [vmem:[%s3197_s5 + $0x198] sm:$0xff] }
 0x325   :  { %1061 = vmatpush1.msra.mxu1 %v874_v33  ;;  %v1241_v33 = vld [vmem:[%s3197_s5 + $0x118] sm:$0xff] }
 0x326   :  { %1062 = vmatprep.subr.mxu1 %v867_v34  ;;  %v1256_v34 = vld [vmem:[%s3197_s5 + $0x190] sm:$0xff] }
 0x327   :  { %1063 = vmatpush1.msra.mxu1 %v866_v35  ;;  %v1240_v35 = vld [vmem:[%s3197_s5 + $0x110] sm:$0xff] }
 0x328   :  { %1064 = vmatprep.subr.mxu1 %v859_v36  ;;  %v1255_v36 = vld [vmem:[%s3197_s5 + $0x188] sm:$0xff] }
 0x329   :  { %1065 = vmatpush1.msra.mxu1 %v858_v37  ;;  %v1239_v37 = vld [vmem:[%s3197_s5 + $0x108] sm:$0xff] }
 0x32a   :  { %1066 = vmatprep.subr.mxu1 %v851_v43  ;;  %v1254_v43 = vld [vmem:[%s3197_s5 + $0x180] sm:$0xff] }
 0x32b   :  { %1067 = vmatpush1.msra.mxu1 %v850_v44  ;;  %v1238_v44 = vld [vmem:[%s3197_s5 + $0x100] sm:$0xff] }
 0x32c   :  { %1068 = vmatprep.subr.mxu1 %v843_v40  ;;  %v1333_v40 = vld [vmem:[%s3197_s5 + $0x3f8] sm:$0xff] }
 0x32d   :  { %1069 = vmatpush1.msra.mxu1 %v842_v46 }
 0x32e   :  { %1070 = vmatprep.subr.mxu1 %v835_v47 }
 0x32f   :  { %1071 = vmatpush1.msra.mxu1 %v834_v48  ;;  %v1182_v48 = vld [vmem:[%s3193_s1] sm:$0xff] }
 0x330   :  { %1882 = vmatmul.mubr.msk.f32.vlgmr.msra.gmra.mxu1 %vm894_vm13, %v2799_v14  ;;  %1127 = vmatprep.subr.mxu1 %v893_v50 }
 0x331   :  { %1128 = vmatpush1.msra.mxu1 %v892_v51  ;;  %1175 = vmatprep.mubr.f32.mxu1 %v2369_v45 }
 0x332   :  { %1129 = vmatprep.subr.mxu1 %v885_v54 }
 0x333   :  { %1130 = vmatpush1.msra.mxu1 %v884_v55  ;;  %v1285_v55 = vld [vmem:[%s3197_s5 + $0x278] sm:$0xff] }
 0x334   :  { %1131 = vmatprep.subr.mxu1 %v877_v39  ;;  %v1300_v39 = vld [vmem:[%s3197_s5 + $0x2f0] sm:$0xff] }
 0x335   :  { %1132 = vmatpush1.msra.mxu1 %v876_v56  ;;  %v1284_v56 = vld [vmem:[%s3197_s5 + $0x270] sm:$0xff] }
 0x336   :  { %1133 = vmatprep.subr.mxu1 %v869_v57  ;;  %v1299_v57 = vld [vmem:[%s3197_s5 + $0x2e8] sm:$0xff] }
 0x337   :  { %1134 = vmatpush1.msra.mxu1 %v868_v58  ;;  %v1283_v58 = vld [vmem:[%s3197_s5 + $0x268] sm:$0xff] }
 0x338   :  { %1135 = vmatprep.subr.mxu1 %v861_v59  ;;  %v1298_v59 = vld [vmem:[%s3197_s5 + $0x2e0] sm:$0xff] }
 0x339   :  { %1136 = vmatpush1.msra.mxu1 %v860_v60  ;;  %v1282_v60 = vld [vmem:[%s3197_s5 + $0x260] sm:$0xff] }
 0x33a   :  { %1137 = vmatprep.subr.mxu1 %v853_v63  ;;  %v1297_v63 = vld [vmem:[%s3197_s5 + $0x2d8] sm:$0xff] }
 0x33b   :  { %1138 = vmatpush1.msra.mxu1 %v852_v61 }
 0x33c   :  { %1139 = vmatprep.subr.mxu1 %v845_v38  ;;  %v1281_v38 = vld [vmem:[%s3197_s5 + $0x258] sm:$0xff] }
 0x33d   :  { %1140 = vmatpush1.msra.mxu1 %v844_v0  ;;  %v1296_v0 = vld [vmem:[%s3197_s5 + $0x2d0] sm:$0xff] }
 0x33e   :  { %1141 = vmatprep.subr.mxu1 %v837_v1 }
 0x33f   :  { %1142 = vmatpush1.msra.mxu1 %v836_v52  ;;  %v1183_v52 = vld [vmem:[%s3193_s1 + $0x8] sm:$0xff] }
 0x340   :  { %1883 = vmatmul.mubr.msk.f32.vlgmr.msra.gmra.mxu1 %vm894_vm13, %v2799_v14  ;;  %1956 = vmatprep.subr.mxu1 %v1269_v2  ;;  %v1264_v14 = vld [vmem:[%s3197_s5 + $0x1d0] sm:$0xff] }
 0x341   :  { %1957 = vmatpush3.msra.mxu1 %v1253_v62  ;;  %v1280_v2 = vld [vmem:[%s3197_s5 + $0x250] sm:$0xff] }
 0x342   :  { %1958 = vmatprep.subr.mxu1 %v1268_v41  ;;  %v1295_v41 = vld [vmem:[%s3197_s5 + $0x2c8] sm:$0xff] }
 0x343   :  { %1959 = vmatpush3.msra.mxu1 %v1252_v4  ;;  %v1279_v4 = vld [vmem:[%s3197_s5 + $0x248] sm:$0xff] }
 0x344   :  { %1960 = vmatprep.subr.mxu1 %v1267_v5 }
 0x345   :  { %1961 = vmatpush3.msra.mxu1 %v1251_v6  ;;  %v1294_v6 = vld [vmem:[%s3197_s5 + $0x2c0] sm:$0xff] }
 0x346   :  { %1962 = vmatprep.subr.mxu1 %v1266_v7  ;;  %v1278_v7 = vld [vmem:[%s3197_s5 + $0x240] sm:$0xff] }
 0x347   :  { %1963 = vmatpush3.msra.mxu1 %v1250_v9  ;;  %v1293_v9 = vld [vmem:[%s3197_s5 + $0x2b8] sm:$0xff] }
 0x348   :  { %1964 = vmatprep.subr.mxu1 %v1265_v10  ;;  %v1317_v10 = vld [vmem:[%s3197_s5 + $0x378] sm:$0xff] }
 0x349   :  { %1965 = vmatpush3.msra.mxu1 %v1249_v12  ;;  %v1332_v12 = vld [vmem:[%s3197_s5 + $0x3f0] sm:$0xff] }
 0x34a   :  { %1966 = vmatprep.subr.mxu1 %v1264_v14  ;;  %v1316_v14 = vld [vmem:[%s3197_s5 + $0x370] sm:$0xff] }
 0x34b   :  { %1967 = vmatpush3.msra.mxu1 %v1248_v49  ;;  %v1331_v49 = vld [vmem:[%s3197_s5 + $0x3e8] sm:$0xff] }
 0x34c   :  { %1968 = vmatprep.subr.mxu1 %v1263_v17  ;;  %v1315_v17 = vld [vmem:[%s3197_s5 + $0x368] sm:$0xff] }
 0x34d   :  { %1969 = vmatpush3.msra.mxu1 %v1247_v42  ;;  %v1330_v42 = vld [vmem:[%s3197_s5 + $0x3e0] sm:$0xff] }
 0x34e   :  { %1970 = vmatprep.subr.mxu1 %v1262_v20  ;;  %v1314_v20 = vld [vmem:[%s3197_s5 + $0x360] sm:$0xff] }
 0x34f   :  { %1971 = vmatpush3.msra.mxu1 %v1246_v22  ;;  %v1329_v22 = vld [vmem:[%s3197_s5 + $0x3d8] sm:$0xff] }
 0x350   :  { %1972 = vmatprep.subr.mxu1 %v1261_v23 }
 0x351   :  { %1973 = vmatpush3.msra.mxu1 %v1245_v25  ;;  %v1313_v25 = vld [vmem:[%s3197_s5 + $0x358] sm:$0xff] }
 0x352   :  { %1974 = vmatprep.subr.mxu1 %v1260_v26  ;;  %v1288_v26 = vld [vmem:[%s3197_s5 + $0x290] sm:$0xff] }
 0x353   :  { %1975 = vmatpush3.msra.mxu1 %v1244_v27  ;;  %v1328_v27 = vld [vmem:[%s3197_s5 + $0x3d0] sm:$0xff] }
 0x354   :  { %1976 = vmatprep.subr.mxu1 %v1259_v28 }
 0x355   :  { %1977 = vmatpush3.msra.mxu1 %v1243_v29  ;;  %v1184_v29 = vld [vmem:[%s3193_s1 + $0x10] sm:$0xff] }
 0x356   :  { %1978 = vmatprep.subr.mxu1 %v1258_v30  ;;  %v1272_v30 = vld [vmem:[%s3197_s5 + $0x210] sm:$0xff] }
 0x357   :  { %1979 = vmatpush3.msra.mxu1 %v1242_v31  ;;  %v1312_v31 = vld [vmem:[%s3197_s5 + $0x350] sm:$0xff] }
 0x358   :  { %1980 = vmatprep.subr.mxu1 %v1257_v32 }
 0x359   :  { %1981 = vmatpush3.msra.mxu1 %v1241_v33  ;;  %v1287_v33 = vld [vmem:[%s3197_s5 + $0x288] sm:$0xff] }
 0x35a   :  { %1982 = vmatprep.subr.mxu1 %v1256_v34  ;;  %v1327_v34 = vld [vmem:[%s3197_s5 + $0x3c8] sm:$0xff] }
 0x35b   :  { %1983 = vmatpush3.msra.mxu1 %v1240_v35  ;;  %v1271_v35 = vld [vmem:[%s3197_s5 + $0x208] sm:$0xff] }
 0x35c   :  { %1984 = vmatprep.subr.mxu1 %v1255_v36  ;;  %v1311_v36 = vld [vmem:[%s3197_s5 + $0x348] sm:$0xff] }
 0x35d   :  { %1985 = vmatpush3.msra.mxu1 %v1239_v37 }
 0x35e   :  { %1986 = vmatprep.subr.mxu1 %v1254_v43  ;;  %v1286_v43 = vld [vmem:[%s3197_s5 + $0x280] sm:$0xff] }
 0x35f   :  { %1987 = vmatpush3.msra.mxu1 %v1238_v44  ;;  %v1326_v44 = vld [vmem:[%s3197_s5 + $0x3c0] sm:$0xff] }
 0x360   :  { %2026 = vmatprep.subr.mxu1 %v1333_v40  ;;  %v1270_v40 = vld [vmem:[%s3197_s5 + $0x200] sm:$0xff] }
 0x3d0   :  { %v964_v46 = vpop.f32.mrf.mxu1 }
 0x3d2   :  { %v966_v47 = vpop.f32.mrf.mxu1 }
 0x3d3   :  { %v1194_v50 = vcombine.low %v964_v46, %v966_v47  ;;  %v1310_v47 = vld [vmem:[%s3197_s5 + $0x340] sm:$0xff] }
 0x3d5   :  { %v1202_v51 = vmul.f32 %v1194_v50, %v1182_v48  ;;  %v1325_v48 = vld [vmem:[%s3197_s5 + $0x3b8] sm:$0xff] }
 0x3d6   :  { %v1309_v50 = vld [vmem:[%s3197_s5 + $0x338] sm:$0xff] }
 0x3d7   :  { %v1345_v54 = vcombine.high %v1202_v51, %v1202_v51 }
 0x3d9   :  { %1417 = vmatprep.mubr.f32.mxu0 %v1345_v54  ;;  %v1308_v54 = vld [vmem:[%s3197_s5 + $0x330] sm:$0xff] }
 0x3da   :  { %1418 = vmatmul.mubr.f32.vlgmr.msra.gmra.mxu0 %v1202_v51  ;;  %v1324_v51 = vld [vmem:[%s3197_s5 + $0x3b0] sm:$0xff] }
 0x3db   :  { %1992 = vmatpush3.msra.mxu0 %v1285_v55  ;;  %v1323_v55 = vld [vmem:[%s3197_s5 + $0x3a8] sm:$0xff] }
 0x3dc   :  { %1993 = vmatprep.subr.mxu0 %v1300_v39  ;;  %v1307_v39 = vld [vmem:[%s3197_s5 + $0x328] sm:$0xff] }
 0x3dd   :  { %1994 = vmatpush3.msra.mxu0 %v1284_v56  ;;  %v1322_v56 = vld [vmem:[%s3197_s5 + $0x3a0] sm:$0xff] }
 0x3de   :  { %1995 = vmatprep.subr.mxu0 %v1299_v57  ;;  %v1306_v57 = vld [vmem:[%s3197_s5 + $0x320] sm:$0xff] }
 0x3df   :  { %1996 = vmatpush3.msra.mxu0 %v1283_v58 }
 0x3e0   :  { %v1035_v61 = vpop.f32.mrf.mxu1  ;;  %1997 = vmatprep.subr.mxu0 %v1298_v59  ;;  %v1321_v59 = vld [vmem:[%s3197_s5 + $0x398] sm:$0xff] }
 0x3e1   :  { %1998 = vmatpush3.msra.mxu0 %v1282_v60  ;;  %v1305_v60 = vld [vmem:[%s3197_s5 + $0x318] sm:$0xff] }
 0x3e2   :  { %v1037_v1 = vpop.f32.mrf.mxu1  ;;  %1999 = vmatprep.subr.mxu0 %v1297_v63 }
 0x3e3   :  { %v1195_v62 = vcombine.low %v1035_v61, %v1037_v1  ;;  %2000 = vmatpush3.msra.mxu0 %v1281_v38  ;;  %v1185_v61 = vld [vmem:[%s3193_s1 + $0x18] sm:$0xff]  ;;  %v1320_v38 = vld [vmem:[%s3197_s5 + $0x390] sm:$0xff] }
 0x3e4   :  { %2001 = vmatprep.subr.mxu0 %v1296_v0  ;;  %v1304_v1 = vld [vmem:[%s3197_s5 + $0x310] sm:$0xff] }
 0x3e5   :  { %v1203_v5 = vmul.f32 %v1195_v62, %v1183_v52  ;;  %2002 = vmatpush3.msra.mxu0 %v1280_v2  ;;  %v1319_v52 = vld [vmem:[%s3197_s5 + $0x388] sm:$0xff] }
 0x3e6   :  { %2003 = vmatprep.subr.mxu0 %v1295_v41  ;;  %v1303_v62 = vld [vmem:[%s3197_s5 + $0x308] sm:$0xff]  ;;  %v1318_v41 = vld [vmem:[%s3197_s5 + $0x380] sm:$0xff] }
 0x3e7   :  { %2004 = vmatpush3.msra.mxu0 %v1279_v4  ;;  %v1346_v8 = vcombine.high %v1203_v5, %v1203_v5  ;;  %v1302_v4 = vld [vmem:[%s3197_s5 + $0x300] sm:$0xff] }
 0x3e8   :  { %2005 = vmatprep.subr.mxu0 %v1294_v6  ;;  %v1649_v6 = vld [vmem:[#allocation4 + $0x78] sm:$0xff] }
 0x3e9   :  { %1487 = vmatprep.mubr.f32.mxu1 %v1346_v8  ;;  %2006 = vmatpush3.msra.mxu0 %v1278_v7  ;;  %v1648_v7 = vld [vmem:[#allocation4 + $0x70] sm:$0xff]  ;;  %v1647_v8 = vld [vmem:[#allocation4 + $0x68] sm:$0xff] }
 0x3ea   :  { %1488 = vmatmul.mubr.f32.vlgmr.msra.gmra.mxu1 %v1203_v5  ;;  %2007 = vmatprep.subr.mxu0 %v1293_v9  ;;  %v1646_v9 = vld [vmem:[#allocation4 + $0x60] sm:$0xff] }
 0x3eb   :  { %2008 = vmatpush3.msra.mxu0 %v1277_v3  ;;  %2027 = vmatpush3.msra.mxu1 %v1317_v10  ;;  %v1645_v3 = vld [vmem:[#allocation4 + $0x58] sm:$0xff]  ;;  %v1644_v10 = vld [vmem:[#allocation4 + $0x50] sm:$0xff] }
 0x3ec   :  { %2009 = vmatprep.subr.mxu0 %v1292_v11  ;;  %2028 = vmatprep.subr.mxu1 %v1332_v12  ;;  %v1643_v11 = vld [vmem:[#allocation4 + $0x48] sm:$0xff]  ;;  %v1642_v12 = vld [vmem:[#allocation4 + $0x40] sm:$0xff] }
 0x3ed   :  { %2010 = vmatpush3.msra.mxu0 %v1276_v13  ;;  %2029 = vmatpush3.msra.mxu1 %v1316_v14  ;;  %v1641_v13 = vld [vmem:[#allocation4 + $0x38] sm:$0xff]  ;;  %v1640_v14 = vld [vmem:[#allocation4 + $0x30] sm:$0xff] }
 0x3ee   :  { %2011 = vmatprep.subr.mxu0 %v1291_v15  ;;  %2030 = vmatprep.subr.mxu1 %v1331_v49  ;;  %v1639_v15 = vld [vmem:[#allocation4 + $0x28] sm:$0xff]  ;;  %v1638_v49 = vld [vmem:[#allocation4 + $0x20] sm:$0xff] }
 0x3ef   :  { %2012 = vmatpush3.msra.mxu0 %v1275_v16  ;;  %2031 = vmatpush3.msra.mxu1 %v1315_v17  ;;  %v1637_v16 = vld [vmem:[#allocation4 + $0x18] sm:$0xff]  ;;  %v1636_v17 = vld [vmem:[#allocation4 + $0x10] sm:$0xff] }
 0x3f0   :  { %v1106_v23 = vpop.f32.mrf.mxu1  ;;  %2013 = vmatprep.subr.mxu0 %v1290_v18  ;;  %2032 = vmatprep.subr.mxu1 %v1330_v42  ;;  %v1635_v18 = vld [vmem:[#allocation4 + $0x8] sm:$0xff]  ;;  %v1634_v42 = vld [vmem:[#allocation4] sm:$0xff] }
 0x3f1   :  { %2014 = vmatpush3.msra.mxu0 %v1274_v19  ;;  %2033 = vmatpush3.msra.mxu1 %v1314_v20  ;;  %v1743_v19 = vld [vmem:[#allocation6 + $0x78] sm:$0xff]  ;;  %v1742_v20 = vld [vmem:[#allocation6 + $0x70] sm:$0xff] }
 0x3f2   :  { %v1108_v28 = vpop.f32.mrf.mxu1  ;;  %2015 = vmatprep.subr.mxu0 %v1289_v21  ;;  %2034 = vmatprep.subr.mxu1 %v1329_v22  ;;  %v1741_v21 = vld [vmem:[#allocation6 + $0x68] sm:$0xff]  ;;  %v1740_v22 = vld [vmem:[#allocation6 + $0x60] sm:$0xff] }
 0x3f3   :  { %v1196_v32 = vcombine.low %v1106_v23, %v1108_v28  ;;  %2016 = vmatpush3.msra.mxu0 %v1273_v24  ;;  %2035 = vmatpush3.msra.mxu1 %v1313_v25  ;;  %v1739_v23 = vld [vmem:[#allocation6 + $0x58] sm:$0xff]  ;;  %v1738_v24 = vld [vmem:[#allocation6 + $0x50] sm:$0xff]  ;;  %v1737_v25 = vld [vmem:[#allocation6 + $0x48] sm:$0xff] }
 0x3f4   :  { %2017 = vmatprep.subr.mxu0 %v1288_v26  ;;  %2036 = vmatprep.subr.mxu1 %v1328_v27  ;;  %v1736_v26 = vld [vmem:[#allocation6 + $0x40] sm:$0xff]  ;;  %v1735_v27 = vld [vmem:[#allocation6 + $0x38] sm:$0xff]  ;;  %v1734_v28 = vld [vmem:[#allocation6 + $0x30] sm:$0xff] }
 0x3f5   :  { %v1204_v37 = vmul.f32 %v1196_v32, %v1184_v29  ;;  %2018 = vmatpush3.msra.mxu0 %v1272_v30  ;;  %2037 = vmatpush3.msra.mxu1 %v1312_v31  ;;  %v1733_v29 = vld [vmem:[#allocation6 + $0x28] sm:$0xff]  ;;  %v1732_v30 = vld [vmem:[#allocation6 + $0x20] sm:$0xff]  ;;  %v1731_v31 = vld [vmem:[#allocation6 + $0x18] sm:$0xff] }
 0x3f6   :  { %2019 = vmatprep.subr.mxu0 %v1287_v33  ;;  %2038 = vmatprep.subr.mxu1 %v1327_v34 }
 0x3f7   :  { %2020 = vmatpush3.msra.mxu0 %v1271_v35  ;;  %2039 = vmatpush3.msra.mxu1 %v1311_v36  ;;  %v1347_v46 = vcombine.high %v1204_v37, %v1204_v37 }
 0x3f8   :  { %2021 = vmatprep.subr.mxu0 %v1286_v43  ;;  %2040 = vmatprep.subr.mxu1 %v1326_v44  ;;  %v1884_v43 = vld [vmem:[%s3198_s6] ss:$0 sm:$0xff] }
 0x3f9   :  { %2022 = vmatpush3.msra.mxu0 %v1270_v40  ;;  %1557 = vmatprep.mubr.f32.mxu0 %v1347_v46 }
 0x3fa   :  { %2041 = vmatpush3.msra.mxu1 %v1310_v47  ;;  %1558 = vmatmul.mubr.f32.vlgmr.msra.gmra.mxu0 %v1204_v37 }
 0x3fb   :  { %2042 = vmatprep.subr.mxu1 %v1325_v48  ;;  %2147 = vmatprep.subr.mxu0 %v2369_v45 }
 0x3fc   :  { %2043 = vmatpush3.msra.mxu1 %v1309_v50  ;;  %2148 = vmatpush3.msra.mxu0 %v1649_v6 }
 0x3fd   :  { %2044 = vmatprep.subr.mxu1 %v1324_v51  ;;  %2149 = vmatprep.subr.mxu0 %v2369_v45 }
 0x3fe   :  { %2045 = vmatpush3.msra.mxu1 %v1308_v54  ;;  %2150 = vmatpush3.msra.mxu0 %v1648_v7 }
 0x3ff   :  { %2046 = vmatprep.subr.mxu1 %v1323_v55  ;;  %2151 = vmatprep.subr.mxu0 %v2369_v45 }
 0x400   :  { %2047 = vmatpush3.msra.mxu1 %v1307_v39  ;;  %v1177_v58 = vpop.f32.mrf.mxu1  ;;  %2152 = vmatpush3.msra.mxu0 %v1647_v8 }
 0x401   :  { %2048 = vmatprep.subr.mxu1 %v1322_v56  ;;  %2153 = vmatprep.subr.mxu0 %v2369_v45 }
 0x402   :  { %2049 = vmatpush3.msra.mxu1 %v1306_v57  ;;  %v1179_v63 = vpop.f32.mrf.mxu1  ;;  %2154 = vmatpush3.msra.mxu0 %v1646_v9  ;;  %v1730_v57 = vld [vmem:[#allocation6 + $0x10] sm:$0xff] }
 0x403   :  { %v1197_v0 = vcombine.low %v1177_v58, %v1179_v63  ;;  %2050 = vmatprep.subr.mxu1 %v1321_v59  ;;  %2155 = vmatprep.subr.mxu0 %v2369_v45  ;;  %v1729_v58 = vld [vmem:[#allocation6 + $0x8] sm:$0xff]  ;;  %v1728_v59 = vld [vmem:[#allocation6] sm:$0xff] }
 0x404   :  { %2051 = vmatpush3.msra.mxu1 %v1305_v60  ;;  %2156 = vmatpush3.msra.mxu0 %v1645_v3  ;;  %v1885_v60 = vld [vmem:[%s3200_s8] ss:$0 sm:$0xff] }
 0x405   :  { %v1205_v2 = vmul.f32 %v1197_v0, %v1185_v61  ;;  %2052 = vmatprep.subr.mxu1 %v1320_v38  ;;  %2157 = vmatprep.subr.mxu0 %v2369_v45 }
 0x406   :  { %2053 = vmatpush3.msra.mxu1 %v1304_v1  ;;  %2158 = vmatpush3.msra.mxu0 %v1644_v10  ;;  %v1886_v1 = vld [vmem:[%s3202_s10] ss:$0 sm:$0xff] }
 0x407   :  { %2054 = vmatprep.subr.mxu1 %v1319_v52  ;;  %v1348_v5 = vcombine.high %v1205_v2, %v1205_v2  ;;  %2159 = vmatprep.subr.mxu0 %v2369_v45 }
 0x408   :  { %2055 = vmatpush3.msra.mxu1 %v1303_v62  ;;  %2160 = vmatpush3.msra.mxu0 %v1643_v11 }
 0x409   :  { %2056 = vmatprep.subr.mxu1 %v1318_v41  ;;  %1627 = vmatprep.mubr.f32.mxu1 %v1348_v5 }
 0x40a   :  { %2057 = vmatpush3.msra.mxu1 %v1302_v4  ;;  %2161 = vmatprep.subr.mxu0 %v2369_v45 }
 0x40b   :  { %1628 = vmatmul.mubr.f32.vlgmr.msra.gmra.mxu1 %v1205_v2  ;;  %2182 = vmatprep.subr.mxu1 %v2369_v45 }
 0x40c   :  { %2162 = vmatpush3.msra.mxu0 %v1642_v12  ;;  %2179 = vmatprep.mubr.msk.f32.mxu0 %vm2370_vm14, %v2369_v45 }
 0x40d   :  { %2163 = vmatprep.subr.mxu0 %v2369_v45  ;;  %2214 = vmatprep.mubr.msk.f32.mxu1 %vm2370_vm14, %v2369_v45 }
 0x40e   :  { %2164 = vmatpush3.msra.mxu0 %v1641_v13  ;;  %2183 = vmatpush3.msra.mxu1 %v1743_v19 }
 0x40f   :  { %2165 = vmatprep.subr.mxu0 %v2369_v45  ;;  %2184 = vmatprep.subr.mxu1 %v2369_v45 }
 0x410   :  { %2166 = vmatpush3.msra.mxu0 %v1640_v14  ;;  %2185 = vmatpush3.msra.mxu1 %v1742_v20 }
 0x411   :  { %2167 = vmatprep.subr.mxu0 %v2369_v45  ;;  %2186 = vmatprep.subr.mxu1 %v2369_v45 }
 0x412   :  { %2168 = vmatpush3.msra.mxu0 %v1639_v15  ;;  %2187 = vmatpush3.msra.mxu1 %v1741_v21 }
 0x413   :  { %2169 = vmatprep.subr.mxu0 %v2369_v45  ;;  %2188 = vmatprep.subr.mxu1 %v2369_v45 }
 0x414   :  { %2170 = vmatpush3.msra.mxu0 %v1638_v49  ;;  %2189 = vmatpush3.msra.mxu1 %v1740_v22 }
 0x415   :  { %2171 = vmatprep.subr.mxu0 %v2369_v45  ;;  %2190 = vmatprep.subr.mxu1 %v2369_v45 }
 0x416   :  { %2172 = vmatpush3.msra.mxu0 %v1637_v16  ;;  %2191 = vmatpush3.msra.mxu1 %v1739_v23 }
 0x417   :  { %2173 = vmatprep.subr.mxu0 %v2369_v45  ;;  %2192 = vmatprep.subr.mxu1 %v2369_v45 }
 0x418   :  { %2174 = vmatpush3.msra.mxu0 %v1636_v17  ;;  %2193 = vmatpush3.msra.mxu1 %v1738_v24 }
 0x419   :  { %2175 = vmatprep.subr.mxu0 %v2369_v45  ;;  %2194 = vmatprep.subr.mxu1 %v2369_v45 }
 0x41a   :  { %2176 = vmatpush3.msra.mxu0 %v1635_v18  ;;  %2195 = vmatpush3.msra.mxu1 %v1737_v25 }
 0x41b   :  { %2177 = vmatprep.subr.mxu0 %v2369_v45  ;;  %2196 = vmatprep.subr.mxu1 %v2369_v45 }
 0x41c   :  { %2178 = vmatpush3.msra.mxu0 %v1634_v42  ;;  %2197 = vmatpush3.msra.mxu1 %v1736_v26 }
 0x41d   :  { %2198 = vmatprep.subr.mxu1 %v2369_v45 }
 0x41e   :  { %2199 = vmatpush3.msra.mxu1 %v1735_v27 }
 0x41f   :  { %2200 = vmatprep.subr.mxu1 %v2369_v45 }
 0x420   :  { %2201 = vmatpush3.msra.mxu1 %v1734_v28 }
 0x421   :  { %2202 = vmatprep.subr.mxu1 %v2369_v45 }
 0x422   :  { %2203 = vmatpush3.msra.mxu1 %v1733_v29 }
 0x423   :  { %2204 = vmatprep.subr.mxu1 %v2369_v45 }
 0x424   :  { %2205 = vmatpush3.msra.mxu1 %v1732_v30 }
 0x425   :  { %2206 = vmatprep.subr.mxu1 %v2369_v45 }
 0x426   :  { %2207 = vmatpush3.msra.mxu1 %v1731_v31 }
 0x427   :  { %2208 = vmatprep.subr.mxu1 %v2369_v45 }
 0x428   :  { %2209 = vmatpush3.msra.mxu1 %v1730_v57 }
 0x429   :  { %2210 = vmatprep.subr.mxu1 %v2369_v45 }
 0x42a   :  { %2211 = vmatpush3.msra.mxu1 %v1729_v58 }
 0x42b   :  { %2212 = vmatprep.subr.mxu1 %v2369_v45 }
 0x42c   :  { %2213 = vmatpush3.msra.mxu1 %v1728_v59 }
 0x49a   :  { %v1953_v32 = vpop.f32.mrf.mxu0 }
 0x49c   :  { %v1954_v33 = vpop.f32.mrf.mxu0 }
 0x49d   :  { %v1955_v37 = vadd.f32 %v1954_v33, %v1953_v32 }
 0x49f   :  { %v1420_v46 = vadd.f32 %v1955_v37, %v1884_v43 }
 0x4aa   :  { %v1988_v34 = vpop.f32.mrf.mxu1 }
 0x4ac   :  { %v1989_v36 = vpop.f32.mrf.mxu1 }
 0x4ad   :  { %v1990_v40 = vadd.f32 %v1989_v36, %v1988_v34 }
 0x4af   :  { %v1490_v50 = vadd.f32 %v1990_v40, %v1420_v46 }
 0x4ba   :  { %v2023_v35 = vpop.f32.mrf.mxu0 }
 0x4bc   :  { %v2024_v44 = vpop.f32.mrf.mxu0 }
 0x4bd   :  { %v2025_v47 = vadd.f32 %v2024_v44, %v2023_v35 }
 0x4bf   :  { %v1560_v54 = vadd.f32 %v2025_v47, %v1490_v50 }
 0x4cb   :  { %v2058_v48 = vpop.f32.mrf.mxu1 }
 0x4cd   :  { %v2059_v51 = vpop.f32.mrf.mxu1 }
 0x4ce   :  { %v2060_v55 = vadd.f32 %v2059_v51, %v2058_v48 }
 0x4d0   :  { %v1630_v39 = vadd.f32 %v2060_v55, %v1560_v54 }
 0x4d2   :  { %v1633_v56 = vmax.f32 %v1630_v39, 0.0 }
 0x4d4   :  { %2180 = vmatmul.mubr.f32.vlgmr.msra.gmra.mxu0 %v1633_v56 }
 0x594   :  { %v1723_v63 = vpop.f32.mrf.mxu0 }
 0x595   :  { %v1724_v61 = vadd.f32 %v1885_v60, %v1723_v63 }
 0x596   :  { %v2181_v38 = vpop.f32.mrf.mxu0 }
 0x597   :  { %v1727_v0 = vmax.f32 %v1724_v61, 0.0 }
 0x599   :  { %1838 = vst [vmem:[%s3203_s11] sm:$0xf] %v1727_v0  ;;  %2215 = vmatmul.mubr.f32.vlgmr.msra.gmra.mxu1 %v1727_v0 }
 0x659   :  { %v1817_v45 = vpop.f32.mrf.mxu1 }
 0x65a   :  { %v1818_v52 = vadd.f32 %v1886_v1, %v1817_v45 }
 0x65b   :  { %v2216_v2 = vpop.f32.mrf.mxu1 }
 0x65c   :  { %1839 = vst [vmem:[%s3203_s11 + $0x4] sm:$0xf] %v1818_v52  ;;  %v1822_v62 = vsel %vm1821_vm15, %v1818_v52, -1e+30 }
 0x65d   :  { %v1824_v41 = vsel %vm1823_vm0, %v1822_v62, -inf }
 0x65e   :  { %1825 = vmax.xlane.f32.xlu0 %v1824_v41 }
 0x6e7   :  { %v1826_v4 = vpop.xlane.xlu0 %1825 }
 0x6e8   :  { %v1827_v5 = vsub.f32 %v1822_v62, %v1826_v4 }
 0x6ea   :  { %v1828_v6 = vmul.f32 1.442695, %v1827_v5 }
 0x6ec   :  { %2294 = vpow2.f32 %v1828_v6 }
 0x6f9   :  { %v2295_v7 = vpop.eup %2294 }
 0x6fa   :  { %v1830_v8 = vsel %vm1823_vm0, %v2295_v7, 0.0 }
 0x6fb   :  { %1831 = vadd.xlane.f32.xlu1 %v1830_v8 }
 0x784   :  { %v1832_v9 = vpop.xlane.xlu1 %1831 }
 0x785   :  { %2296 = vrcp.f32 %v1832_v9 }
 0x792   :  { %v2297_v53 = vpop.eup %2296 }
 0x793   :  { %v1834_v3 = vmul.f32 %v2297_v53, %v1832_v9 }
 0x795   :  { %v1835_v10 = vsub.f32 2.0, %v1834_v3 }
 0x797   :  { %v1836_v11 = vmul.f32 %v2297_v53, %v1835_v10 }
 0x799   :  { %v1837_v12 = vmul.f32 %v2295_v7, %v1836_v11 }
 0x79b   :  { %1840 = vst [vmem:[%s3203_s11 + $0x8] sm:$0xf] %v1837_v12 }
 0x79c   :  { %1845 = vsyncpa [#allocation3], 1 }
 0x79d   :  { %1846 = vsyncpa [#allocation5], 1 }

// kernel: dann_withatt_forward.3
= control target key start
LH: loop header
LB: loop body
LE: loop exit
PB: predicated region body
PF: predicated region fallthrough
CT: control target
= control target key end

     0   :  { %vm72_vm0 = vcmask 130048   ;;  %vm605_vm1 = vcmask 130112   ;;  %vm612_vm2 = vcmask 195712   ;;  %vm619_vm3 = vcmask 261312   ;;  %s3350_s3 = inlined_call_operand.vmem [shape: f32[16,16], index: 3, kind: input, shape index: {}]   ;;  %s3351_s0 = inlined_call_operand.vmem [shape: f32[4,64,16], index: 0, kind: input, shape index: {}]   ;;  %s3352_s4 = inlined_call_operand.vmem [shape: f32[1,16], index: 4, kind: input, shape index: {}]   ;;  %s3353_s2 = inlined_call_operand.vmem [shape: f32[64,1024], index: 2, kind: input, shape index: {}]   ;;  %s3354_s5 = inlined_call_operand.vmem [shape: f32[1024,128], index: 5, kind: input, shape index: {}]   ;;  %s3355_s1 = inlined_call_operand.vmem [shape: f32[4,1024], index: 1, kind: input, shape index: {}]   ;;  %s3356_s7 = inlined_call_operand.vmem [shape: f32[128,128], index: 7, kind: input, shape index: {}]   ;;  %s3357_s9 = inlined_call_operand.vmem [shape: f32[128,128], index: 9, kind: input, shape index: {}]   ;;  %s3358_s6 = inlined_call_operand.vmem [shape: f32[1,128], index: 6, kind: input, shape index: {}]   ;;  %s3359_s8 = inlined_call_operand.vmem [shape: f32[1,128], index: 8, kind: input, shape index: {}]   ;;  %s3360_s11 = inlined_call_operand.vmem [shape: f32[4,384], index: 11, kind: output, shape index: {}]   ;;  %s3361_s10 = inlined_call_operand.vmem [shape: f32[1,128], index: 10, kind: input, shape index: {}]  }
   0x1   :  { %v71_v0 = vld [vmem:[%s3350_s3 + $0x8] sm:$0xff]  ;;  %v70_v1 = vld [vmem:[%s3350_s3] sm:$0xff]  ;;  %v40_v4 = vld [vmem:[%s3351_s0 + $0x10] sm:$0xff]  ;;  %vm626_vm4 = vcmask 326912   ;;  %vm633_vm5 = vcmask 392512   ;;  %vm640_vm6 = vcmask 458112  }
   0x2   :  { %v38_v2 = vld [vmem:[%s3351_s0] sm:$0xff]  ;;  %2052 = vmatprep.subr.mxu0 %v71_v0  ;;  %v39_v3 = vld [vmem:[%s3351_s0 + $0x8] sm:$0xff]  ;;  %v41_v5 = vld [vmem:[%s3351_s0 + $0x18] sm:$0xff]  ;;  %vm647_vm7 = vcmask 523712   ;;  %vm766_vm8 = vcmask 1041409   ;;  %vm768_vm9 = vcmask 1042434  }
   0x3   :  { %2056 = vmatprep.mubr.msk.f32.mxu0 %vm72_vm0, %v38_v2  ;;  %2053 = vmatpush3.msra.mxu0 %v71_v0  ;;  %v42_v6 = vld [vmem:[%s3351_s0 + $0x20] sm:$0xff]  ;;  %v43_v7 = vld [vmem:[%s3351_s0 + $0x28] sm:$0xff]  ;;  %v44_v8 = vld [vmem:[%s3351_s0 + $0x30] sm:$0xff]  ;;  %vm770_vm10 = vcmask 1043459   ;;  %vm774_vm12 = vcmask 519168   ;;  %vm853_vm13 = vcmask 523264  }
   0x4   :  { %2054 = vmatprep.subr.mxu0 %v70_v1  ;;  %v45_v9 = vld [vmem:[%s3351_s0 + $0x38] sm:$0xff]  ;;  %v46_v10 = vld [vmem:[%s3351_s0 + $0x40] sm:$0xff]  ;;  %v47_v11 = vld [vmem:[%s3351_s0 + $0x48] sm:$0xff]  ;;  %vm2249_vm14 = vmmov 0  }
   0x5   :  { %2055 = vmatpush3.msra.mxu0 %v70_v1  ;;  %v48_v12 = vld [vmem:[%s3351_s0 + $0x50] sm:$0xff]  ;;  %v49_v13 = vld [vmem:[%s3351_s0 + $0x58] sm:$0xff]  ;;  %v50_v14 = vld [vmem:[%s3351_s0 + $0x60] sm:$0xff] }
   0x6   :  { %2057 = vmatmul.mubr.msk.f32.vlgmr.msra.gmra.mxu0 %vm72_vm0, %v39_v3  ;;  %v51_v15 = vld [vmem:[%s3351_s0 + $0x68] sm:$0xff]  ;;  %v52_v16 = vld [vmem:[%s3351_s0 + $0x70] sm:$0xff]  ;;  %v53_v17 = vld [vmem:[%s3351_s0 + $0x78] sm:$0xff] }
   0x7   :  { %2059 = vmatprep.mubr.msk.f32.mxu0 %vm72_vm0, %v40_v4  ;;  %v54_v18 = vld [vmem:[%s3351_s0 + $0x80] sm:$0xff]  ;;  %v55_v19 = vld [vmem:[%s3351_s0 + $0x88] sm:$0xff]  ;;  %v56_v20 = vld [vmem:[%s3351_s0 + $0x90] sm:$0xff] }
   0x8   :  { %v57_v21 = vld [vmem:[%s3351_s0 + $0x98] sm:$0xff]  ;;  %v58_v22 = vld [vmem:[%s3351_s0 + $0xa0] sm:$0xff]  ;;  %v59_v23 = vld [vmem:[%s3351_s0 + $0xa8] sm:$0xff] }
   0x9   :  { %v60_v24 = vld [vmem:[%s3351_s0 + $0xb0] sm:$0xff]  ;;  %v61_v25 = vld [vmem:[%s3351_s0 + $0xb8] sm:$0xff]  ;;  %v62_v26 = vld [vmem:[%s3351_s0 + $0xc0] sm:$0xff] }
   0xa   :  { %2060 = vmatmul.mubr.msk.f32.gmra.mxu0 %vm72_vm0, %v41_v5  ;;  %v63_v27 = vld [vmem:[%s3351_s0 + $0xc8] sm:$0xff]  ;;  %v64_v28 = vld [vmem:[%s3351_s0 + $0xd0] sm:$0xff]  ;;  %v65_v29 = vld [vmem:[%s3351_s0 + $0xd8] sm:$0xff] }
   0xb   :  { %2062 = vmatprep.mubr.msk.f32.mxu0 %vm72_vm0, %v42_v6  ;;  %v66_v30 = vld [vmem:[%s3351_s0 + $0xe0] sm:$0xff]  ;;  %v67_v31 = vld [vmem:[%s3351_s0 + $0xe8] sm:$0xff]  ;;  %v68_v32 = vld [vmem:[%s3351_s0 + $0xf0] sm:$0xff] }
   0xc   :  { %v69_v33 = vld [vmem:[%s3351_s0 + $0xf8] sm:$0xff]  ;;  %v2447_v41 = vld [vmem:[%s3352_s4] ss:$0 sm:$0xff] }
   0xe   :  { %2063 = vmatmul.mubr.msk.f32.gmra.mxu0 %vm72_vm0, %v43_v7 }
   0xf   :  { %2065 = vmatprep.mubr.msk.f32.mxu0 %vm72_vm0, %v44_v8 }
  0x12   :  { %2066 = vmatmul.mubr.msk.f32.gmra.mxu0 %vm72_vm0, %v45_v9 }
  0x13   :  { %2068 = vmatprep.mubr.msk.f32.mxu0 %vm72_vm0, %v46_v10 }
  0x16   :  { %2069 = vmatmul.mubr.msk.f32.gmra.mxu0 %vm72_vm0, %v47_v11 }
  0x17   :  { %2071 = vmatprep.mubr.msk.f32.mxu0 %vm72_vm0, %v48_v12 }
  0x1a   :  { %2072 = vmatmul.mubr.msk.f32.gmra.mxu0 %vm72_vm0, %v49_v13 }
  0x1b   :  { %2074 = vmatprep.mubr.msk.f32.mxu0 %vm72_vm0, %v50_v14 }
  0x1e   :  { %2075 = vmatmul.mubr.msk.f32.gmra.mxu0 %vm72_vm0, %v51_v15 }
  0x1f   :  { %2077 = vmatprep.mubr.msk.f32.mxu0 %vm72_vm0, %v52_v16 }
  0x22   :  { %2078 = vmatmul.mubr.msk.f32.gmra.mxu0 %vm72_vm0, %v53_v17 }
  0x23   :  { %2080 = vmatprep.mubr.msk.f32.mxu0 %vm72_vm0, %v54_v18 }
  0x26   :  { %2081 = vmatmul.mubr.msk.f32.gmra.mxu0 %vm72_vm0, %v55_v19 }
  0x27   :  { %2083 = vmatprep.mubr.msk.f32.mxu0 %vm72_vm0, %v56_v20 }
  0x2a   :  { %2084 = vmatmul.mubr.msk.f32.gmra.mxu0 %vm72_vm0, %v57_v21 }
  0x2b   :  { %2086 = vmatprep.mubr.msk.f32.mxu0 %vm72_vm0, %v58_v22 }
  0x2e   :  { %2087 = vmatmul.mubr.msk.f32.gmra.mxu0 %vm72_vm0, %v59_v23 }
  0x2f   :  { %2089 = vmatprep.mubr.msk.f32.mxu0 %vm72_vm0, %v60_v24 }
  0x32   :  { %2090 = vmatmul.mubr.msk.f32.gmra.mxu0 %vm72_vm0, %v61_v25 }
  0x33   :  { %2092 = vmatprep.mubr.msk.f32.mxu0 %vm72_vm0, %v62_v26 }
  0x36   :  { %2093 = vmatmul.mubr.msk.f32.gmra.mxu0 %vm72_vm0, %v63_v27 }
  0x37   :  { %2095 = vmatprep.mubr.msk.f32.mxu0 %vm72_vm0, %v64_v28 }
  0x3a   :  { %2096 = vmatmul.mubr.msk.f32.gmra.mxu0 %vm72_vm0, %v65_v29 }
  0x3b   :  { %2098 = vmatprep.mubr.msk.f32.mxu0 %vm72_vm0, %v66_v30 }
  0x3e   :  { %2099 = vmatmul.mubr.msk.f32.gmra.mxu0 %vm72_vm0, %v67_v31 }
  0x3f   :  { %2101 = vmatprep.mubr.msk.f32.mxu0 %vm72_vm0, %v68_v32 }
  0x42   :  { %2102 = vmatmul.mubr.msk.f32.gmra.mxu0 %vm72_vm0, %v69_v33 }
  0xc6   :  { %v2058_v34 = vpop.f32.mrf.mxu0 }
  0xc7   :  { %2176 = vtanh.f32 %v2058_v34 }
  0xc8   :  { %v235_v35 = vpop.f32.mrf.mxu0 }
  0xc9   :  { %2178 = vtanh.f32 %v235_v35 }
  0xca   :  { %v2061_v36 = vpop.f32.mrf.mxu0 }
  0xcb   :  { %2180 = vtanh.f32 %v2061_v36 }
  0xcc   :  { %v245_v37 = vpop.f32.mrf.mxu0 }
  0xcd   :  { %2182 = vtanh.f32 %v245_v37 }
  0xce   :  { %v2064_v38 = vpop.f32.mrf.mxu0 }
  0xcf   :  { %2184 = vtanh.f32 %v2064_v38 }
  0xd0   :  { %v255_v39 = vpop.f32.mrf.mxu0 }
  0xd1   :  { %2186 = vtanh.f32 %v255_v39 }
  0xd2   :  { %v2067_v40 = vpop.f32.mrf.mxu0 }
  0xd3   :  { %2188 = vtanh.f32 %v2067_v40 }
  0xd4   :  { %v2177_v42 = vpop.eup %2176  ;;  %v265_v43 = vpop.f32.mrf.mxu0 }
  0xd5   :  { %v434_v44 = vmul.f32 %v2177_v42, %v2447_v41  ;;  %2190 = vtanh.f32 %v265_v43 }
  0xd6   :  { %v2179_v45 = vpop.eup %2178  ;;  %v2070_v46 = vpop.f32.mrf.mxu0 }
  0xd7   :  { %v468_v47 = vsel %vm72_vm0, %v434_v44, 0.0  ;;  %v433_v48 = vmul.f32 %v2179_v45, %v2447_v41  ;;  %2192 = vtanh.f32 %v2070_v46 }
  0xd8   :  { %v2181_v49 = vpop.eup %2180  ;;  %469 = vadd.xlane.f32.xlu0 %v468_v47  ;;  %v275_v50 = vpop.f32.mrf.mxu0 }
  0xd9   :  { %v436_v52 = vmul.f32 %v2181_v49, %v2447_v41  ;;  %v465_v54 = vsel %vm72_vm0, %v433_v48, 0.0  ;;  %2194 = vtanh.f32 %v275_v50 }
  0xda   :  { %v2073_v51 = vpop.f32.mrf.mxu0  ;;  %v2183_v53 = vpop.eup %2182 }
  0xdb   :  { %v474_v60 = vsel %vm72_vm0, %v436_v52, 0.0  ;;  %v435_v62 = vmul.f32 %v2183_v53, %v2447_v41 }
  0xdc   :  { %v2185_v55 = vpop.eup %2184  ;;  %466 = vadd.xlane.f32.xlu0 %v465_v54  ;;  %v285_v56 = vpop.f32.mrf.mxu0 }
  0xdd   :  { %v438_v57 = vmul.f32 %v2185_v55, %v2447_v41  ;;  %v471_v3 = vsel %vm72_vm0, %v435_v62, 0.0 }
  0xde   :  { %v2187_v58 = vpop.eup %2186  ;;  %v2076_v59 = vpop.f32.mrf.mxu0 }
  0xdf   :  { %2196 = vtanh.f32 %v2076_v59  ;;  %v480_v61 = vsel %vm72_vm0, %v438_v57, 0.0  ;;  %v437_v63 = vmul.f32 %v2187_v58, %v2447_v41 }
  0xe0   :  { %v2189_v0 = vpop.eup %2188  ;;  %475 = vadd.xlane.f32.xlu0 %v474_v60  ;;  %481 = vadd.xlane.f32.xlu1 %v480_v61  ;;  %v295_v1 = vpop.f32.mrf.mxu0 }
  0xe1   :  { %2198 = vtanh.f32 %v295_v1  ;;  %v477_v4 = vsel %vm72_vm0, %v437_v63, 0.0  ;;  %v440_v5 = vmul.f32 %v2189_v0, %v2447_v41 }
  0xe2   :  { %2200 = vtanh.f32 %v2073_v51  ;;  %v2079_v2 = vpop.f32.mrf.mxu0  ;;  %v2191_v6 = vpop.eup %2190 }
  0xe3   :  { %2202 = vtanh.f32 %v2079_v2  ;;  %v486_v10 = vsel %vm72_vm0, %v440_v5, 0.0  ;;  %v439_v11 = vmul.f32 %v2191_v6, %v2447_v41 }
  0xe4   :  { %472 = vadd.xlane.f32.xlu0 %v471_v3  ;;  %478 = vadd.xlane.f32.xlu1 %v477_v4  ;;  %v305_v7 = vpop.f32.mrf.mxu0  ;;  %2204 = vtanh.f32 %v285_v56  ;;  %v2193_v9 = vpop.eup %2192 }
  0xe5   :  { %2206 = vtanh.f32 %v305_v7  ;;  %v442_v14 = vmul.f32 %v2193_v9, %v2447_v41  ;;  %v483_v16 = vsel %vm72_vm0, %v439_v11, 0.0 }
  0xe6   :  { %v2082_v8 = vpop.f32.mrf.mxu0  ;;  %v2195_v15 = vpop.eup %2194 }
  0xe7   :  { %2208 = vtanh.f32 %v2082_v8  ;;  %v492_v22 = vsel %vm72_vm0, %v442_v14, 0.0  ;;  %v441_v25 = vmul.f32 %v2195_v15, %v2447_v41 }
  0xe8   :  { %487 = vadd.xlane.f32.xlu1 %v486_v10  ;;  %v315_v12 = vpop.f32.mrf.mxu0 }
  0xe9   :  { %2210 = vtanh.f32 %v315_v12  ;;  %v489_v32 = vsel %vm72_vm0, %v441_v25, 0.0 }
  0xea   :  { %v2085_v13 = vpop.f32.mrf.mxu0 }
  0xeb   :  { %2212 = vtanh.f32 %v2085_v13 }
  0xec   :  { %v2197_v17 = vpop.eup %2196  ;;  %484 = vadd.xlane.f32.xlu1 %v483_v16  ;;  %v325_v18 = vpop.f32.mrf.mxu0 }
  0xed   :  { %v446_v19 = vmul.f32 %v2197_v17, %v2447_v41  ;;  %2214 = vtanh.f32 %v325_v18 }
  0xee   :  { %v2199_v20 = vpop.eup %2198  ;;  %v2088_v21 = vpop.f32.mrf.mxu0 }
  0xef   :  { %v2201_v23 = vpop.eup %2200  ;;  %v504_v24 = vsel %vm72_vm0, %v446_v19, 0.0  ;;  %v445_v26 = vmul.f32 %v2199_v20, %v2447_v41  ;;  %2216 = vtanh.f32 %v2088_v21 }
  0xf0   :  { %v2203_v27 = vpop.eup %2202  ;;  %493 = vadd.xlane.f32.xlu1 %v492_v22  ;;  %505 = vadd.xlane.f32.xlu0 %v504_v24  ;;  %v335_v28 = vpop.f32.mrf.mxu0  ;;  %v444_v30 = vmul.f32 %v2201_v23, %v2447_v41 }
  0xf1   :  { %v2205_v31 = vpop.eup %2204  ;;  %v501_v33 = vsel %vm72_vm0, %v445_v26, 0.0  ;;  %v448_v34 = vmul.f32 %v2203_v27, %v2447_v41  ;;  %2218 = vtanh.f32 %v335_v28 }
  0xf2   :  { %v2091_v29 = vpop.f32.mrf.mxu0  ;;  %v2207_v35 = vpop.eup %2206  ;;  %v498_v38 = vsel %vm72_vm0, %v444_v30, 0.0  ;;  %v443_v42 = vmul.f32 %v2205_v31, %v2447_v41 }
  0xf3   :  { %v510_v40 = vsel %vm72_vm0, %v448_v34, 0.0  ;;  %v447_v43 = vmul.f32 %v2207_v35, %v2447_v41 }
  0xf4   :  { %490 = vadd.xlane.f32.xlu1 %v489_v32  ;;  %502 = vadd.xlane.f32.xlu0 %v501_v33  ;;  %v345_v36 = vpop.f32.mrf.mxu0  ;;  %v2209_v39 = vpop.eup %2208  ;;  %v495_v49 = vsel %vm72_vm0, %v443_v42, 0.0 }
  0xf5   :  { %v450_v47 = vmul.f32 %v2209_v39, %v2447_v41  ;;  %v507_v50 = vsel %vm72_vm0, %v447_v43, 0.0 }
  0xf6   :  { %v2094_v37 = vpop.f32.mrf.mxu0  ;;  %v2211_v44 = vpop.eup %2210 }
  0xf7   :  { %2220 = vtanh.f32 %v2094_v37  ;;  %v449_v51 = vmul.f32 %v2211_v44, %v2447_v41  ;;  %v516_v54 = vsel %vm72_vm0, %v450_v47, 0.0 }
  0xf8   :  { %499 = vadd.xlane.f32.xlu1 %v498_v38  ;;  %511 = vadd.xlane.f32.xlu0 %v510_v40  ;;  %v355_v45 = vpop.f32.mrf.mxu0  ;;  %2222 = vtanh.f32 %v345_v36  ;;  %v2213_v48 = vpop.eup %2212 }
  0xf9   :  { %v513_v56 = vsel %vm72_vm0, %v449_v51, 0.0  ;;  %v452_v57 = vmul.f32 %v2213_v48, %v2447_v41 }
  0xfa   :  { %v2097_v46 = vpop.f32.mrf.mxu0  ;;  %v2215_v52 = vpop.eup %2214 }
  0xfb   :  { %2224 = vtanh.f32 %v2097_v46  ;;  %v451_v58 = vmul.f32 %v2215_v52, %v2447_v41  ;;  %v522_v63 = vsel %vm72_vm0, %v452_v57, 0.0 }
  0xfc   :  { %496 = vadd.xlane.f32.xlu1 %v495_v49  ;;  %508 = vadd.xlane.f32.xlu0 %v507_v50  ;;  %v365_v53 = vpop.f32.mrf.mxu0  ;;  %v2217_v59 = vpop.eup %2216  ;;  %v561_v50 = vlaneseq }
  0xfd   :  { %2226 = vtanh.f32 %v365_v53  ;;  %v519_v0 = vsel %vm72_vm0, %v451_v58, 0.0  ;;  %v454_v1 = vmul.f32 %v2217_v59, %v2447_v41 }
  0xfe   :  { %2228 = vtanh.f32 %v355_v45  ;;  %v2100_v55 = vpop.f32.mrf.mxu0  ;;  %v2219_v62 = vpop.eup %2218  ;;  %v2529_v53 = vand.u32 127, %v561_v50  ;;  %v597_v57 = vshrl.u32 %v561_v50, 7 }
  0xff   :  { %2230 = vtanh.f32 %v2100_v55  ;;  %v528_v6 = vsel %vm72_vm0, %v454_v1, 0.0  ;;  %v453_v8 = vmul.f32 %v2219_v62, %v2447_v41 }
 0x100   :  { %517 = vadd.xlane.f32.xlu1 %v516_v54  ;;  %514 = vadd.xlane.f32.xlu0 %v513_v56  ;;  %v375_v60 = vpop.f32.mrf.mxu0  ;;  %2232 = vtanh.f32 %v2091_v29  ;;  %v607_v56 = vadd.s32 4294967280, %v2529_v53  ;;  %v600_v58 = vadd.s32 4294967288, %v2529_v53  ;;  %vm563_vm11 = vcmp.lt.s32.totalorder %v2529_v53, 62 }
 0x101   :  { %2234 = vtanh.f32 %v375_v60  ;;  %v525_v13 = vsel %vm72_vm0, %v453_v8, 0.0  ;;  %vm1780_vm15 = vcmp.lt.s32.totalorder %v2529_v53, 4 }
 0x102   :  { %v2103_v61 = vpop.f32.mrf.mxu0  ;;  %v2538_v62 = vsub.s32 %v607_v56, %v597_v57 }
 0x103   :  { %2236 = vtanh.f32 %v2103_v61  ;;  %v2536_v61 = vsub.s32 %v2529_v53, %v597_v57 }
 0x104   :  { %v2221_v2 = vpop.eup %2220  ;;  %523 = vadd.xlane.f32.xlu1 %v522_v63  ;;  %520 = vadd.xlane.f32.xlu0 %v519_v0  ;;  %v385_v3 = vpop.f32.mrf.mxu0  ;;  %v603_v63 = vsub.s32 %v600_v58, %v597_v57  ;;  %v614_v0 = vadd.s32 4294967272, %v2529_v53 }
 0x105   :  { %v458_v4 = vmul.f32 %v2221_v2, %v2447_v41  ;;  %v2223_v5 = vpop.eup %2222  ;;  %2238 = vtanh.f32 %v385_v3 }
 0x106   :  { %v455_v15 = vmul.f32 %v2223_v5, %v2447_v41  ;;  %v617_v8 = vsub.s32 %v614_v0, %v597_v57 }
 0x107   :  { %v540_v7 = vsel %vm72_vm0, %v458_v4, 0.0 }
 0x108   :  { %v2225_v9 = vpop.eup %2224  ;;  %529 = vadd.xlane.f32.xlu1 %v528_v6  ;;  %541 = vadd.xlane.f32.xlu0 %v540_v7  ;;  %v531_v20 = vsel %vm72_vm0, %v455_v15, 0.0  ;;  %v621_v6 = vadd.s32 4294967264, %v2529_v53  ;;  %v628_v15 = vadd.s32 4294967256, %v2529_v53 }
 0x109   :  { %v460_v10 = vmul.f32 %v2225_v9, %v2447_v41 }
 0x10a   :  { %v2227_v11 = vpop.eup %2226 }
 0x10b   :  { %v2229_v12 = vpop.eup %2228  ;;  %v546_v14 = vsel %vm72_vm0, %v460_v10, 0.0  ;;  %v459_v16 = vmul.f32 %v2227_v11, %v2447_v41 }
 0x10c   :  { %v2231_v17 = vpop.eup %2230  ;;  %526 = vadd.xlane.f32.xlu1 %v525_v13  ;;  %547 = vadd.xlane.f32.xlu0 %v546_v14  ;;  %v457_v22 = vmul.f32 %v2229_v12, %v2447_v41 }
 0x10d   :  { %v462_v18 = vmul.f32 %v2231_v17, %v2447_v41  ;;  %v2233_v19 = vpop.eup %2232  ;;  %v543_v21 = vsel %vm72_vm0, %v459_v16, 0.0  ;;  %v624_v17 = vsub.s32 %v621_v6, %v597_v57 }
 0x10e   :  { %v2235_v23 = vpop.eup %2234  ;;  %v537_v26 = vsel %vm72_vm0, %v457_v22, 0.0  ;;  %v456_v27 = vmul.f32 %v2233_v19, %v2447_v41  ;;  %v635_v19 = vadd.s32 4294967248, %v2529_v53 }
 0x10f   :  { %v552_v24 = vsel %vm72_vm0, %v462_v18, 0.0  ;;  %v461_v28 = vmul.f32 %v2235_v23, %v2447_v41  ;;  %v642_v18 = vadd.s32 4294967240, %v2529_v53 }
 0x110   :  { %532 = vadd.xlane.f32.xlu1 %v531_v20  ;;  %544 = vadd.xlane.f32.xlu0 %v543_v21  ;;  %v2237_v25 = vpop.eup %2236  ;;  %v534_v30 = vsel %vm72_vm0, %v456_v27, 0.0 }
 0x111   :  { %v549_v31 = vsel %vm72_vm0, %v461_v28, 0.0  ;;  %v464_v32 = vmul.f32 %v2237_v25, %v2447_v41 }
 0x112   :  { %v2239_v29 = vpop.eup %2238 }
 0x113   :  { %v463_v33 = vmul.f32 %v2239_v29, %v2447_v41  ;;  %v558_v34 = vsel %vm72_vm0, %v464_v32, 0.0  ;;  %v638_v32 = vsub.s32 %v635_v19, %v597_v57 }
 0x114   :  { %538 = vadd.xlane.f32.xlu1 %v537_v26  ;;  %553 = vadd.xlane.f32.xlu0 %v552_v24 }
 0x115   :  { %v555_v35 = vsel %vm72_vm0, %v463_v33, 0.0  ;;  %vm1782_vm0 = vcmask 1043456  }
 0x118   :  { %535 = vadd.xlane.f32.xlu1 %v534_v30  ;;  %550 = vadd.xlane.f32.xlu0 %v549_v31  ;;  %v631_v30 = vsub.s32 %v628_v15, %v597_v57  ;;  %v645_v31 = vsub.s32 %v642_v18, %v597_v57 }
 0x11c   :  { %559 = vadd.xlane.f32.xlu1 %v558_v34  ;;  %556 = vadd.xlane.f32.xlu0 %v555_v35 }
 0x161   :  { %v470_v36 = vpop.xlane.xlu0 %469 }
 0x162   :  { %v604_v14 = vrot.slane %v470_v36, %v603_v63 }
 0x165   :  { %v467_v37 = vpop.xlane.xlu0 %466 }
 0x166   :  { %v599_v7 = vrot.slane %v467_v37, %v2536_v61 }
 0x168   :  { %v606_v20 = vsel %vm605_vm1, %v604_v14, %v599_v7 }
 0x169   :  { %v2513_v38 = vpop.xlane.xlu1 %481  ;;  %v2517_v40 = vpop.xlane.xlu0 %475 }
 0x16a   :  { %v618_v29 = vrot.slane %v2517_v40, %v617_v8 }
 0x16d   :  { %v2515_v39 = vpop.xlane.xlu1 %478  ;;  %v473_v43 = vpop.xlane.xlu0 %472 }
 0x16e   :  { %v611_v10 = vrot.slane %v473_v43, %v2538_v62  ;;  %v625_v43 = vrot.slane %v2515_v39, %v624_v17 }
 0x170   :  { %v613_v24 = vsel %vm612_vm2, %v611_v10, %v606_v20 }
 0x171   :  { %v2519_v42 = vpop.xlane.xlu1 %487  ;;  %v620_v34 = vsel %vm619_vm3, %v618_v29, %v613_v24  ;;  %v846_v29 = vld [vmem:[%s3353_s2 + $0x1c8] sm:$0xff] }
 0x172   :  { %873 = vmatprep.subr.mxu1 %v846_v29  ;;  %v849_v29 = vld [vmem:[%s3353_s2 + $0x1e0] sm:$0xff] }
 0x175   :  { %v2521_v41 = vpop.xlane.xlu1 %484 }
 0x176   :  { %v639_v56 = vrot.slane %v2521_v41, %v638_v32 }
 0x179   :  { %v494_v44 = vpop.xlane.xlu1 %493  ;;  %v2523_v45 = vpop.xlane.xlu0 %505 }
 0x17a   :  { %v656_v5 = vrot.slane %v494_v44, %v603_v63  ;;  %v676_v35 = vrot.slane %v2523_v45, %v631_v30  ;;  %v632_v45 = vrot.slane %v2513_v38, %v631_v30 }
 0x17d   :  { %v491_v46 = vpop.xlane.xlu1 %490  ;;  %v503_v47 = vpop.xlane.xlu0 %502 }
 0x17e   :  { %v652_v1 = vrot.slane %v491_v46, %v2536_v61  ;;  %v671_v25 = vrot.slane %v503_v47, %v624_v17 }
 0x180   :  { %v657_v9 = vsel %vm605_vm1, %v656_v5, %v652_v1 }
 0x181   :  { %v500_v48 = vpop.xlane.xlu1 %499  ;;  %v2525_v49 = vpop.xlane.xlu0 %511 }
 0x182   :  { %v666_v16 = vrot.slane %v500_v48, %v617_v8  ;;  %v686_v5 = vrot.slane %v2525_v49, %v645_v31 }
 0x185   :  { %v497_v51 = vpop.xlane.xlu1 %496  ;;  %v2527_v52 = vpop.xlane.xlu0 %508 }
 0x186   :  { %v661_v2 = vrot.slane %v497_v51, %v2538_v62 }
 0x188   :  { %v662_v11 = vsel %vm612_vm2, %v661_v2, %v657_v9  ;;  %v646_v9 = vrot.slane %v2519_v42, %v645_v31 }
 0x189   :  { %v518_v54 = vpop.xlane.xlu1 %517  ;;  %v515_v55 = vpop.xlane.xlu0 %514  ;;  %v667_v21 = vsel %vm619_vm3, %v666_v16, %v662_v11 }
 0x18a   :  { %v695_v22 = vrot.slane %v518_v54, %v603_v63  ;;  %v691_v23 = vrot.slane %v515_v55, %v2536_v61  ;;  %v672_v33 = vsel %vm626_vm4, %v671_v25, %v667_v21  ;;  %v627_v54 = vsel %vm626_vm4, %v625_v43, %v620_v34  ;;  %v829_v34 = vld [vmem:[%s3353_s2 + $0x140] sm:$0xff] }
 0x18b   :  { %v677_v48 = vsel %vm633_vm5, %v676_v35, %v672_v33  ;;  %v681_v55 = vrot.slane %v2527_v52, %v638_v32  ;;  %v830_v33 = vld [vmem:[%s3353_s2 + $0x148] sm:$0xff]  ;;  %v813_v43 = vld [vmem:[%s3353_s2 + $0xc0] sm:$0xff] }
 0x18c   :  { %v696_v36 = vsel %vm605_vm1, %v695_v22, %v691_v23  ;;  %v822_v35 = vld [vmem:[%s3353_s2 + $0x108] sm:$0xff] }
 0x18d   :  { %v2533_v59 = vpop.xlane.xlu1 %523  ;;  %v521_v60 = vpop.xlane.xlu0 %520 }
 0x18e   :  { %v700_v26 = vrot.slane %v521_v60, %v2538_v62  ;;  %v705_v37 = vrot.slane %v2533_v59, %v617_v8  ;;  %v682_v60 = vsel %vm640_vm6, %v681_v55, %v677_v48  ;;  %v790_v48 = vld [vmem:[%s3353_s2 + $0x8] sm:$0xff]  ;;  %v1180_v55 = vld [vmem:[%s3354_s5 + $0x78] sm:$0xff] }
 0x190   :  { %v701_v44 = vsel %vm612_vm2, %v700_v26, %v696_v36  ;;  %v821_v36 = vld [vmem:[%s3353_s2 + $0x100] sm:$0xff] }
 0x191   :  { %v2543_v3 = vpop.xlane.xlu1 %529  ;;  %v542_v4 = vpop.xlane.xlu0 %541  ;;  %v706_v57 = vsel %vm619_vm3, %v705_v37, %v701_v44  ;;  %v814_v37 = vld [vmem:[%s3353_s2 + $0xc8] sm:$0xff] }
 0x192   :  { %v734_v50 = vrot.slane %v542_v4, %v603_v63  ;;  %v715_v52 = vrot.slane %v2543_v3, %v631_v30  ;;  %v634_v4 = vsel %vm633_vm5, %v632_v45, %v627_v54  ;;  %v687_v3 = vsel %vm647_vm7, %v686_v5, %v682_v60  ;;  %v806_v44 = vld [vmem:[%s3353_s2 + $0x88] sm:$0xff]  ;;  %v1196_v54 = vld [vmem:[%s3354_s5 + $0xf8] sm:$0xff]  ;;  %v1177_v60 = vld [vmem:[%s3354_s5 + $0x60] sm:$0xff] }
 0x193   :  { %v641_v6 = vsel %vm640_vm6, %v639_v56, %v634_v4  ;;  %v2248_v45 = vmov 0.0   ;;  %1878 = vmatprep.subr.mxu0 %v1196_v54  ;;  %v1179_v56 = vld [vmem:[%s3354_s5 + $0x70] sm:$0xff]  ;;  %v1172_v4 = vld [vmem:[%s3354_s5 + $0x38] sm:$0xff] }
 0x194   :  { %v648_v16 = vsel %vm647_vm7, %v646_v9, %v641_v6  ;;  %921 = vmatprep.mubr.f32.mxu1 %v2248_v45  ;;  %1879 = vmatpush3.msra.mxu0 %v1180_v55  ;;  %v1187_v5 = vld [vmem:[%s3354_s5 + $0xb0] sm:$0xff]  ;;  %v1185_v9 = vld [vmem:[%s3354_s5 + $0xa0] sm:$0xff]  ;;  %v844_v54 = vld [vmem:[%s3353_s2 + $0x1b8] sm:$0xff] }
 0x195   :  { %v527_v12 = vpop.xlane.xlu1 %526  ;;  %v548_v13 = vpop.xlane.xlu0 %547  ;;  %v767_v42 = vsel %vm766_vm8, %v687_v3, %v648_v16  ;;  %v1171_v6 = vld [vmem:[%s3354_s5 + $0x30] sm:$0xff] }
 0x196   :  { %v710_v40 = vrot.slane %v527_v12, %v624_v17  ;;  %v744_v58 = vrot.slane %v548_v13, %v617_v8  ;;  %v839_v16 = vld [vmem:[%s3353_s2 + $0x190] sm:$0xff] }
 0x197   :  { %v843_v55 = vld [vmem:[%s3353_s2 + $0x1b0] sm:$0xff] }
 0x198   :  { %v711_v63 = vsel %vm626_vm4, %v710_v40, %v706_v57  ;;  %v805_v40 = vld [vmem:[%s3353_s2 + $0x80] sm:$0xff]  ;;  %v1194_v57 = vld [vmem:[%s3354_s5 + $0xe8] sm:$0xff] }
 0x199   :  { %v533_v27 = vpop.xlane.xlu1 %532  ;;  %v545_v28 = vpop.xlane.xlu0 %544  ;;  %v716_v7 = vsel %vm633_vm5, %v715_v52, %v711_v63  ;;  %v1192_v63 = vld [vmem:[%s3354_s5 + $0xd8] sm:$0xff]  ;;  %v1174_v52 = vld [vmem:[%s3354_s5 + $0x48] sm:$0xff] }
 0x19a   :  { %v739_v39 = vrot.slane %v545_v28, %v2538_v62 }
 0x19d   :  { %v539_v46 = vpop.xlane.xlu1 %538  ;;  %v554_v47 = vpop.xlane.xlu0 %553 }
 0x19e   :  { %v730_v51 = vrot.slane %v539_v46, %v2536_v61  ;;  %v720_v61 = vrot.slane %v533_v27, %v638_v32  ;;  %v754_v11 = vrot.slane %v554_v47, %v631_v30  ;;  %v845_v30 = vld [vmem:[%s3353_s2 + $0x1c0] sm:$0xff]  ;;  %v798_v46 = vld [vmem:[%s3353_s2 + $0x48] sm:$0xff] }
 0x19f   :  { %874 = vmatpush1.msra.mxu1 %v845_v30  ;;  %v797_v47 = vld [vmem:[%s3353_s2 + $0x40] sm:$0xff]  ;;  %v842_v30 = vld [vmem:[%s3353_s2 + $0x1a8] sm:$0xff] }
 0x1a0   :  { %v735_v59 = vsel %vm605_vm1, %v734_v50, %v730_v51  ;;  %v721_v10 = vsel %vm640_vm6, %v720_v61, %v716_v7  ;;  %v789_v50 = vld [vmem:[%s3353_s2] sm:$0xff]  ;;  %v848_v51 = vld [vmem:[%s3353_s2 + $0x1d8] sm:$0xff]  ;;  %v1186_v7 = vld [vmem:[%s3354_s5 + $0xa8] sm:$0xff] }
 0x1a1   :  { %v740_v38 = vsel %vm612_vm2, %v739_v39, %v735_v59  ;;  %v536_v0 = vpop.xlane.xlu1 %535  ;;  %v551_v1 = vpop.xlane.xlu0 %550  ;;  %v1195_v39 = vld [vmem:[%s3354_s5 + $0xf0] sm:$0xff]  ;;  %v1193_v59 = vld [vmem:[%s3354_s5 + $0xe0] sm:$0xff]  ;;  %v1176_v61 = vld [vmem:[%s3354_s5 + $0x58] sm:$0xff] }
 0x1a2   :  { %v725_v2 = vrot.slane %v536_v0, %v645_v31  ;;  %v745_v62 = vsel %vm619_vm3, %v744_v58, %v740_v38  ;;  %v749_v41 = vrot.slane %v551_v1, %v624_v17  ;;  %1880 = vmatprep.subr.mxu0 %v1195_v39  ;;  %v1178_v58 = vld [vmem:[%s3354_s5 + $0x68] sm:$0xff]  ;;  %v1191_v38 = vld [vmem:[%s3354_s5 + $0xd0] sm:$0xff]  ;;  %v836_v39 = vld [vmem:[%s3353_s2 + $0x178] sm:$0xff] }
 0x1a3   :  { %1881 = vmatpush3.msra.mxu0 %v1179_v56  ;;  %v1175_v0 = vld [vmem:[%s3354_s5 + $0x50] sm:$0xff]  ;;  %v1190_v1 = vld [vmem:[%s3354_s5 + $0xc8] sm:$0xff] }
 0x1a4   :  { %v750_v8 = vsel %vm626_vm4, %v749_v41, %v745_v62  ;;  %v726_v14 = vsel %vm647_vm7, %v725_v2, %v721_v10  ;;  %1882 = vmatprep.subr.mxu0 %v1194_v57  ;;  %v1189_v2 = vld [vmem:[%s3354_s5 + $0xc0] sm:$0xff]  ;;  %v1188_v41 = vld [vmem:[%s3354_s5 + $0xb8] sm:$0xff]  ;;  %v835_v56 = vld [vmem:[%s3353_s2 + $0x170] sm:$0xff] }
 0x1a5   :  { %v560_v12 = vpop.xlane.xlu1 %559  ;;  %v557_v13 = vpop.xlane.xlu0 %556  ;;  %v755_v17 = vsel %vm633_vm5, %v754_v11, %v750_v8  ;;  %v769_v20 = vsel %vm768_vm9, %v726_v14, %v767_v42  ;;  %1883 = vmatpush3.msra.mxu0 %v1178_v58  ;;  %v1173_v62 = vld [vmem:[%s3354_s5 + $0x40] sm:$0xff]  ;;  %v1170_v8 = vld [vmem:[%s3354_s5 + $0x28] sm:$0xff]  ;;  %v824_v42 = vld [vmem:[%s3353_s2 + $0x118] sm:$0xff] }
 0x1a6   :  { %v764_v15 = vrot.slane %v560_v12, %v645_v31  ;;  %v759_v49 = vrot.slane %v557_v13, %v638_v32  ;;  %v838_v31 = vld [vmem:[%s3353_s2 + $0x188] sm:$0xff]  ;;  %v837_v32 = vld [vmem:[%s3353_s2 + $0x180] sm:$0xff]  ;;  %1884 = vmatprep.subr.mxu0 %v1193_v59  ;;  %v828_v57 = vld [vmem:[%s3353_s2 + $0x138] sm:$0xff] }
 0x1a7   :  { %875 = vmatprep.subr.mxu1 %v838_v31  ;;  %1885 = vmatpush3.msra.mxu0 %v1177_v60  ;;  %v841_v31 = vld [vmem:[%s3353_s2 + $0x1a0] sm:$0xff]  ;;  %v827_v58 = vld [vmem:[%s3353_s2 + $0x130] sm:$0xff]  ;;  %v820_v59 = vld [vmem:[%s3353_s2 + $0xf8] sm:$0xff] }
 0x1a8   :  { %v760_v18 = vsel %vm640_vm6, %v759_v49, %v755_v17  ;;  %876 = vmatpush1.msra.mxu1 %v837_v32  ;;  %1886 = vmatprep.subr.mxu0 %v1192_v63  ;;  %v840_v49 = vld [vmem:[%s3353_s2 + $0x198] sm:$0xff]  ;;  %v834_v32 = vld [vmem:[%s3353_s2 + $0x168] sm:$0xff]  ;;  %v819_v60 = vld [vmem:[%s3353_s2 + $0xf0] sm:$0xff] }
 0x1a9   :  { %v765_v19 = vsel %vm647_vm7, %v764_v15, %v760_v18  ;;  %877 = vmatprep.subr.mxu1 %v830_v33  ;;  %1887 = vmatpush3.msra.mxu0 %v1176_v61  ;;  %v847_v15 = vld [vmem:[%s3353_s2 + $0x1d0] sm:$0xff]  ;;  %v832_v17 = vld [vmem:[%s3353_s2 + $0x158] sm:$0xff]  ;;  %v833_v33 = vld [vmem:[%s3353_s2 + $0x160] sm:$0xff] }
 0x1aa   :  { %v771_v21 = vsel %vm770_vm10, %v765_v19, %v769_v20  ;;  %878 = vmatpush1.msra.mxu1 %v829_v34  ;;  %1888 = vmatprep.subr.mxu0 %v1191_v38  ;;  %v831_v18 = vld [vmem:[%s3353_s2 + $0x150] sm:$0xff]  ;;  %v816_v20 = vld [vmem:[%s3353_s2 + $0xd8] sm:$0xff]  ;;  %v826_v34 = vld [vmem:[%s3353_s2 + $0x128] sm:$0xff] }
 0x1ab   :  { %v773_v22 = vsel %vm563_vm11, %v771_v21, -1e+30  ;;  %879 = vmatprep.subr.mxu1 %v822_v35  ;;  %1889 = vmatpush3.msra.mxu0 %v1175_v0  ;;  %v823_v19 = vld [vmem:[%s3353_s2 + $0x110] sm:$0xff]  ;;  %v825_v35 = vld [vmem:[%s3353_s2 + $0x120] sm:$0xff]  ;;  %v812_v63 = vld [vmem:[%s3353_s2 + $0xb8] sm:$0xff] }
 0x1ac   :  { %v775_v23 = vsel %vm774_vm12, %v773_v22, -inf  ;;  %880 = vmatpush1.msra.mxu1 %v821_v36  ;;  %1890 = vmatprep.subr.mxu0 %v1190_v1  ;;  %v815_v21 = vld [vmem:[%s3353_s2 + $0xd0] sm:$0xff]  ;;  %v818_v36 = vld [vmem:[%s3353_s2 + $0xe8] sm:$0xff]  ;;  %v804_v38 = vld [vmem:[%s3353_s2 + $0x78] sm:$0xff] }
 0x1ad   :  { %776 = vmax.xlane.f32.xlu0 %v775_v23  ;;  %881 = vmatprep.subr.mxu1 %v814_v37  ;;  %v807_v23 = vld [vmem:[%s3353_s2 + $0x90] sm:$0xff]  ;;  %v817_v37 = vld [vmem:[%s3353_s2 + $0xe0] sm:$0xff]  ;;  %v796_v1 = vld [vmem:[%s3353_s2 + $0x38] sm:$0xff] }
 0x1ae   :  { %882 = vmatpush1.msra.mxu1 %v813_v43  ;;  %1891 = vmatpush3.msra.mxu0 %v1174_v52  ;;  %v810_v43 = vld [vmem:[%s3353_s2 + $0xa8] sm:$0xff]  ;;  %v811_v61 = vld [vmem:[%s3353_s2 + $0xb0] sm:$0xff] }
 0x1af   :  { %883 = vmatprep.subr.mxu1 %v806_v44  ;;  %1892 = vmatprep.subr.mxu0 %v1189_v2  ;;  %v809_v44 = vld [vmem:[%s3353_s2 + $0xa0] sm:$0xff]  ;;  %v803_v0 = vld [vmem:[%s3353_s2 + $0x70] sm:$0xff]  ;;  %v1228_v2 = vld [vmem:[%s3354_s5 + $0x1f8] sm:$0xff] }
 0x1b0   :  { %884 = vmatpush1.msra.mxu1 %v805_v40  ;;  %1893 = vmatpush3.msra.mxu0 %v1173_v62  ;;  %v802_v40 = vld [vmem:[%s3353_s2 + $0x68] sm:$0xff]  ;;  %v795_v52 = vld [vmem:[%s3353_s2 + $0x30] sm:$0xff]  ;;  %v1212_v62 = vld [vmem:[%s3354_s5 + $0x178] sm:$0xff] }
 0x1b1   :  { %885 = vmatprep.subr.mxu1 %v798_v46  ;;  %1894 = vmatprep.subr.mxu0 %v1188_v41  ;;  %v801_v46 = vld [vmem:[%s3353_s2 + $0x60] sm:$0xff]  ;;  %v1227_v41 = vld [vmem:[%s3354_s5 + $0x1f0] sm:$0xff] }
 0x1b2   :  { %886 = vmatpush1.msra.mxu1 %v797_v47  ;;  %1895 = vmatpush3.msra.mxu0 %v1172_v4  ;;  %v794_v47 = vld [vmem:[%s3353_s2 + $0x28] sm:$0xff]  ;;  %v1211_v4 = vld [vmem:[%s3354_s5 + $0x170] sm:$0xff] }
 0x1b3   :  { %887 = vmatprep.subr.mxu1 %v790_v48  ;;  %1896 = vmatprep.subr.mxu0 %v1187_v5  ;;  %v793_v48 = vld [vmem:[%s3353_s2 + $0x20] sm:$0xff]  ;;  %v1226_v5 = vld [vmem:[%s3354_s5 + $0x1e8] sm:$0xff] }
 0x1b4   :  { %888 = vmatpush1.msra.mxu1 %v789_v50  ;;  %1897 = vmatpush3.msra.mxu0 %v1171_v6  ;;  %v852_v50 = vld [vmem:[%s3353_s2 + $0x1f8] sm:$0xff]  ;;  %v1210_v6 = vld [vmem:[%s3354_s5 + $0x168] sm:$0xff] }
 0x1b5   :  { %944 = vmatprep.subr.mxu1 %v848_v51  ;;  %1898 = vmatprep.subr.mxu0 %v1186_v7  ;;  %v851_v51 = vld [vmem:[%s3353_s2 + $0x1f0] sm:$0xff]  ;;  %v1225_v7 = vld [vmem:[%s3354_s5 + $0x1e0] sm:$0xff] }
 0x1b6   :  { %1899 = vmatpush3.msra.mxu0 %v1170_v8  ;;  %v1169_v8 = vld [vmem:[%s3354_s5 + $0x20] sm:$0xff] }
 0x1b7   :  { %1900 = vmatprep.subr.mxu0 %v1185_v9  ;;  %v1209_v9 = vld [vmem:[%s3354_s5 + $0x160] sm:$0xff] }
 0x1b8   :  { %1901 = vmatpush3.msra.mxu0 %v1169_v8 }
 0x236   :  { %v777_v24 = vpop.xlane.xlu0 %776 }
 0x237   :  { %v778_v25 = vsub.f32 %v773_v22, %v777_v24  ;;  %v808_v22 = vld [vmem:[%s3353_s2 + $0x98] sm:$0xff] }
 0x238   :  { %v800_v24 = vld [vmem:[%s3353_s2 + $0x58] sm:$0xff] }
 0x239   :  { %v779_v26 = vmul.f32 1.442695, %v778_v25  ;;  %v799_v25 = vld [vmem:[%s3353_s2 + $0x50] sm:$0xff] }
 0x23b   :  { %2240 = vpow2.f32 %v779_v26  ;;  %v792_v26 = vld [vmem:[%s3353_s2 + $0x18] sm:$0xff] }
 0x248   :  { %v2595_v27 = vpop.eup %2240 }
 0x249   :  { %v781_v28 = vsel %vm774_vm12, %v2595_v27, 0.0 }
 0x24a   :  { %782 = vadd.xlane.f32.xlu1 %v781_v28  ;;  %v850_v28 = vld [vmem:[%s3353_s2 + $0x1e8] sm:$0xff] }
 0x2d3   :  { %v783_v3 = vpop.xlane.xlu1 %782 }
 0x2d4   :  { %2242 = vrcp.f32 %v783_v3 }
 0x2e1   :  { %v2243_v10 = vpop.eup %2242 }
 0x2e2   :  { %v785_v11 = vmul.f32 %v2243_v10, %v783_v3  ;;  %v1184_v3 = vld [vmem:[%s3354_s5 + $0x98] sm:$0xff] }
 0x2e3   :  { %1902 = vmatprep.subr.mxu0 %v1184_v3  ;;  %v1236_v3 = vld [vmem:[%s3354_s5 + $0x238] sm:$0xff] }
 0x2e4   :  { %v786_v12 = vsub.f32 2.0, %v785_v11  ;;  %v1168_v11 = vld [vmem:[%s3354_s5 + $0x18] sm:$0xff] }
 0x2e5   :  { %1903 = vmatpush3.msra.mxu0 %v1168_v11  ;;  %v1251_v11 = vld [vmem:[%s3354_s5 + $0x2b0] sm:$0xff] }
 0x2e6   :  { %v787_v13 = vmul.f32 %v2243_v10, %v786_v12  ;;  %v1224_v10 = vld [vmem:[%s3354_s5 + $0x1d8] sm:$0xff] }
 0x2e7   :  { %v1208_v12 = vld [vmem:[%s3354_s5 + $0x158] sm:$0xff] }
 0x2e8   :  { %v2720_v14 = vmul.f32 %v2595_v27, %v787_v13  ;;  %v791_v27 = vld [vmem:[%s3353_s2 + $0x10] sm:$0xff] }
 0x2e9   :  { %v1183_v13 = vld [vmem:[%s3354_s5 + $0x90] sm:$0xff] }
 0x2ea   :  { %1837 = vmatmul.mubr.msk.f32.vlgmr.msra.gmra.mxu1 %vm853_vm13, %v2720_v14  ;;  %1904 = vmatprep.subr.mxu0 %v1183_v13  ;;  %v1235_v13 = vld [vmem:[%s3354_s5 + $0x230] sm:$0xff] }
 0x2eb   :  { %945 = vmatpush1.msra.mxu1 %v847_v15  ;;  %992 = vmatprep.mubr.f32.mxu1 %v2248_v45  ;;  %v1167_v15 = vld [vmem:[%s3354_s5 + $0x10] sm:$0xff] }
 0x2ec   :  { %946 = vmatprep.subr.mxu1 %v840_v49  ;;  %v1207_v49 = vld [vmem:[%s3354_s5 + $0x150] sm:$0xff]  ;;  %1905 = vmatpush3.msra.mxu0 %v1167_v15  ;;  %v1250_v15 = vld [vmem:[%s3354_s5 + $0x2a8] sm:$0xff] }
 0x2ed   :  { %947 = vmatpush1.msra.mxu1 %v839_v16  ;;  %v1182_v16 = vld [vmem:[%s3354_s5 + $0x88] sm:$0xff] }
 0x2ee   :  { %948 = vmatprep.subr.mxu1 %v832_v17  ;;  %v1222_v17 = vld [vmem:[%s3354_s5 + $0x1c8] sm:$0xff]  ;;  %1906 = vmatprep.subr.mxu0 %v1182_v16 }
 0x2ef   :  { %949 = vmatpush1.msra.mxu1 %v831_v18  ;;  %v1166_v18 = vld [vmem:[%s3354_s5 + $0x8] sm:$0xff] }
 0x2f0   :  { %950 = vmatprep.subr.mxu1 %v824_v42  ;;  %v1206_v42 = vld [vmem:[%s3354_s5 + $0x148] sm:$0xff]  ;;  %1907 = vmatpush3.msra.mxu0 %v1166_v18  ;;  %v1249_v18 = vld [vmem:[%s3354_s5 + $0x2a0] sm:$0xff] }
 0x2f1   :  { %951 = vmatpush1.msra.mxu1 %v823_v19  ;;  %v1181_v19 = vld [vmem:[%s3354_s5 + $0x80] sm:$0xff]  ;;  %v1234_v16 = vld [vmem:[%s3354_s5 + $0x228] sm:$0xff] }
 0x2f2   :  { %952 = vmatprep.subr.mxu1 %v816_v20  ;;  %v1221_v20 = vld [vmem:[%s3354_s5 + $0x1c0] sm:$0xff]  ;;  %1908 = vmatprep.subr.mxu0 %v1181_v19 }
 0x2f3   :  { %953 = vmatpush1.msra.mxu1 %v815_v21  ;;  %v1165_v21 = vld [vmem:[%s3354_s5] sm:$0xff] }
 0x2f4   :  { %954 = vmatprep.subr.mxu1 %v808_v22  ;;  %v1205_v22 = vld [vmem:[%s3354_s5 + $0x140] sm:$0xff]  ;;  %1909 = vmatpush3.msra.mxu0 %v1165_v21  ;;  %v1248_v21 = vld [vmem:[%s3354_s5 + $0x298] sm:$0xff] }
 0x2f5   :  { %955 = vmatpush1.msra.mxu1 %v807_v23  ;;  %v1220_v23 = vld [vmem:[%s3354_s5 + $0x1b8] sm:$0xff]  ;;  %v1233_v19 = vld [vmem:[%s3354_s5 + $0x220] sm:$0xff] }
 0x2f6   :  { %956 = vmatprep.subr.mxu1 %v800_v24  ;;  %v1260_v24 = vld [vmem:[%s3354_s5 + $0x2f8] sm:$0xff] }
 0x2f7   :  { %957 = vmatpush1.msra.mxu1 %v799_v25  ;;  %1948 = vmatprep.subr.mxu0 %v1260_v24  ;;  %v1204_v25 = vld [vmem:[%s3354_s5 + $0x138] sm:$0xff] }
 0x2f8   :  { %958 = vmatprep.subr.mxu1 %v792_v26  ;;  %v1219_v26 = vld [vmem:[%s3354_s5 + $0x1b0] sm:$0xff]  ;;  %v1232_v24 = vld [vmem:[%s3354_s5 + $0x218] sm:$0xff] }
 0x2f9   :  { %959 = vmatpush1.msra.mxu1 %v791_v27  ;;  %v1203_v27 = vld [vmem:[%s3354_s5 + $0x130] sm:$0xff] }
 0x2fa   :  { %1838 = vmatmul.mubr.msk.f32.vlgmr.msra.gmra.mxu1 %vm853_vm13, %v2720_v14  ;;  %1015 = vmatprep.subr.mxu1 %v850_v28  ;;  %v1218_v28 = vld [vmem:[%s3354_s5 + $0x1a8] sm:$0xff] }
 0x2fb   :  { %1016 = vmatpush1.msra.mxu1 %v849_v29  ;;  %1063 = vmatprep.mubr.f32.mxu1 %v2248_v45  ;;  %v1202_v29 = vld [vmem:[%s3354_s5 + $0x128] sm:$0xff] }
 0x2fc   :  { %1017 = vmatprep.subr.mxu1 %v842_v30  ;;  %v1217_v30 = vld [vmem:[%s3354_s5 + $0x1a0] sm:$0xff] }
 0x2fd   :  { %1018 = vmatpush1.msra.mxu1 %v841_v31  ;;  %v1201_v31 = vld [vmem:[%s3354_s5 + $0x120] sm:$0xff] }
 0x2fe   :  { %1019 = vmatprep.subr.mxu1 %v834_v32  ;;  %v1216_v32 = vld [vmem:[%s3354_s5 + $0x198] sm:$0xff] }
 0x2ff   :  { %1020 = vmatpush1.msra.mxu1 %v833_v33  ;;  %v1200_v33 = vld [vmem:[%s3354_s5 + $0x118] sm:$0xff] }
 0x300   :  { %1021 = vmatprep.subr.mxu1 %v826_v34  ;;  %v1215_v34 = vld [vmem:[%s3354_s5 + $0x190] sm:$0xff] }
 0x301   :  { %1022 = vmatpush1.msra.mxu1 %v825_v35  ;;  %v1199_v35 = vld [vmem:[%s3354_s5 + $0x110] sm:$0xff] }
 0x302   :  { %1023 = vmatprep.subr.mxu1 %v818_v36  ;;  %v1214_v36 = vld [vmem:[%s3354_s5 + $0x188] sm:$0xff] }
 0x303   :  { %1024 = vmatpush1.msra.mxu1 %v817_v37  ;;  %v1198_v37 = vld [vmem:[%s3354_s5 + $0x108] sm:$0xff] }
 0x304   :  { %1025 = vmatprep.subr.mxu1 %v810_v43  ;;  %v1213_v43 = vld [vmem:[%s3354_s5 + $0x180] sm:$0xff] }
 0x305   :  { %1026 = vmatpush1.msra.mxu1 %v809_v44  ;;  %v1197_v44 = vld [vmem:[%s3354_s5 + $0x100] sm:$0xff] }
 0x306   :  { %1027 = vmatprep.subr.mxu1 %v802_v40  ;;  %v1292_v40 = vld [vmem:[%s3354_s5 + $0x3f8] sm:$0xff] }
 0x307   :  { %1028 = vmatpush1.msra.mxu1 %v801_v46 }
 0x308   :  { %1029 = vmatprep.subr.mxu1 %v794_v47 }
 0x309   :  { %1030 = vmatpush1.msra.mxu1 %v793_v48  ;;  %v1141_v48 = vld [vmem:[%s3355_s1] sm:$0xff] }
 0x30a   :  { %1839 = vmatmul.mubr.msk.f32.vlgmr.msra.gmra.mxu1 %vm853_vm13, %v2720_v14  ;;  %1086 = vmatprep.subr.mxu1 %v852_v50 }
 0x30b   :  { %1087 = vmatpush1.msra.mxu1 %v851_v51  ;;  %1134 = vmatprep.mubr.f32.mxu1 %v2248_v45 }
 0x30c   :  { %1088 = vmatprep.subr.mxu1 %v844_v54 }
 0x30d   :  { %1089 = vmatpush1.msra.mxu1 %v843_v55  ;;  %v1244_v55 = vld [vmem:[%s3354_s5 + $0x278] sm:$0xff] }
 0x30e   :  { %1090 = vmatprep.subr.mxu1 %v836_v39  ;;  %v1259_v39 = vld [vmem:[%s3354_s5 + $0x2f0] sm:$0xff] }
 0x30f   :  { %1091 = vmatpush1.msra.mxu1 %v835_v56  ;;  %v1243_v56 = vld [vmem:[%s3354_s5 + $0x270] sm:$0xff] }
 0x310   :  { %1092 = vmatprep.subr.mxu1 %v828_v57  ;;  %v1258_v57 = vld [vmem:[%s3354_s5 + $0x2e8] sm:$0xff] }
 0x311   :  { %1093 = vmatpush1.msra.mxu1 %v827_v58  ;;  %v1242_v58 = vld [vmem:[%s3354_s5 + $0x268] sm:$0xff] }
 0x312   :  { %1094 = vmatprep.subr.mxu1 %v820_v59  ;;  %v1257_v59 = vld [vmem:[%s3354_s5 + $0x2e0] sm:$0xff] }
 0x313   :  { %1095 = vmatpush1.msra.mxu1 %v819_v60  ;;  %v1241_v60 = vld [vmem:[%s3354_s5 + $0x260] sm:$0xff] }
 0x314   :  { %1096 = vmatprep.subr.mxu1 %v812_v63  ;;  %v1256_v63 = vld [vmem:[%s3354_s5 + $0x2d8] sm:$0xff] }
 0x315   :  { %1097 = vmatpush1.msra.mxu1 %v811_v61 }
 0x316   :  { %1098 = vmatprep.subr.mxu1 %v804_v38  ;;  %v1240_v38 = vld [vmem:[%s3354_s5 + $0x258] sm:$0xff] }
 0x317   :  { %1099 = vmatpush1.msra.mxu1 %v803_v0  ;;  %v1255_v0 = vld [vmem:[%s3354_s5 + $0x2d0] sm:$0xff] }
 0x318   :  { %1100 = vmatprep.subr.mxu1 %v796_v1 }
 0x319   :  { %1101 = vmatpush1.msra.mxu1 %v795_v52  ;;  %v1142_v52 = vld [vmem:[%s3355_s1 + $0x8] sm:$0xff] }
 0x31a   :  { %1840 = vmatmul.mubr.msk.f32.vlgmr.msra.gmra.mxu1 %vm853_vm13, %v2720_v14  ;;  %1913 = vmatprep.subr.mxu1 %v1228_v2  ;;  %v1223_v14 = vld [vmem:[%s3354_s5 + $0x1d0] sm:$0xff] }
 0x31b   :  { %1914 = vmatpush3.msra.mxu1 %v1212_v62  ;;  %v1239_v2 = vld [vmem:[%s3354_s5 + $0x250] sm:$0xff] }
 0x31c   :  { %1915 = vmatprep.subr.mxu1 %v1227_v41  ;;  %v1254_v41 = vld [vmem:[%s3354_s5 + $0x2c8] sm:$0xff] }
 0x31d   :  { %1916 = vmatpush3.msra.mxu1 %v1211_v4  ;;  %v1238_v4 = vld [vmem:[%s3354_s5 + $0x248] sm:$0xff] }
 0x31e   :  { %1917 = vmatprep.subr.mxu1 %v1226_v5 }
 0x31f   :  { %1918 = vmatpush3.msra.mxu1 %v1210_v6  ;;  %v1253_v6 = vld [vmem:[%s3354_s5 + $0x2c0] sm:$0xff] }
 0x320   :  { %1919 = vmatprep.subr.mxu1 %v1225_v7  ;;  %v1237_v7 = vld [vmem:[%s3354_s5 + $0x240] sm:$0xff] }
 0x321   :  { %1920 = vmatpush3.msra.mxu1 %v1209_v9  ;;  %v1252_v9 = vld [vmem:[%s3354_s5 + $0x2b8] sm:$0xff] }
 0x322   :  { %1921 = vmatprep.subr.mxu1 %v1224_v10  ;;  %v1276_v10 = vld [vmem:[%s3354_s5 + $0x378] sm:$0xff] }
 0x323   :  { %1922 = vmatpush3.msra.mxu1 %v1208_v12  ;;  %v1291_v12 = vld [vmem:[%s3354_s5 + $0x3f0] sm:$0xff] }
 0x324   :  { %1923 = vmatprep.subr.mxu1 %v1223_v14  ;;  %v1275_v14 = vld [vmem:[%s3354_s5 + $0x370] sm:$0xff] }
 0x325   :  { %1924 = vmatpush3.msra.mxu1 %v1207_v49  ;;  %v1290_v49 = vld [vmem:[%s3354_s5 + $0x3e8] sm:$0xff] }
 0x326   :  { %1925 = vmatprep.subr.mxu1 %v1222_v17  ;;  %v1274_v17 = vld [vmem:[%s3354_s5 + $0x368] sm:$0xff] }
 0x327   :  { %1926 = vmatpush3.msra.mxu1 %v1206_v42  ;;  %v1289_v42 = vld [vmem:[%s3354_s5 + $0x3e0] sm:$0xff] }
 0x328   :  { %1927 = vmatprep.subr.mxu1 %v1221_v20  ;;  %v1273_v20 = vld [vmem:[%s3354_s5 + $0x360] sm:$0xff] }
 0x329   :  { %1928 = vmatpush3.msra.mxu1 %v1205_v22  ;;  %v1288_v22 = vld [vmem:[%s3354_s5 + $0x3d8] sm:$0xff] }
 0x32a   :  { %1929 = vmatprep.subr.mxu1 %v1220_v23 }
 0x32b   :  { %1930 = vmatpush3.msra.mxu1 %v1204_v25  ;;  %v1272_v25 = vld [vmem:[%s3354_s5 + $0x358] sm:$0xff] }
 0x32c   :  { %1931 = vmatprep.subr.mxu1 %v1219_v26  ;;  %v1247_v26 = vld [vmem:[%s3354_s5 + $0x290] sm:$0xff] }
 0x32d   :  { %1932 = vmatpush3.msra.mxu1 %v1203_v27  ;;  %v1287_v27 = vld [vmem:[%s3354_s5 + $0x3d0] sm:$0xff] }
 0x32e   :  { %1933 = vmatprep.subr.mxu1 %v1218_v28 }
 0x32f   :  { %1934 = vmatpush3.msra.mxu1 %v1202_v29  ;;  %v1143_v29 = vld [vmem:[%s3355_s1 + $0x10] sm:$0xff] }
 0x330   :  { %1935 = vmatprep.subr.mxu1 %v1217_v30  ;;  %v1231_v30 = vld [vmem:[%s3354_s5 + $0x210] sm:$0xff] }
 0x331   :  { %1936 = vmatpush3.msra.mxu1 %v1201_v31  ;;  %v1271_v31 = vld [vmem:[%s3354_s5 + $0x350] sm:$0xff] }
 0x332   :  { %1937 = vmatprep.subr.mxu1 %v1216_v32 }
 0x333   :  { %1938 = vmatpush3.msra.mxu1 %v1200_v33  ;;  %v1246_v33 = vld [vmem:[%s3354_s5 + $0x288] sm:$0xff] }
 0x334   :  { %1939 = vmatprep.subr.mxu1 %v1215_v34  ;;  %v1286_v34 = vld [vmem:[%s3354_s5 + $0x3c8] sm:$0xff] }
 0x335   :  { %1940 = vmatpush3.msra.mxu1 %v1199_v35  ;;  %v1230_v35 = vld [vmem:[%s3354_s5 + $0x208] sm:$0xff] }
 0x336   :  { %1941 = vmatprep.subr.mxu1 %v1214_v36  ;;  %v1270_v36 = vld [vmem:[%s3354_s5 + $0x348] sm:$0xff] }
 0x337   :  { %1942 = vmatpush3.msra.mxu1 %v1198_v37 }
 0x338   :  { %1943 = vmatprep.subr.mxu1 %v1213_v43  ;;  %v1245_v43 = vld [vmem:[%s3354_s5 + $0x280] sm:$0xff] }
 0x339   :  { %1944 = vmatpush3.msra.mxu1 %v1197_v44  ;;  %v1285_v44 = vld [vmem:[%s3354_s5 + $0x3c0] sm:$0xff] }
 0x33a   :  { %1983 = vmatprep.subr.mxu1 %v1292_v40  ;;  %v1229_v40 = vld [vmem:[%s3354_s5 + $0x200] sm:$0xff] }
 0x3aa   :  { %v923_v46 = vpop.f32.mrf.mxu1 }
 0x3ac   :  { %v925_v47 = vpop.f32.mrf.mxu1 }
 0x3ad   :  { %v1153_v50 = vcombine.low %v923_v46, %v925_v47  ;;  %v1269_v47 = vld [vmem:[%s3354_s5 + $0x340] sm:$0xff] }
 0x3af   :  { %v1161_v51 = vmul.f32 %v1153_v50, %v1141_v48  ;;  %v1284_v48 = vld [vmem:[%s3354_s5 + $0x3b8] sm:$0xff] }
 0x3b0   :  { %v1268_v50 = vld [vmem:[%s3354_s5 + $0x338] sm:$0xff] }
 0x3b1   :  { %v1304_v54 = vcombine.high %v1161_v51, %v1161_v51 }
 0x3b3   :  { %1376 = vmatprep.mubr.f32.mxu0 %v1304_v54  ;;  %v1267_v54 = vld [vmem:[%s3354_s5 + $0x330] sm:$0xff] }
 0x3b4   :  { %1377 = vmatmul.mubr.f32.vlgmr.msra.gmra.mxu0 %v1161_v51  ;;  %v1283_v51 = vld [vmem:[%s3354_s5 + $0x3b0] sm:$0xff] }
 0x3b5   :  { %1949 = vmatpush3.msra.mxu0 %v1244_v55  ;;  %v1282_v55 = vld [vmem:[%s3354_s5 + $0x3a8] sm:$0xff] }
 0x3b6   :  { %1950 = vmatprep.subr.mxu0 %v1259_v39  ;;  %v1266_v39 = vld [vmem:[%s3354_s5 + $0x328] sm:$0xff] }
 0x3b7   :  { %1951 = vmatpush3.msra.mxu0 %v1243_v56  ;;  %v1281_v56 = vld [vmem:[%s3354_s5 + $0x3a0] sm:$0xff] }
 0x3b8   :  { %1952 = vmatprep.subr.mxu0 %v1258_v57  ;;  %v1265_v57 = vld [vmem:[%s3354_s5 + $0x320] sm:$0xff] }
 0x3b9   :  { %1953 = vmatpush3.msra.mxu0 %v1242_v58 }
 0x3ba   :  { %v994_v61 = vpop.f32.mrf.mxu1  ;;  %1954 = vmatprep.subr.mxu0 %v1257_v59  ;;  %v1280_v59 = vld [vmem:[%s3354_s5 + $0x398] sm:$0xff] }
 0x3bb   :  { %1955 = vmatpush3.msra.mxu0 %v1241_v60  ;;  %v1264_v60 = vld [vmem:[%s3354_s5 + $0x318] sm:$0xff] }
 0x3bc   :  { %v996_v1 = vpop.f32.mrf.mxu1  ;;  %1956 = vmatprep.subr.mxu0 %v1256_v63 }
 0x3bd   :  { %v1154_v62 = vcombine.low %v994_v61, %v996_v1  ;;  %1957 = vmatpush3.msra.mxu0 %v1240_v38  ;;  %v1144_v61 = vld [vmem:[%s3355_s1 + $0x18] sm:$0xff]  ;;  %v1279_v38 = vld [vmem:[%s3354_s5 + $0x390] sm:$0xff] }
 0x3be   :  { %1958 = vmatprep.subr.mxu0 %v1255_v0  ;;  %v1263_v1 = vld [vmem:[%s3354_s5 + $0x310] sm:$0xff] }
 0x3bf   :  { %v1162_v5 = vmul.f32 %v1154_v62, %v1142_v52  ;;  %1959 = vmatpush3.msra.mxu0 %v1239_v2  ;;  %v1278_v52 = vld [vmem:[%s3354_s5 + $0x388] sm:$0xff] }
 0x3c0   :  { %1960 = vmatprep.subr.mxu0 %v1254_v41  ;;  %v1262_v62 = vld [vmem:[%s3354_s5 + $0x308] sm:$0xff]  ;;  %v1277_v41 = vld [vmem:[%s3354_s5 + $0x380] sm:$0xff] }
 0x3c1   :  { %1961 = vmatpush3.msra.mxu0 %v1238_v4  ;;  %v1305_v8 = vcombine.high %v1162_v5, %v1162_v5  ;;  %v1261_v4 = vld [vmem:[%s3354_s5 + $0x300] sm:$0xff] }
 0x3c2   :  { %1962 = vmatprep.subr.mxu0 %v1253_v6  ;;  %v1608_v6 = vld [vmem:[%s3356_s7 + $0x78] sm:$0xff] }
 0x3c3   :  { %1446 = vmatprep.mubr.f32.mxu1 %v1305_v8  ;;  %1963 = vmatpush3.msra.mxu0 %v1237_v7  ;;  %v1607_v7 = vld [vmem:[%s3356_s7 + $0x70] sm:$0xff]  ;;  %v1606_v8 = vld [vmem:[%s3356_s7 + $0x68] sm:$0xff] }
 0x3c4   :  { %1447 = vmatmul.mubr.f32.vlgmr.msra.gmra.mxu1 %v1162_v5  ;;  %1964 = vmatprep.subr.mxu0 %v1252_v9  ;;  %v1605_v9 = vld [vmem:[%s3356_s7 + $0x60] sm:$0xff] }
 0x3c5   :  { %1965 = vmatpush3.msra.mxu0 %v1236_v3  ;;  %1984 = vmatpush3.msra.mxu1 %v1276_v10  ;;  %v1604_v3 = vld [vmem:[%s3356_s7 + $0x58] sm:$0xff]  ;;  %v1603_v10 = vld [vmem:[%s3356_s7 + $0x50] sm:$0xff] }
 0x3c6   :  { %1966 = vmatprep.subr.mxu0 %v1251_v11  ;;  %1985 = vmatprep.subr.mxu1 %v1291_v12  ;;  %v1602_v11 = vld [vmem:[%s3356_s7 + $0x48] sm:$0xff]  ;;  %v1601_v12 = vld [vmem:[%s3356_s7 + $0x40] sm:$0xff] }
 0x3c7   :  { %1967 = vmatpush3.msra.mxu0 %v1235_v13  ;;  %1986 = vmatpush3.msra.mxu1 %v1275_v14  ;;  %v1600_v13 = vld [vmem:[%s3356_s7 + $0x38] sm:$0xff]  ;;  %v1599_v14 = vld [vmem:[%s3356_s7 + $0x30] sm:$0xff] }
 0x3c8   :  { %1968 = vmatprep.subr.mxu0 %v1250_v15  ;;  %1987 = vmatprep.subr.mxu1 %v1290_v49  ;;  %v1598_v15 = vld [vmem:[%s3356_s7 + $0x28] sm:$0xff]  ;;  %v1597_v49 = vld [vmem:[%s3356_s7 + $0x20] sm:$0xff] }
 0x3c9   :  { %1969 = vmatpush3.msra.mxu0 %v1234_v16  ;;  %1988 = vmatpush3.msra.mxu1 %v1274_v17  ;;  %v1596_v16 = vld [vmem:[%s3356_s7 + $0x18] sm:$0xff]  ;;  %v1595_v17 = vld [vmem:[%s3356_s7 + $0x10] sm:$0xff] }
 0x3ca   :  { %v1065_v23 = vpop.f32.mrf.mxu1  ;;  %1970 = vmatprep.subr.mxu0 %v1249_v18  ;;  %1989 = vmatprep.subr.mxu1 %v1289_v42  ;;  %v1594_v18 = vld [vmem:[%s3356_s7 + $0x8] sm:$0xff]  ;;  %v1593_v42 = vld [vmem:[%s3356_s7] sm:$0xff] }
 0x3cb   :  { %1971 = vmatpush3.msra.mxu0 %v1233_v19  ;;  %1990 = vmatpush3.msra.mxu1 %v1273_v20  ;;  %v1702_v19 = vld [vmem:[%s3357_s9 + $0x78] sm:$0xff]  ;;  %v1701_v20 = vld [vmem:[%s3357_s9 + $0x70] sm:$0xff] }
 0x3cc   :  { %v1067_v28 = vpop.f32.mrf.mxu1  ;;  %1972 = vmatprep.subr.mxu0 %v1248_v21  ;;  %1991 = vmatprep.subr.mxu1 %v1288_v22  ;;  %v1700_v21 = vld [vmem:[%s3357_s9 + $0x68] sm:$0xff]  ;;  %v1699_v22 = vld [vmem:[%s3357_s9 + $0x60] sm:$0xff] }
 0x3cd   :  { %v1155_v32 = vcombine.low %v1065_v23, %v1067_v28  ;;  %1973 = vmatpush3.msra.mxu0 %v1232_v24  ;;  %1992 = vmatpush3.msra.mxu1 %v1272_v25  ;;  %v1698_v23 = vld [vmem:[%s3357_s9 + $0x58] sm:$0xff]  ;;  %v1697_v24 = vld [vmem:[%s3357_s9 + $0x50] sm:$0xff]  ;;  %v1696_v25 = vld [vmem:[%s3357_s9 + $0x48] sm:$0xff] }
 0x3ce   :  { %1974 = vmatprep.subr.mxu0 %v1247_v26  ;;  %1993 = vmatprep.subr.mxu1 %v1287_v27  ;;  %v1695_v26 = vld [vmem:[%s3357_s9 + $0x40] sm:$0xff]  ;;  %v1694_v27 = vld [vmem:[%s3357_s9 + $0x38] sm:$0xff]  ;;  %v1693_v28 = vld [vmem:[%s3357_s9 + $0x30] sm:$0xff] }
 0x3cf   :  { %v1163_v37 = vmul.f32 %v1155_v32, %v1143_v29  ;;  %1975 = vmatpush3.msra.mxu0 %v1231_v30  ;;  %1994 = vmatpush3.msra.mxu1 %v1271_v31  ;;  %v1692_v29 = vld [vmem:[%s3357_s9 + $0x28] sm:$0xff]  ;;  %v1691_v30 = vld [vmem:[%s3357_s9 + $0x20] sm:$0xff]  ;;  %v1690_v31 = vld [vmem:[%s3357_s9 + $0x18] sm:$0xff] }
 0x3d0   :  { %1976 = vmatprep.subr.mxu0 %v1246_v33  ;;  %1995 = vmatprep.subr.mxu1 %v1286_v34 }
 0x3d1   :  { %1977 = vmatpush3.msra.mxu0 %v1230_v35  ;;  %1996 = vmatpush3.msra.mxu1 %v1270_v36  ;;  %v1306_v46 = vcombine.high %v1163_v37, %v1163_v37 }
 0x3d2   :  { %1978 = vmatprep.subr.mxu0 %v1245_v43  ;;  %1997 = vmatprep.subr.mxu1 %v1285_v44  ;;  %v1841_v43 = vld [vmem:[%s3358_s6] ss:$0 sm:$0xff] }
 0x3d3   :  { %1979 = vmatpush3.msra.mxu0 %v1229_v40  ;;  %1516 = vmatprep.mubr.f32.mxu0 %v1306_v46 }
 0x3d4   :  { %1998 = vmatpush3.msra.mxu1 %v1269_v47  ;;  %1517 = vmatmul.mubr.f32.vlgmr.msra.gmra.mxu0 %v1163_v37 }
 0x3d5   :  { %1999 = vmatprep.subr.mxu1 %v1284_v48  ;;  %2104 = vmatprep.subr.mxu0 %v2248_v45 }
 0x3d6   :  { %2000 = vmatpush3.msra.mxu1 %v1268_v50  ;;  %2105 = vmatpush3.msra.mxu0 %v1608_v6 }
 0x3d7   :  { %2001 = vmatprep.subr.mxu1 %v1283_v51  ;;  %2106 = vmatprep.subr.mxu0 %v2248_v45 }
 0x3d8   :  { %2002 = vmatpush3.msra.mxu1 %v1267_v54  ;;  %2107 = vmatpush3.msra.mxu0 %v1607_v7 }
 0x3d9   :  { %2003 = vmatprep.subr.mxu1 %v1282_v55  ;;  %2108 = vmatprep.subr.mxu0 %v2248_v45 }
 0x3da   :  { %2004 = vmatpush3.msra.mxu1 %v1266_v39  ;;  %v1136_v58 = vpop.f32.mrf.mxu1  ;;  %2109 = vmatpush3.msra.mxu0 %v1606_v8 }
 0x3db   :  { %2005 = vmatprep.subr.mxu1 %v1281_v56  ;;  %2110 = vmatprep.subr.mxu0 %v2248_v45 }
 0x3dc   :  { %2006 = vmatpush3.msra.mxu1 %v1265_v57  ;;  %v1138_v63 = vpop.f32.mrf.mxu1  ;;  %2111 = vmatpush3.msra.mxu0 %v1605_v9  ;;  %v1689_v57 = vld [vmem:[%s3357_s9 + $0x10] sm:$0xff] }
 0x3dd   :  { %v1156_v0 = vcombine.low %v1136_v58, %v1138_v63  ;;  %2007 = vmatprep.subr.mxu1 %v1280_v59  ;;  %2112 = vmatprep.subr.mxu0 %v2248_v45  ;;  %v1688_v58 = vld [vmem:[%s3357_s9 + $0x8] sm:$0xff]  ;;  %v1687_v59 = vld [vmem:[%s3357_s9] sm:$0xff] }
 0x3de   :  { %2008 = vmatpush3.msra.mxu1 %v1264_v60  ;;  %2113 = vmatpush3.msra.mxu0 %v1604_v3  ;;  %v1842_v60 = vld [vmem:[%s3359_s8] ss:$0 sm:$0xff] }
 0x3df   :  { %v1164_v2 = vmul.f32 %v1156_v0, %v1144_v61  ;;  %2009 = vmatprep.subr.mxu1 %v1279_v38  ;;  %2114 = vmatprep.subr.mxu0 %v2248_v45 }
 0x3e0   :  { %2010 = vmatpush3.msra.mxu1 %v1263_v1  ;;  %2115 = vmatpush3.msra.mxu0 %v1603_v10 }
 0x3e1   :  { %2011 = vmatprep.subr.mxu1 %v1278_v52  ;;  %v1307_v5 = vcombine.high %v1164_v2, %v1164_v2  ;;  %2116 = vmatprep.subr.mxu0 %v2248_v45 }
 0x3e2   :  { %2012 = vmatpush3.msra.mxu1 %v1262_v62  ;;  %2117 = vmatpush3.msra.mxu0 %v1602_v11 }
 0x3e3   :  { %2013 = vmatprep.subr.mxu1 %v1277_v41  ;;  %1586 = vmatprep.mubr.f32.mxu1 %v1307_v5 }
 0x3e4   :  { %2014 = vmatpush3.msra.mxu1 %v1261_v4  ;;  %2118 = vmatprep.subr.mxu0 %v2248_v45 }
 0x3e5   :  { %1587 = vmatmul.mubr.f32.vlgmr.msra.gmra.mxu1 %v1164_v2  ;;  %2139 = vmatprep.subr.mxu1 %v2248_v45 }
 0x3e6   :  { %2119 = vmatpush3.msra.mxu0 %v1601_v12  ;;  %2136 = vmatprep.mubr.msk.f32.mxu0 %vm2249_vm14, %v2248_v45 }
 0x3e7   :  { %2120 = vmatprep.subr.mxu0 %v2248_v45  ;;  %2171 = vmatprep.mubr.msk.f32.mxu1 %vm2249_vm14, %v2248_v45 }
 0x3e8   :  { %2121 = vmatpush3.msra.mxu0 %v1600_v13  ;;  %2140 = vmatpush3.msra.mxu1 %v1702_v19 }
 0x3e9   :  { %2122 = vmatprep.subr.mxu0 %v2248_v45  ;;  %2141 = vmatprep.subr.mxu1 %v2248_v45 }
 0x3ea   :  { %2123 = vmatpush3.msra.mxu0 %v1599_v14  ;;  %2142 = vmatpush3.msra.mxu1 %v1701_v20 }
 0x3eb   :  { %2124 = vmatprep.subr.mxu0 %v2248_v45  ;;  %2143 = vmatprep.subr.mxu1 %v2248_v45 }
 0x3ec   :  { %2125 = vmatpush3.msra.mxu0 %v1598_v15  ;;  %2144 = vmatpush3.msra.mxu1 %v1700_v21 }
 0x3ed   :  { %2126 = vmatprep.subr.mxu0 %v2248_v45  ;;  %2145 = vmatprep.subr.mxu1 %v2248_v45 }
 0x3ee   :  { %2127 = vmatpush3.msra.mxu0 %v1597_v49  ;;  %2146 = vmatpush3.msra.mxu1 %v1699_v22 }
 0x3ef   :  { %2128 = vmatprep.subr.mxu0 %v2248_v45  ;;  %2147 = vmatprep.subr.mxu1 %v2248_v45 }
 0x3f0   :  { %2129 = vmatpush3.msra.mxu0 %v1596_v16  ;;  %2148 = vmatpush3.msra.mxu1 %v1698_v23 }
 0x3f1   :  { %2130 = vmatprep.subr.mxu0 %v2248_v45  ;;  %2149 = vmatprep.subr.mxu1 %v2248_v45 }
 0x3f2   :  { %2131 = vmatpush3.msra.mxu0 %v1595_v17  ;;  %2150 = vmatpush3.msra.mxu1 %v1697_v24 }
 0x3f3   :  { %2132 = vmatprep.subr.mxu0 %v2248_v45  ;;  %2151 = vmatprep.subr.mxu1 %v2248_v45 }
 0x3f4   :  { %2133 = vmatpush3.msra.mxu0 %v1594_v18  ;;  %2152 = vmatpush3.msra.mxu1 %v1696_v25 }
 0x3f5   :  { %2134 = vmatprep.subr.mxu0 %v2248_v45  ;;  %2153 = vmatprep.subr.mxu1 %v2248_v45 }
 0x3f6   :  { %2135 = vmatpush3.msra.mxu0 %v1593_v42  ;;  %2154 = vmatpush3.msra.mxu1 %v1695_v26 }
 0x3f7   :  { %2155 = vmatprep.subr.mxu1 %v2248_v45 }
 0x3f8   :  { %2156 = vmatpush3.msra.mxu1 %v1694_v27 }
 0x3f9   :  { %2157 = vmatprep.subr.mxu1 %v2248_v45 }
 0x3fa   :  { %2158 = vmatpush3.msra.mxu1 %v1693_v28 }
 0x3fb   :  { %2159 = vmatprep.subr.mxu1 %v2248_v45 }
 0x3fc   :  { %2160 = vmatpush3.msra.mxu1 %v1692_v29 }
 0x3fd   :  { %2161 = vmatprep.subr.mxu1 %v2248_v45 }
 0x3fe   :  { %2162 = vmatpush3.msra.mxu1 %v1691_v30 }
 0x3ff   :  { %2163 = vmatprep.subr.mxu1 %v2248_v45 }
 0x400   :  { %2164 = vmatpush3.msra.mxu1 %v1690_v31 }
 0x401   :  { %2165 = vmatprep.subr.mxu1 %v2248_v45 }
 0x402   :  { %2166 = vmatpush3.msra.mxu1 %v1689_v57 }
 0x403   :  { %2167 = vmatprep.subr.mxu1 %v2248_v45 }
 0x404   :  { %2168 = vmatpush3.msra.mxu1 %v1688_v58 }
 0x405   :  { %2169 = vmatprep.subr.mxu1 %v2248_v45  ;;  %v1843_v45 = vld [vmem:[%s3361_s10] ss:$0 sm:$0xff] }
 0x406   :  { %2170 = vmatpush3.msra.mxu1 %v1687_v59 }
 0x474   :  { %v1910_v32 = vpop.f32.mrf.mxu0 }
 0x476   :  { %v1911_v33 = vpop.f32.mrf.mxu0 }
 0x477   :  { %v1912_v37 = vadd.f32 %v1911_v33, %v1910_v32 }
 0x479   :  { %v1379_v46 = vadd.f32 %v1912_v37, %v1841_v43 }
 0x484   :  { %v1945_v34 = vpop.f32.mrf.mxu1 }
 0x486   :  { %v1946_v36 = vpop.f32.mrf.mxu1 }
 0x487   :  { %v1947_v40 = vadd.f32 %v1946_v36, %v1945_v34 }
 0x489   :  { %v1449_v50 = vadd.f32 %v1947_v40, %v1379_v46 }
 0x494   :  { %v1980_v35 = vpop.f32.mrf.mxu0 }
 0x496   :  { %v1981_v44 = vpop.f32.mrf.mxu0 }
 0x497   :  { %v1982_v47 = vadd.f32 %v1981_v44, %v1980_v35 }
 0x499   :  { %v1519_v54 = vadd.f32 %v1982_v47, %v1449_v50 }
 0x4a5   :  { %v2015_v48 = vpop.f32.mrf.mxu1 }
 0x4a7   :  { %v2016_v51 = vpop.f32.mrf.mxu1 }
 0x4a8   :  { %v2017_v55 = vadd.f32 %v2016_v51, %v2015_v48 }
 0x4aa   :  { %v1589_v39 = vadd.f32 %v2017_v55, %v1519_v54 }
 0x4ac   :  { %v1592_v56 = vmax.f32 %v1589_v39, 0.0 }
 0x4ae   :  { %2137 = vmatmul.mubr.f32.vlgmr.msra.gmra.mxu0 %v1592_v56 }
 0x56e   :  { %v1682_v63 = vpop.f32.mrf.mxu0 }
 0x56f   :  { %v1683_v61 = vadd.f32 %v1842_v60, %v1682_v63 }
 0x570   :  { %v2138_v38 = vpop.f32.mrf.mxu0 }
 0x571   :  { %v1686_v0 = vmax.f32 %v1683_v61, 0.0 }
 0x573   :  { %1797 = vst [vmem:[%s3360_s11] sm:$0xf] %v1686_v0  ;;  %2172 = vmatmul.mubr.f32.vlgmr.msra.gmra.mxu1 %v1686_v0 }
 0x633   :  { %v1776_v1 = vpop.f32.mrf.mxu1 }
 0x634   :  { %v1777_v52 = vadd.f32 %v1843_v45, %v1776_v1 }
 0x635   :  { %v2173_v2 = vpop.f32.mrf.mxu1 }
 0x636   :  { %1798 = vst [vmem:[%s3360_s11 + $0x4] sm:$0xf] %v1777_v52  ;;  %v1781_v62 = vsel %vm1780_vm15, %v1777_v52, -1e+30 }
 0x637   :  { %v1783_v41 = vsel %vm1782_vm0, %v1781_v62, -inf }
 0x638   :  { %1784 = vmax.xlane.f32.xlu0 %v1783_v41 }
 0x6c1   :  { %v1785_v4 = vpop.xlane.xlu0 %1784 }
 0x6c2   :  { %v1786_v5 = vsub.f32 %v1781_v62, %v1785_v4 }
 0x6c4   :  { %v1787_v6 = vmul.f32 1.442695, %v1786_v5 }
 0x6c6   :  { %2244 = vpow2.f32 %v1787_v6 }
 0x6d3   :  { %v2245_v7 = vpop.eup %2244 }
 0x6d4   :  { %v1789_v8 = vsel %vm1782_vm0, %v2245_v7, 0.0 }
 0x6d5   :  { %1790 = vadd.xlane.f32.xlu1 %v1789_v8 }
 0x75e   :  { %v1791_v9 = vpop.xlane.xlu1 %1790 }
 0x75f   :  { %2246 = vrcp.f32 %v1791_v9 }
 0x76c   :  { %v2247_v53 = vpop.eup %2246 }
 0x76d   :  { %v1793_v3 = vmul.f32 %v2247_v53, %v1791_v9 }
 0x76f   :  { %v1794_v10 = vsub.f32 2.0, %v1793_v3 }
 0x771   :  { %v1795_v11 = vmul.f32 %v2247_v53, %v1794_v10 }
 0x773   :  { %v1796_v12 = vmul.f32 %v2245_v7, %v1795_v11 }
 0x775   :  { %1799 = vst [vmem:[%s3360_s11 + $0x8] sm:$0xf] %v1796_v12 }

</bundles_post_ra>
